<compile_context>
chip_gen: v7x
topology: tpu7x:2x2x1
jax: 0.10.0
libtpu: 0.0.40
codegen_flags: <defaults>
</compile_context>

<pallas_src>
import jax
import jax.numpy as jnp
from jax import lax
from jax.experimental import pallas as pl
from jax.experimental.pallas import tpu as pltpu

EPS = 1e-5
_PADW = 8   # left zero-pad width of the conv2 scratch; multiple of 8 keeps the interior
            # store sublane-aligned (reads at offsets _PADW-1.._PADW+1 are plain slices).


# --------------------------------- helpers ---------------------------------

def _pick_row_tile(rows, max_tile=256):
    """Largest multiple-of-8 divisor of `rows` that is <= max_tile (else full rows)."""
    if rows <= max_tile:
        return rows
    for t in range(max_tile - max_tile % 8, 7, -8):
        if rows % t == 0:
            return t
    return rows


def _stats_block(y):
    """(8, C) tile: row 0 = per-channel sums, rows 1..7 = per-channel sums of squares."""
    s = jnp.sum(y, axis=0, keepdims=True)          # (1, C)
    sq = jnp.sum(y * y, axis=0, keepdims=True)     # (1, C)
    row = lax.broadcasted_iota(jnp.int32, (8, y.shape[1]), 0)
    return jnp.where(row == 0, s, sq)


def _finalize_bn(st, n, gamma, beta):
    """Partial (sum, sumsq) tiles -> folded BN scale/bias (train-mode, biased var)."""
    total = jnp.sum(st, axis=0)                    # (8, C); row0=sum, row1=sumsq
    mean = total[0] / n
    var = total[1] / n - mean * mean
    scale = gamma / jnp.sqrt(var + EPS)
    bias = beta - mean * scale
    return scale.reshape(1, -1), bias.reshape(1, -1)


# --------------------------------- kernels ---------------------------------

def _conv1_kernel(x_ref, w1_ref, y_ref, st_ref):
    """conv1 (1x1) as a row-tile matmul + partial BN1 statistics."""
    y = jnp.dot(x_ref[...], w1_ref[...], preferred_element_type=jnp.float32)
    y_ref[...] = y
    st_ref[...] = _stats_block(y).reshape(st_ref.shape)


def _conv2_kernel(y1_ref, s1_ref, b1_ref, w2_ref, y2_ref, st_ref, pad_ref):
    """BN1-apply + ReLU + 3x3 same-conv (fused zero pad) + partial BN2 statistics."""
    _, H, W, Cw = y1_ref.shape
    n_rows = H * W

    # BN1 (folded scale/bias) + ReLU.
    y1n = jnp.maximum(
        y1_ref[0] * s1_ref[...].reshape(1, 1, Cw) + b1_ref[...].reshape(1, 1, Cw), 0.0)

    # Zero-padded image held in VMEM scratch: whole-scratch zero (cheap) then an
    # aligned interior store at (row 1, sublane offset _PADW).
    pad_ref[...] = jnp.zeros_like(pad_ref)
    pad_ref[1:H + 1, _PADW:_PADW + W, :] = y1n

    def tap(ky, kx):
        c0 = _PADW - 1 + kx
        return pad_ref[ky:ky + H, c0:c0 + W, :].reshape(n_rows, Cw)

    if Cw % 128 == 0:
        # Lane-aligned channels: single im2col matmul, K = 9*Cw (best MXU feeding).
        patches = jnp.concatenate(
            [tap(ky, kx) for ky in range(3) for kx in range(3)], axis=1)
        y2 = jnp.dot(patches, w2_ref[...], preferred_element_type=jnp.float32)
    else:
        # Narrow channels: 9 accumulated MXU dots (avoids lane-unaligned concat).
        y2 = jnp.zeros((n_rows, Cw), jnp.float32)
        for t, (ky, kx) in enumerate([(a, b) for a in range(3) for b in range(3)]):
            y2 = y2 + jnp.dot(tap(ky, kx), w2_ref[t * Cw:(t + 1) * Cw, :],
                              preferred_element_type=jnp.float32)

    y2_ref[...] = y2.reshape(1, H, W, Cw)
    st_ref[...] = _stats_block(y2).reshape(st_ref.shape)


def _conv3_kernel(y2_ref, s2_ref, b2_ref, w3_ref, y3_ref, st_ref):
    """BN2-apply + ReLU + conv3 (1x1 matmul) + partial BN3 statistics."""
    y2n = jnp.maximum(y2_ref[...] * s2_ref[...] + b2_ref[...], 0.0)
    y3 = jnp.dot(y2n, w3_ref[...], preferred_element_type=jnp.float32)
    y3_ref[...] = y3
    st_ref[...] = _stats_block(y3).reshape(st_ref.shape)


def _bn3_residual_kernel(y3_ref, x_ref, s3_ref, b3_ref, o_ref):
    """BN3-apply + residual add + ReLU, lane-dense (rows, W*C) layout."""
    o_ref[...] = jnp.maximum(y3_ref[...] * s3_ref[...] + b3_ref[...] + x_ref[...], 0.0)


# --------------------------------- wrapper ---------------------------------

def bottleneck_forward(x_nchw, params, row_tile=256):
    """Pallas implementation of Bottleneck.forward (NCHW in / NCHW out)."""
    w1, w2, w3, g1, b1, g2, b2, g3, b3 = params
    B, Cin, H, W = x_nchw.shape
    Cw = w1.shape[1]
    Cout = w3.shape[1]
    assert Cin == Cout, "residual path requires inplanes == planes (downsample=None)"
    n = B * H * W

    x_nhwc = jnp.transpose(x_nchw, (0, 2, 3, 1)).astype(jnp.float32)
    x_rows = x_nhwc.reshape(n, Cin)

    parallel = pltpu.CompilerParams(dimension_semantics=("parallel",))

    # ---- pass 1: conv1 (1x1) + partial BN1 stats, row-tiled & pipelined --------------
    tr = _pick_row_tile(n, row_tile)
    nt = n // tr
    y1, st1 = pl.pallas_call(
        _conv1_kernel,
        grid=(nt,),
        in_specs=[pl.BlockSpec((tr, Cin), lambda i: (i, 0)),
                  pl.BlockSpec((Cin, Cw), lambda i: (0, 0))],
        out_specs=(pl.BlockSpec((tr, Cw), lambda i: (i, 0)),
                   pl.BlockSpec((1, 8, Cw), lambda i: (i, 0, 0))),
        out_shape=(jax.ShapeDtypeStruct((n, Cw), jnp.float32),
                   jax.ShapeDtypeStruct((nt, 8, Cw), jnp.float32)),
        compiler_params=parallel,
    )(x_rows, w1)
    scale1, bias1 = _finalize_bn(st1, n, g1, b1)

    # ---- pass 2: BN1 + ReLU + conv2 (3x3, fused pad) + partial BN2 stats -------------
    w2_flat = w2.reshape(9 * Cw, Cw)                 # (ky,kx,ci,co) -> (tap*ci, co)
    pad_w = W + _PADW + 8
    y2, st2 = pl.pallas_call(
        _conv2_kernel,
        grid=(B,),
        in_specs=[pl.BlockSpec((1, H, W, Cw), lambda b: (b, 0, 0, 0)),
                  pl.BlockSpec((1, Cw), lambda b: (0, 0)),
                  pl.BlockSpec((1, Cw), lambda b: (0, 0)),
                  pl.BlockSpec((9 * Cw, Cw), lambda b: (0, 0))],
        out_specs=(pl.BlockSpec((1, H, W, Cw), lambda b: (b, 0, 0, 0)),
                   pl.BlockSpec((1, 8, Cw), lambda b: (b, 0, 0))),
        out_shape=(jax.ShapeDtypeStruct((B, H, W, Cw), jnp.float32),
                   jax.ShapeDtypeStruct((B, 8, Cw), jnp.float32)),
        scratch_shapes=[pltpu.VMEM((H + 2, pad_w, Cw), jnp.float32)],
        compiler_params=parallel,
    )(y1.reshape(B, H, W, Cw), scale1, bias1, w2_flat)
    scale2, bias2 = _finalize_bn(st2, n, g2, b2)

    # ---- pass 3: BN2 + ReLU + conv3 (1x1) + partial BN3 stats ------------------------
    y3, st3 = pl.pallas_call(
        _conv3_kernel,
        grid=(nt,),
        in_specs=[pl.BlockSpec((tr, Cw), lambda i: (i, 0)),
                  pl.BlockSpec((1, Cw), lambda i: (0, 0)),
                  pl.BlockSpec((1, Cw), lambda i: (0, 0)),
                  pl.BlockSpec((Cw, Cout), lambda i: (0, 0))],
        out_specs=(pl.BlockSpec((tr, Cout), lambda i: (i, 0)),
                   pl.BlockSpec((1, 8, Cout), lambda i: (i, 0, 0))),
        out_shape=(jax.ShapeDtypeStruct((n, Cout), jnp.float32),
                   jax.ShapeDtypeStruct((nt, 8, Cout), jnp.float32)),
        compiler_params=parallel,
    )(y2.reshape(n, Cw), scale2, bias2, w3)
    scale3, bias3 = _finalize_bn(st3, n, g3, b3)

    # ---- pass 4: BN3 + residual + ReLU, lane-dense (B*H, W*C) layout -----------------
    rows2, cols = B * H, W * Cout
    tr2 = _pick_row_tile(rows2, row_tile)
    nt2 = rows2 // tr2
    scale3t = jnp.tile(scale3, (1, W))               # column index = w*Cout + c
    bias3t = jnp.tile(bias3, (1, W))
    out = pl.pallas_call(
        _bn3_residual_kernel,
        grid=(nt2,),
        in_specs=[pl.BlockSpec((tr2, cols), lambda i: (i, 0)),
                  pl.BlockSpec((tr2, cols), lambda i: (i, 0)),
                  pl.BlockSpec((1, cols), lambda i: (0, 0)),
                  pl.BlockSpec((1, cols), lambda i: (0, 0))],
        out_specs=pl.BlockSpec((tr2, cols), lambda i: (i, 0)),
        out_shape=jax.ShapeDtypeStruct((rows2, cols), jnp.float32),
        compiler_params=parallel,
    )(y3.reshape(rows2, cols), x_nhwc.reshape(rows2, cols), scale3t, bias3t)

    return jnp.transpose(out.reshape(B, H, W, Cout), (0, 3, 1, 2))   # back to NCHW


# ----------------------- pure-JAX reference (for verification) -----------------------

def _conv2d(x, w_oihw, padding=0):
    return lax.conv_general_dilated(
        x, w_oihw, window_strides=(1, 1),
        padding=[(padding, padding), (padding, padding)],
        dimension_numbers=("NCHW", "OIHW", "NCHW"))


def _bn_train_nchw(x, g, b):
    mean = x.mean(axis=(0, 2, 3), keepdims=True)
    var = ((x - mean) ** 2).mean(axis=(0, 2, 3), keepdims=True)
    return (x - mean) / jnp.sqrt(var + EPS) * g.reshape(1, -1, 1, 1) + b.reshape(1, -1, 1, 1)


def bottleneck_reference(x, params):
    (w1, w2, w3, g1, b1, g2, b2, g3, b3) = params
    Cw, Cout = w1.shape[1], w3.shape[1]
    w1_o = jnp.transpose(w1, (1, 0)).reshape(Cw, w1.shape[0], 1, 1)
    w2_o = jnp.transpose(w2, (3, 2, 0, 1))                  # (co, ci, kh, kw)
    w3_o = jnp.transpose(w3, (1, 0)).reshape(Cout, Cw, 1, 1)
    out = jax.nn.relu(_bn_train_nchw(_conv2d(x, w1_o), g1, b1))
    out = jax.nn.relu(_bn_train_nchw(_conv2d(out, w2_o, padding=1), g2, b2))
    out = _bn_train_nchw(_conv2d(out, w3_o), g3, b3)
    return jax.nn.relu(out + x)


if __name__ == "__main__":
    key = jax.random.PRNGKey(0)
    B, C, H, W = 2, 8, 16, 16                 # inplanes = planes = 8 -> width = 8
    inplanes = planes = width = C

    ks = jax.random.split(key, 10)
    x = jax.random.normal(ks[0], (B, C, H, W), jnp.float32)
    w1 = 0.2 * jax.random.normal(ks[1], (inplanes, width), jnp.float32)      # conv1 (ci,co)
    w2 = 0.2 * jax.random.normal(ks[2], (3, 3, width, width), jnp.float32)   # (ky,kx,ci,co)
    w3 = 0.2 * jax.random.normal(ks[3], (width, planes), jnp.float32)        # conv3 (ci,co)
    g1 = 1.0 + 0.1 * jax.random.normal(ks[4], (width,), jnp.float32)
    b1 = 0.1 * jax.random.normal(ks[5], (width,), jnp.float32)
    g2 = 1.0 + 0.1 * jax.random.normal(ks[6], (width,), jnp.float32)
    b2 = 0.1 * jax.random.normal(ks[7], (width,), jnp.float32)
    g3 = 1.0 + 0.1 * jax.random.normal(ks[8], (planes,), jnp.float32)
    b3 = 0.1 * jax.random.normal(ks[9], (planes,), jnp.float32)
    params = (w1, w2, w3, g1, b1, g2, b2, g3, b3)

    fwd = jax.jit(bottleneck_forward)
    out = jax.block_until_ready(fwd(x, params))
    ref = jax.block_until_ready(bottleneck_reference(x, params))

    assert out.shape == (B, C, H, W)
    max_err = float(jnp.max(jnp.abs(out - ref)))
    assert jnp.allclose(out, ref, atol=1e-3, rtol=1e-3), f"max abs err = {max_err}"
    print("KERNEL_OK")
</pallas_src>

<mosaic_0001>
module attributes {stable_mosaic.version = 11 : i64} {
  func.func @_conv1_kernel(%arg0: i32, %arg1: memref<256x8xf32, #tpu.memory_space<vmem>>, %arg2: memref<8x8xf32, #tpu.memory_space<vmem>>, %arg3: memref<256x8xf32, #tpu.memory_space<vmem>>, %arg4: memref<1x8x8xf32, #tpu.memory_space<vmem>>) attributes {dimension_semantics = [#tpu.dimension_semantics<parallel>], iteration_bounds = array<i64: 2>, scalar_prefetch = 0 : i64, scratch_operands = 0 : i64, tpu.core_type = #tpu.core_type<tc>, window_params = [{transform_indices = @transform_0, window_bounds = array<i64: 256, 8>}, {pipeline_mode = #tpu.pipeline_mode<synchronous>, transform_indices = @transform_1, window_bounds = array<i64: 8, 8>}, {transform_indices = @transform_2, window_bounds = array<i64: 256, 8>}, {transform_indices = @transform_3, window_bounds = array<i64: 1, 8, 8>}]} {
    %c0 = arith.constant 0 : index
    %c0_0 = arith.constant 0 : index
    %0 = vector.load %arg1[%c0, %c0_0] : memref<256x8xf32, #tpu.memory_space<vmem>>, vector<256x8xf32>
    %c0_1 = arith.constant 0 : index
    %c0_2 = arith.constant 0 : index
    %1 = vector.load %arg2[%c0_1, %c0_2] : memref<8x8xf32, #tpu.memory_space<vmem>>, vector<8x8xf32>
    %cst = arith.constant dense<0.000000e+00> : vector<256x8xf32>
    %2 = tpu.matmul %0, %1, %cst {dimension_numbers = #tpu.dot_dimension_numbers<[1], [0], [0], [1], [0, 0, 1, 1], [], []>} : vector<256x8xf32>, vector<8x8xf32>, vector<256x8xf32> -> vector<256x8xf32>
    %c0_3 = arith.constant 0 : index
    %c0_4 = arith.constant 0 : index
    %3 = vector.load %arg3[%c0_3, %c0_4] : memref<256x8xf32, #tpu.memory_space<vmem>>, vector<256x8xf32>
    tpu.vector_store %arg3[%c0_3, %c0_4], %2 {strides = array<i32>} : memref<256x8xf32, #tpu.memory_space<vmem>>, vector<256x8xf32>,
    %cst_5 = arith.constant dense<0.000000e+00> : vector<8xf32>
    %4 = vector.multi_reduction <add>, %2, %cst_5 [0] : vector<256x8xf32> to vector<8xf32>
    %5 = vector.shape_cast %4 : vector<8xf32> to vector<1x8xf32>
    %6 = arith.mulf %2, %2 : vector<256x8xf32>
    %cst_6 = arith.constant dense<0.000000e+00> : vector<8xf32>
    %7 = vector.multi_reduction <add>, %6, %cst_6 [0] : vector<256x8xf32> to vector<8xf32>
    %8 = vector.shape_cast %7 : vector<8xf32> to vector<1x8xf32>
    %9 = tpu.iota {dimensions = array<i32: 0>} : vector<8x8xi32>
    %c0_i32 = arith.constant 0 : i32
    %10 = vector.broadcast %c0_i32 : i32 to vector<8x8xi32>
    %11 = arith.cmpi eq, %9, %10 : vector<8x8xi32>
    %12 = vector.shape_cast %5 : vector<1x8xf32> to vector<1x8xf32>
    %13 = vector.broadcast %12 : vector<1x8xf32> to vector<8x8xf32>
    %14 = vector.shape_cast %8 : vector<1x8xf32> to vector<1x8xf32>
    %15 = vector.broadcast %14 : vector<1x8xf32> to vector<8x8xf32>
    %16 = arith.select %11, %13, %15 : vector<8x8xi1>, vector<8x8xf32>
    %17 = vector.shape_cast %16 : vector<8x8xf32> to vector<1x8x8xf32>
    %c0_7 = arith.constant 0 : index
    %c0_8 = arith.constant 0 : index
    %c0_9 = arith.constant 0 : index
    %18 = vector.load %arg4[%c0_7, %c0_8, %c0_9] : memref<1x8x8xf32, #tpu.memory_space<vmem>>, vector<1x8x8xf32>
    tpu.vector_store %arg4[%c0_7, %c0_8, %c0_9], %17 {strides = array<i32>} : memref<1x8x8xf32, #tpu.memory_space<vmem>>, vector<1x8x8xf32>,
    return
  }
  func.func @transform_0(%arg0: i32) -> (i32, i32) {
    %c0_i32 = arith.constant 0 : i32
    %c0_i32_0 = arith.constant 0 : i32
    return %arg0, %c0_i32 : i32, i32
  }
  func.func @transform_1(%arg0: i32) -> (i32, i32) {
    %c0_i32 = arith.constant 0 : i32
    %c0_i32_0 = arith.constant 0 : i32
    %c0_i32_1 = arith.constant 0 : i32
    return %c0_i32, %c0_i32_0 : i32, i32
  }
  func.func @transform_2(%arg0: i32) -> (i32, i32) {
    %c0_i32 = arith.constant 0 : i32
    %c0_i32_0 = arith.constant 0 : i32
    return %arg0, %c0_i32 : i32, i32
  }
  func.func @transform_3(%arg0: i32) -> (i32, i32, i32) {
    %c0_i32 = arith.constant 0 : i32
    %c0_i32_0 = arith.constant 0 : i32
    %c0_i32_1 = arith.constant 0 : i32
    return %arg0, %c0_i32, %c0_i32_0 : i32, i32, i32
  }
}

module attributes {stable_mosaic.version = 11 : i64} {
  func.func @_conv3_kernel(%arg0: i32, %arg1: memref<256x8xf32, #tpu.memory_space<vmem>>, %arg2: memref<1x8xf32, #tpu.memory_space<vmem>>, %arg3: memref<1x8xf32, #tpu.memory_space<vmem>>, %arg4: memref<8x8xf32, #tpu.memory_space<vmem>>, %arg5: memref<256x8xf32, #tpu.memory_space<vmem>>, %arg6: memref<1x8x8xf32, #tpu.memory_space<vmem>>) attributes {dimension_semantics = [#tpu.dimension_semantics<parallel>], iteration_bounds = array<i64: 2>, scalar_prefetch = 0 : i64, scratch_operands = 0 : i64, tpu.core_type = #tpu.core_type<tc>, window_params = [{transform_indices = @transform_0, window_bounds = array<i64: 256, 8>}, {pipeline_mode = #tpu.pipeline_mode<synchronous>, transform_indices = @transform_1, window_bounds = array<i64: 1, 8>}, {pipeline_mode = #tpu.pipeline_mode<synchronous>, transform_indices = @transform_2, window_bounds = array<i64: 1, 8>}, {pipeline_mode = #tpu.pipeline_mode<synchronous>, transform_indices = @transform_3, window_bounds = array<i64: 8, 8>}, {transform_indices = @transform_4, window_bounds = array<i64: 256, 8>}, {transform_indices = @transform_5, window_bounds = array<i64: 1, 8, 8>}]} {
    %c0 = arith.constant 0 : index
    %c0_0 = arith.constant 0 : index
    %0 = vector.load %arg1[%c0, %c0_0] : memref<256x8xf32, #tpu.memory_space<vmem>>, vector<256x8xf32>
    %c0_1 = arith.constant 0 : index
    %c0_2 = arith.constant 0 : index
    %1 = vector.load %arg2[%c0_1, %c0_2] : memref<1x8xf32, #tpu.memory_space<vmem>>, vector<1x8xf32>
    %2 = vector.broadcast %1 : vector<1x8xf32> to vector<256x8xf32>
    %3 = arith.mulf %0, %2 : vector<256x8xf32>
    %c0_3 = arith.constant 0 : index
    %c0_4 = arith.constant 0 : index
    %4 = vector.load %arg3[%c0_3, %c0_4] : memref<1x8xf32, #tpu.memory_space<vmem>>, vector<1x8xf32>
    %5 = vector.broadcast %4 : vector<1x8xf32> to vector<256x8xf32>
    %6 = arith.addf %3, %5 : vector<256x8xf32>
    %cst = arith.constant 0.000000e+00 : f32
    %7 = vector.broadcast %cst : f32 to vector<256x8xf32>
    %8 = arith.maximumf %6, %7 : vector<256x8xf32>
    %c0_5 = arith.constant 0 : index
    %c0_6 = arith.constant 0 : index
    %9 = vector.load %arg4[%c0_5, %c0_6] : memref<8x8xf32, #tpu.memory_space<vmem>>, vector<8x8xf32>
    %cst_7 = arith.constant dense<0.000000e+00> : vector<256x8xf32>
    %10 = tpu.matmul %8, %9, %cst_7 {dimension_numbers = #tpu.dot_dimension_numbers<[1], [0], [0], [1], [0, 0, 1, 1], [], []>} : vector<256x8xf32>, vector<8x8xf32>, vector<256x8xf32> -> vector<256x8xf32>
    %c0_8 = arith.constant 0 : index
    %c0_9 = arith.constant 0 : index
    %11 = vector.load %arg5[%c0_8, %c0_9] : memref<256x8xf32, #tpu.memory_space<vmem>>, vector<256x8xf32>
    tpu.vector_store %arg5[%c0_8, %c0_9], %10 {strides = array<i32>} : memref<256x8xf32, #tpu.memory_space<vmem>>, vector<256x8xf32>,
    %cst_10 = arith.constant dense<0.000000e+00> : vector<8xf32>
    %12 = vector.multi_reduction <add>, %10, %cst_10 [0] : vector<256x8xf32> to vector<8xf32>
    %13 = vector.shape_cast %12 : vector<8xf32> to vector<1x8xf32>
    %14 = arith.mulf %10, %10 : vector<256x8xf32>
    %cst_11 = arith.constant dense<0.000000e+00> : vector<8xf32>
    %15 = vector.multi_reduction <add>, %14, %cst_11 [0] : vector<256x8xf32> to vector<8xf32>
    %16 = vector.shape_cast %15 : vector<8xf32> to vector<1x8xf32>
    %17 = tpu.iota {dimensions = array<i32: 0>} : vector<8x8xi32>
    %c0_i32 = arith.constant 0 : i32
    %18 = vector.broadcast %c0_i32 : i32 to vector<8x8xi32>
    %19 = arith.cmpi eq, %17, %18 : vector<8x8xi32>
    %20 = vector.shape_cast %13 : vector<1x8xf32> to vector<1x8xf32>
    %21 = vector.broadcast %20 : vector<1x8xf32> to vector<8x8xf32>
    %22 = vector.shape_cast %16 : vector<1x8xf32> to vector<1x8xf32>
    %23 = vector.broadcast %22 : vector<1x8xf32> to vector<8x8xf32>
    %24 = arith.select %19, %21, %23 : vector<8x8xi1>, vector<8x8xf32>
    %25 = vector.shape_cast %24 : vector<8x8xf32> to vector<1x8x8xf32>
    %c0_12 = arith.constant 0 : index
    %c0_13 = arith.constant 0 : index
    %c0_14 = arith.constant 0 : index
    %26 = vector.load %arg6[%c0_12, %c0_13, %c0_14] : memref<1x8x8xf32, #tpu.memory_space<vmem>>, vector<1x8x8xf32>
    tpu.vector_store %arg6[%c0_12, %c0_13, %c0_14], %25 {strides = array<i32>} : memref<1x8x8xf32, #tpu.memory_space<vmem>>, vector<1x8x8xf32>,
    return
  }
  func.func @transform_0(%arg0: i32) -> (i32, i32) {
    %c0_i32 = arith.constant 0 : i32
    %c0_i32_0 = arith.constant 0 : i32
    return %arg0, %c0_i32 : i32, i32
  }
  func.func @transform_1(%arg0: i32) -> (i32, i32) {
    %c0_i32 = arith.constant 0 : i32
    %c0_i32_0 = arith.constant 0 : i32
    %c0_i32_1 = arith.constant 0 : i32
    return %c0_i32, %c0_i32_0 : i32, i32
  }
  func.func @transform_2(%arg0: i32) -> (i32, i32) {
    %c0_i32 = arith.constant 0 : i32
    %c0_i32_0 = arith.constant 0 : i32
    %c0_i32_1 = arith.constant 0 : i32
    return %c0_i32, %c0_i32_0 : i32, i32
  }
  func.func @transform_3(%arg0: i32) -> (i32, i32) {
    %c0_i32 = arith.constant 0 : i32
    %c0_i32_0 = arith.constant 0 : i32
    %c0_i32_1 = arith.constant 0 : i32
    return %c0_i32, %c0_i32_0 : i32, i32
  }
  func.func @transform_4(%arg0: i32) -> (i32, i32) {
    %c0_i32 = arith.constant 0 : i32
    %c0_i32_0 = arith.constant 0 : i32
    return %arg0, %c0_i32 : i32, i32
  }
  func.func @transform_5(%arg0: i32) -> (i32, i32, i32) {
    %c0_i32 = arith.constant 0 : i32
    %c0_i32_0 = arith.constant 0 : i32
    %c0_i32_1 = arith.constant 0 : i32
    return %arg0, %c0_i32, %c0_i32_0 : i32, i32, i32
  }
}

module attributes {stable_mosaic.version = 11 : i64} {
  func.func @_conv2_kernel(%arg0: i32, %arg1: memref<1x16x16x8xf32, #tpu.memory_space<vmem>>, %arg2: memref<1x8xf32, #tpu.memory_space<vmem>>, %arg3: memref<1x8xf32, #tpu.memory_space<vmem>>, %arg4: memref<72x8xf32, #tpu.memory_space<vmem>>, %arg5: memref<1x16x16x8xf32, #tpu.memory_space<vmem>>, %arg6: memref<1x8x8xf32, #tpu.memory_space<vmem>>, %arg7: memref<18x32x8xf32, #tpu.memory_space<vmem>>) attributes {dimension_semantics = [#tpu.dimension_semantics<parallel>], iteration_bounds = array<i64: 2>, scalar_prefetch = 0 : i64, scratch_operands = 1 : i64, tpu.core_type = #tpu.core_type<tc>, window_params = [{transform_indices = @transform_0, window_bounds = array<i64: 1, 16, 16, 8>}, {pipeline_mode = #tpu.pipeline_mode<synchronous>, transform_indices = @transform_1, window_bounds = array<i64: 1, 8>}, {pipeline_mode = #tpu.pipeline_mode<synchronous>, transform_indices = @transform_2, window_bounds = array<i64: 1, 8>}, {pipeline_mode = #tpu.pipeline_mode<synchronous>, transform_indices = @transform_3, window_bounds = array<i64: 72, 8>}, {transform_indices = @transform_4, window_bounds = array<i64: 1, 16, 16, 8>}, {transform_indices = @transform_5, window_bounds = array<i64: 1, 8, 8>}]} {
    %c0 = arith.constant 0 : index
    %c0_0 = arith.constant 0 : index
    %c0_1 = arith.constant 0 : index
    %c0_2 = arith.constant 0 : index
    %0 = vector.load %arg1[%c0, %c0_0, %c0_1, %c0_2] : memref<1x16x16x8xf32, #tpu.memory_space<vmem>>, vector<1x16x16x8xf32>
    %1 = vector.shape_cast %0 : vector<1x16x16x8xf32> to vector<16x16x8xf32>
    %c0_3 = arith.constant 0 : index
    %c0_4 = arith.constant 0 : index
    %2 = vector.load %arg2[%c0_3, %c0_4] : memref<1x8xf32, #tpu.memory_space<vmem>>, vector<1x8xf32>
    %3 = vector.shape_cast %2 : vector<1x8xf32> to vector<1x1x8xf32>
    %4 = vector.broadcast %3 : vector<1x1x8xf32> to vector<16x16x8xf32>
    %5 = arith.mulf %1, %4 : vector<16x16x8xf32>
    %c0_5 = arith.constant 0 : index
    %c0_6 = arith.constant 0 : index
    %6 = vector.load %arg3[%c0_5, %c0_6] : memref<1x8xf32, #tpu.memory_space<vmem>>, vector<1x8xf32>
    %7 = vector.shape_cast %6 : vector<1x8xf32> to vector<1x1x8xf32>
    %8 = vector.broadcast %7 : vector<1x1x8xf32> to vector<16x16x8xf32>
    %9 = arith.addf %5, %8 : vector<16x16x8xf32>
    %cst = arith.constant 0.000000e+00 : f32
    %10 = vector.broadcast %cst : f32 to vector<16x16x8xf32>
    %11 = arith.maximumf %9, %10 : vector<16x16x8xf32>
    %cst_7 = arith.constant 0.000000e+00 : f32
    %12 = vector.broadcast %cst_7 : f32 to vector<18x32x8xf32>
    %c0_8 = arith.constant 0 : index
    %c0_9 = arith.constant 0 : index
    %c0_10 = arith.constant 0 : index
    %13 = vector.load %arg7[%c0_8, %c0_9, %c0_10] : memref<18x32x8xf32, #tpu.memory_space<vmem>>, vector<18x32x8xf32>
    tpu.vector_store %arg7[%c0_8, %c0_9, %c0_10], %12 {strides = array<i32>} : memref<18x32x8xf32, #tpu.memory_space<vmem>>, vector<18x32x8xf32>,
    %c1 = arith.constant 1 : index
    %c8 = arith.constant 8 : index
    %c0_11 = arith.constant 0 : index
    %14 = vector.load %arg7[%c1, %c8, %c0_11] : memref<18x32x8xf32, #tpu.memory_space<vmem>>, vector<16x16x8xf32>
    tpu.vector_store %arg7[%c1, %c8, %c0_11], %11 {strides = array<i32>} : memref<18x32x8xf32, #tpu.memory_space<vmem>>, vector<16x16x8xf32>,
    %cst_12 = arith.constant 0.000000e+00 : f32
    %15 = vector.broadcast %cst_12 : f32 to vector<256x8xf32>
    %c0_13 = arith.constant 0 : index
    %c7 = arith.constant 7 : index
    %c0_14 = arith.constant 0 : index
    %16 = vector.load %arg7[%c0_13, %c7, %c0_14] : memref<18x32x8xf32, #tpu.memory_space<vmem>>, vector<16x16x8xf32>
    %17 = vector.shape_cast %16 : vector<16x16x8xf32> to vector<256x8xf32>
    %c0_15 = arith.constant 0 : index
    %c0_16 = arith.constant 0 : index
    %18 = vector.load %arg4[%c0_15, %c0_16] : memref<72x8xf32, #tpu.memory_space<vmem>>, vector<8x8xf32>
    %cst_17 = arith.constant dense<0.000000e+00> : vector<256x8xf32>
    %19 = tpu.matmul %17, %18, %cst_17 {dimension_numbers = #tpu.dot_dimension_numbers<[1], [0], [0], [1], [0, 0, 1, 1], [], []>} : vector<256x8xf32>, vector<8x8xf32>, vector<256x8xf32> -> vector<256x8xf32>
    %20 = arith.addf %15, %19 : vector<256x8xf32>
    %c0_18 = arith.constant 0 : index
    %c8_19 = arith.constant 8 : index
    %c0_20 = arith.constant 0 : index
    %21 = vector.load %arg7[%c0_18, %c8_19, %c0_20] : memref<18x32x8xf32, #tpu.memory_space<vmem>>, vector<16x16x8xf32>
    %22 = vector.shape_cast %21 : vector<16x16x8xf32> to vector<256x8xf32>
    %c8_21 = arith.constant 8 : index
    %c0_22 = arith.constant 0 : index
    %23 = vector.load %arg4[%c8_21, %c0_22] : memref<72x8xf32, #tpu.memory_space<vmem>>, vector<8x8xf32>
    %cst_23 = arith.constant dense<0.000000e+00> : vector<256x8xf32>
    %24 = tpu.matmul %22, %23, %cst_23 {dimension_numbers = #tpu.dot_dimension_numbers<[1], [0], [0], [1], [0, 0, 1, 1], [], []>} : vector<256x8xf32>, vector<8x8xf32>, vector<256x8xf32> -> vector<256x8xf32>
    %25 = arith.addf %20, %24 : vector<256x8xf32>
    %c0_24 = arith.constant 0 : index
    %c9 = arith.constant 9 : index
    %c0_25 = arith.constant 0 : index
    %26 = vector.load %arg7[%c0_24, %c9, %c0_25] : memref<18x32x8xf32, #tpu.memory_space<vmem>>, vector<16x16x8xf32>
    %27 = vector.shape_cast %26 : vector<16x16x8xf32> to vector<256x8xf32>
    %c16 = arith.constant 16 : index
    %c0_26 = arith.constant 0 : index
    %28 = vector.load %arg4[%c16, %c0_26] : memref<72x8xf32, #tpu.memory_space<vmem>>, vector<8x8xf32>
    %cst_27 = arith.constant dense<0.000000e+00> : vector<256x8xf32>
    %29 = tpu.matmul %27, %28, %cst_27 {dimension_numbers = #tpu.dot_dimension_numbers<[1], [0], [0], [1], [0, 0, 1, 1], [], []>} : vector<256x8xf32>, vector<8x8xf32>, vector<256x8xf32> -> vector<256x8xf32>
    %30 = arith.addf %25, %29 : vector<256x8xf32>
    %c1_28 = arith.constant 1 : index
    %c7_29 = arith.constant 7 : index
    %c0_30 = arith.constant 0 : index
    %31 = vector.load %arg7[%c1_28, %c7_29, %c0_30] : memref<18x32x8xf32, #tpu.memory_space<vmem>>, vector<16x16x8xf32>
    %32 = vector.shape_cast %31 : vector<16x16x8xf32> to vector<256x8xf32>
    %c24 = arith.constant 24 : index
    %c0_31 = arith.constant 0 : index
    %33 = vector.load %arg4[%c24, %c0_31] : memref<72x8xf32, #tpu.memory_space<vmem>>, vector<8x8xf32>
    %cst_32 = arith.constant dense<0.000000e+00> : vector<256x8xf32>
    %34 = tpu.matmul %32, %33, %cst_32 {dimension_numbers = #tpu.dot_dimension_numbers<[1], [0], [0], [1], [0, 0, 1, 1], [], []>} : vector<256x8xf32>, vector<8x8xf32>, vector<256x8xf32> -> vector<256x8xf32>
    %35 = arith.addf %30, %34 : vector<256x8xf32>
    %c1_33 = arith.constant 1 : index
    %c8_34 = arith.constant 8 : index
    %c0_35 = arith.constant 0 : index
    %36 = vector.load %arg7[%c1_33, %c8_34, %c0_35] : memref<18x32x8xf32, #tpu.memory_space<vmem>>, vector<16x16x8xf32>
    %37 = vector.shape_cast %36 : vector<16x16x8xf32> to vector<256x8xf32>
    %c32 = arith.constant 32 : index
    %c0_36 = arith.constant 0 : index
    %38 = vector.load %arg4[%c32, %c0_36] : memref<72x8xf32, #tpu.memory_space<vmem>>, vector<8x8xf32>
    %cst_37 = arith.constant dense<0.000000e+00> : vector<256x8xf32>
    %39 = tpu.matmul %37, %38, %cst_37 {dimension_numbers = #tpu.dot_dimension_numbers<[1], [0], [0], [1], [0, 0, 1, 1], [], []>} : vector<256x8xf32>, vector<8x8xf32>, vector<256x8xf32> -> vector<256x8xf32>
    %40 = arith.addf %35, %39 : vector<256x8xf32>
    %c1_38 = arith.constant 1 : index
    %c9_39 = arith.constant 9 : index
    %c0_40 = arith.constant 0 : index
    %41 = vector.load %arg7[%c1_38, %c9_39, %c0_40] : memref<18x32x8xf32, #tpu.memory_space<vmem>>, vector<16x16x8xf32>
    %42 = vector.shape_cast %41 : vector<16x16x8xf32> to vector<256x8xf32>
    %c40 = arith.constant 40 : index
    %c0_41 = arith.constant 0 : index
    %43 = vector.load %arg4[%c40, %c0_41] : memref<72x8xf32, #tpu.memory_space<vmem>>, vector<8x8xf32>
    %cst_42 = arith.constant dense<0.000000e+00> : vector<256x8xf32>
    %44 = tpu.matmul %42, %43, %cst_42 {dimension_numbers = #tpu.dot_dimension_numbers<[1], [0], [0], [1], [0, 0, 1, 1], [], []>} : vector<256x8xf32>, vector<8x8xf32>, vector<256x8xf32> -> vector<256x8xf32>
    %45 = arith.addf %40, %44 : vector<256x8xf32>
    %c2 = arith.constant 2 : index
    %c7_43 = arith.constant 7 : index
    %c0_44 = arith.constant 0 : index
    %46 = vector.load %arg7[%c2, %c7_43, %c0_44] : memref<18x32x8xf32, #tpu.memory_space<vmem>>, vector<16x16x8xf32>
    %47 = vector.shape_cast %46 : vector<16x16x8xf32> to vector<256x8xf32>
    %c48 = arith.constant 48 : index
    %c0_45 = arith.constant 0 : index
    %48 = vector.load %arg4[%c48, %c0_45] : memref<72x8xf32, #tpu.memory_space<vmem>>, vector<8x8xf32>
    %cst_46 = arith.constant dense<0.000000e+00> : vector<256x8xf32>
    %49 = tpu.matmul %47, %48, %cst_46 {dimension_numbers = #tpu.dot_dimension_numbers<[1], [0], [0], [1], [0, 0, 1, 1], [], []>} : vector<256x8xf32>, vector<8x8xf32>, vector<256x8xf32> -> vector<256x8xf32>
    %50 = arith.addf %45, %49 : vector<256x8xf32>
    %c2_47 = arith.constant 2 : index
    %c8_48 = arith.constant 8 : index
    %c0_49 = arith.constant 0 : index
    %51 = vector.load %arg7[%c2_47, %c8_48, %c0_49] : memref<18x32x8xf32, #tpu.memory_space<vmem>>, vector<16x16x8xf32>
    %52 = vector.shape_cast %51 : vector<16x16x8xf32> to vector<256x8xf32>
    %c56 = arith.constant 56 : index
    %c0_50 = arith.constant 0 : index
    %53 = vector.load %arg4[%c56, %c0_50] : memref<72x8xf32, #tpu.memory_space<vmem>>, vector<8x8xf32>
    %cst_51 = arith.constant dense<0.000000e+00> : vector<256x8xf32>
    %54 = tpu.matmul %52, %53, %cst_51 {dimension_numbers = #tpu.dot_dimension_numbers<[1], [0], [0], [1], [0, 0, 1, 1], [], []>} : vector<256x8xf32>, vector<8x8xf32>, vector<256x8xf32> -> vector<256x8xf32>
    %55 = arith.addf %50, %54 : vector<256x8xf32>
    %c2_52 = arith.constant 2 : index
    %c9_53 = arith.constant 9 : index
    %c0_54 = arith.constant 0 : index
    %56 = vector.load %arg7[%c2_52, %c9_53, %c0_54] : memref<18x32x8xf32, #tpu.memory_space<vmem>>, vector<16x16x8xf32>
    %57 = vector.shape_cast %56 : vector<16x16x8xf32> to vector<256x8xf32>
    %c64 = arith.constant 64 : index
    %c0_55 = arith.constant 0 : index
    %58 = vector.load %arg4[%c64, %c0_55] : memref<72x8xf32, #tpu.memory_space<vmem>>, vector<8x8xf32>
    %cst_56 = arith.constant dense<0.000000e+00> : vector<256x8xf32>
    %59 = tpu.matmul %57, %58, %cst_56 {dimension_numbers = #tpu.dot_dimension_numbers<[1], [0], [0], [1], [0, 0, 1, 1], [], []>} : vector<256x8xf32>, vector<8x8xf32>, vector<256x8xf32> -> vector<256x8xf32>
    %60 = arith.addf %55, %59 : vector<256x8xf32>
    %61 = vector.shape_cast %60 : vector<256x8xf32> to vector<1x16x16x8xf32>
    %c0_57 = arith.constant 0 : index
    %c0_58 = arith.constant 0 : index
    %c0_59 = arith.constant 0 : index
    %c0_60 = arith.constant 0 : index
    %62 = vector.load %arg5[%c0_57, %c0_58, %c0_59, %c0_60] : memref<1x16x16x8xf32, #tpu.memory_space<vmem>>, vector<1x16x16x8xf32>
    tpu.vector_store %arg5[%c0_57, %c0_58, %c0_59, %c0_60], %61 {strides = array<i32>} : memref<1x16x16x8xf32, #tpu.memory_space<vmem>>, vector<1x16x16x8xf32>,
    %cst_61 = arith.constant dense<0.000000e+00> : vector<8xf32>
    %63 = vector.multi_reduction <add>, %60, %cst_61 [0] : vector<256x8xf32> to vector<8xf32>
    %64 = vector.shape_cast %63 : vector<8xf32> to vector<1x8xf32>
    %65 = arith.mulf %60, %60 : vector<256x8xf32>
    %cst_62 = arith.constant dense<0.000000e+00> : vector<8xf32>
    %66 = vector.multi_reduction <add>, %65, %cst_62 [0] : vector<256x8xf32> to vector<8xf32>
    %67 = vector.shape_cast %66 : vector<8xf32> to vector<1x8xf32>
    %68 = tpu.iota {dimensions = array<i32: 0>} : vector<8x8xi32>
    %c0_i32 = arith.constant 0 : i32
    %69 = vector.broadcast %c0_i32 : i32 to vector<8x8xi32>
    %70 = arith.cmpi eq, %68, %69 : vector<8x8xi32>
    %71 = vector.shape_cast %64 : vector<1x8xf32> to vector<1x8xf32>
    %72 = vector.broadcast %71 : vector<1x8xf32> to vector<8x8xf32>
    %73 = vector.shape_cast %67 : vector<1x8xf32> to vector<1x8xf32>
    %74 = vector.broadcast %73 : vector<1x8xf32> to vector<8x8xf32>
    %75 = arith.select %70, %72, %74 : vector<8x8xi1>, vector<8x8xf32>
    %76 = vector.shape_cast %75 : vector<8x8xf32> to vector<1x8x8xf32>
    %c0_63 = arith.constant 0 : index
    %c0_64 = arith.constant 0 : index
    %c0_65 = arith.constant 0 : index
    %77 = vector.load %arg6[%c0_63, %c0_64, %c0_65] : memref<1x8x8xf32, #tpu.memory_space<vmem>>, vector<1x8x8xf32>
    tpu.vector_store %arg6[%c0_63, %c0_64, %c0_65], %76 {strides = array<i32>} : memref<1x8x8xf32, #tpu.memory_space<vmem>>, vector<1x8x8xf32>,
    return
  }
  func.func @transform_0(%arg0: i32) -> (i32, i32, i32, i32) {
    %c0_i32 = arith.constant 0 : i32
    %c0_i32_0 = arith.constant 0 : i32
    %c0_i32_1 = arith.constant 0 : i32
    %c0_i32_2 = arith.constant 0 : i32
    return %arg0, %c0_i32, %c0_i32_0, %c0_i32_1 : i32, i32, i32, i32
  }
  func.func @transform_1(%arg0: i32) -> (i32, i32) {
    %c0_i32 = arith.constant 0 : i32
    %c0_i32_0 = arith.constant 0 : i32
    %c0_i32_1 = arith.constant 0 : i32
    return %c0_i32, %c0_i32_0 : i32, i32
  }
  func.func @transform_2(%arg0: i32) -> (i32, i32) {
    %c0_i32 = arith.constant 0 : i32
    %c0_i32_0 = arith.constant 0 : i32
    %c0_i32_1 = arith.constant 0 : i32
    return %c0_i32, %c0_i32_0 : i32, i32
  }
  func.func @transform_3(%arg0: i32) -> (i32, i32) {
    %c0_i32 = arith.constant 0 : i32
    %c0_i32_0 = arith.constant 0 : i32
    %c0_i32_1 = arith.constant 0 : i32
    return %c0_i32, %c0_i32_0 : i32, i32
  }
  func.func @transform_4(%arg0: i32) -> (i32, i32, i32, i32) {
    %c0_i32 = arith.constant 0 : i32
    %c0_i32_0 = arith.constant 0 : i32
    %c0_i32_1 = arith.constant 0 : i32
    %c0_i32_2 = arith.constant 0 : i32
    return %arg0, %c0_i32, %c0_i32_0, %c0_i32_1 : i32, i32, i32, i32
  }
  func.func @transform_5(%arg0: i32) -> (i32, i32, i32) {
    %c0_i32 = arith.constant 0 : i32
    %c0_i32_0 = arith.constant 0 : i32
    %c0_i32_1 = arith.constant 0 : i32
    return %arg0, %c0_i32, %c0_i32_0 : i32, i32, i32
  }
}

module attributes {stable_mosaic.version = 11 : i64} {
  func.func @_bn3_residual_kernel(%arg0: i32, %arg1: memref<32x128xf32, #tpu.memory_space<vmem>>, %arg2: memref<32x128xf32, #tpu.memory_space<vmem>>, %arg3: memref<1x128xf32, #tpu.memory_space<vmem>>, %arg4: memref<1x128xf32, #tpu.memory_space<vmem>>, %arg5: memref<32x128xf32, #tpu.memory_space<vmem>>) attributes {dimension_semantics = [#tpu.dimension_semantics<parallel>], iteration_bounds = array<i64: 1>, scalar_prefetch = 0 : i64, scratch_operands = 0 : i64, tpu.core_type = #tpu.core_type<tc>, window_params = [{transform_indices = @transform_0, window_bounds = array<i64: 32, 128>}, {transform_indices = @transform_1, window_bounds = array<i64: 32, 128>}, {pipeline_mode = #tpu.pipeline_mode<synchronous>, transform_indices = @transform_2, window_bounds = array<i64: 1, 128>}, {pipeline_mode = #tpu.pipeline_mode<synchronous>, transform_indices = @transform_3, window_bounds = array<i64: 1, 128>}, {transform_indices = @transform_4, window_bounds = array<i64: 32, 128>}]} {
    %c0 = arith.constant 0 : index
    %c0_0 = arith.constant 0 : index
    %0 = vector.load %arg1[%c0, %c0_0] : memref<32x128xf32, #tpu.memory_space<vmem>>, vector<32x128xf32>
    %c0_1 = arith.constant 0 : index
    %c0_2 = arith.constant 0 : index
    %1 = vector.load %arg3[%c0_1, %c0_2] : memref<1x128xf32, #tpu.memory_space<vmem>>, vector<1x128xf32>
    %2 = vector.broadcast %1 : vector<1x128xf32> to vector<32x128xf32>
    %3 = arith.mulf %0, %2 : vector<32x128xf32>
    %c0_3 = arith.constant 0 : index
    %c0_4 = arith.constant 0 : index
    %4 = vector.load %arg4[%c0_3, %c0_4] : memref<1x128xf32, #tpu.memory_space<vmem>>, vector<1x128xf32>
    %5 = vector.broadcast %4 : vector<1x128xf32> to vector<32x128xf32>
    %6 = arith.addf %3, %5 : vector<32x128xf32>
    %c0_5 = arith.constant 0 : index
    %c0_6 = arith.constant 0 : index
    %7 = vector.load %arg2[%c0_5, %c0_6] : memref<32x128xf32, #tpu.memory_space<vmem>>, vector<32x128xf32>
    %8 = arith.addf %6, %7 : vector<32x128xf32>
    %cst = arith.constant 0.000000e+00 : f32
    %9 = vector.broadcast %cst : f32 to vector<32x128xf32>
    %10 = arith.maximumf %8, %9 : vector<32x128xf32>
    %c0_7 = arith.constant 0 : index
    %c0_8 = arith.constant 0 : index
    %11 = vector.load %arg5[%c0_7, %c0_8] : memref<32x128xf32, #tpu.memory_space<vmem>>, vector<32x128xf32>
    tpu.vector_store %arg5[%c0_7, %c0_8], %10 {strides = array<i32>} : memref<32x128xf32, #tpu.memory_space<vmem>>, vector<32x128xf32>,
    return
  }
  func.func @transform_0(%arg0: i32) -> (i32, i32) {
    %c0_i32 = arith.constant 0 : i32
    %c0_i32_0 = arith.constant 0 : i32
    return %arg0, %c0_i32 : i32, i32
  }
  func.func @transform_1(%arg0: i32) -> (i32, i32) {
    %c0_i32 = arith.constant 0 : i32
    %c0_i32_0 = arith.constant 0 : i32
    return %arg0, %c0_i32 : i32, i32
  }
  func.func @transform_2(%arg0: i32) -> (i32, i32) {
    %c0_i32 = arith.constant 0 : i32
    %c0_i32_0 = arith.constant 0 : i32
    %c0_i32_1 = arith.constant 0 : i32
    return %c0_i32, %c0_i32_0 : i32, i32
  }
  func.func @transform_3(%arg0: i32) -> (i32, i32) {
    %c0_i32 = arith.constant 0 : i32
    %c0_i32_0 = arith.constant 0 : i32
    %c0_i32_1 = arith.constant 0 : i32
    return %c0_i32, %c0_i32_0 : i32, i32
  }
  func.func @transform_4(%arg0: i32) -> (i32, i32) {
    %c0_i32 = arith.constant 0 : i32
    %c0_i32_0 = arith.constant 0 : i32
    return %arg0, %c0_i32 : i32, i32
  }
}

</mosaic_0001>

<bundles_post_ra>
// kernel: bottleneck_forward.4
= control target key start
LH: loop header
LB: loop body
LE: loop exit
PB: predicated region body
PF: predicated region fallthrough
CT: control target
= control target key end

     0   :  { %s999_s12 = smov 0   ;;  %s1327_s0 = inlined_call_operand.vmem [shape: f32[512,8], index: 0, kind: input, shape index: {}]   ;;  %s1328_s1 = inlined_call_operand.vmem [shape: f32[8,8], index: 1, kind: input, shape index: {}]   ;;  %s1329_s2 = inlined_call_operand.vmem [shape: f32[512,8], index: 2, kind: output, shape index: {0}]   ;;  %s1330_s3 = inlined_call_operand.vmem [shape: f32[2,8,8], index: 3, kind: output, shape index: {1}]  }
   0x1 LB: > { %s1005_s13 = sadd.s32 4294967295, %s977_s12   ;;  %p838_p0 = scmp.ge.s32.totalorder %s977_s12, 1  ;;  %s977_s12 = sphi %s999_s12, %s14_s12  }
   0x2   : > { %p141_p1 = scmp.lt.s32.totalorder %s977_s12, 3 }
   0x4   : > { %p142_p2 = pnand %p838_p0, %p141_p1 }
   0x5   : > { %v217_v0 = vld [vmem:[%s1328_s1] sm:$0xff] (!%p142_p2)  ;;  %s839_s16 = sshll.u32 (!%p142_p2), %s1005_s13, 5  ;;  %vm218_vm0 = vcmask (!%p142_p2), 64512   ;;  %p181_p4 = scmp.lt.s32.totalorder (!%p142_p2), %s1005_s13, 1 }
   0x6   : > { %145 = sbr.rel (%p142_p2) target bundleno = 312 (0x138), region = 28  ;;  %911 = vmatprep.subr.mxu0 (!%p142_p2), %v217_v0  ;;  %p170_p3 = scmp.lt.s32.totalorder (!%p142_p2), %s839_s16, 63  ;;  %961 = vmatprep.subr.mxu1 (!%p142_p2), %v217_v0 }
   0x7   : > { %912 = vmatpush3.msra.mxu0 (!%p142_p2), %v217_v0  ;;  %962 = vmatpush3.msra.mxu1 (!%p142_p2), %v217_v0 }
   0xd   : > { %s1332_s16 = smov (!%p170_p3, %s839_s16), 63  ;;  %s1334_s13 = smov (!%p181_p4, %s1005_s13), 1 }
   0xe   : > { %s840_s17 = sshll.u32 %s1332_s16, 3  ;;  %s843_s24 = sshll.u32 %s1334_s13, 3 }
   0xf   : > { %s1021_s20 = scalar_lea.vmem %s1327_s0, %s840_s17  ;;  %s1092_s23 = scalar_lea.vmem %s1329_s2, %s840_s17 }
  0x10   : > { %v185_v1 = vld [vmem:[%s1021_s20] sm:$0xff]  ;;  %v186_v2 = vld [vmem:[%s1021_s20 + $0x8] sm:$0xff]  ;;  %v187_v3 = vld [vmem:[%s1021_s20 + $0x10] sm:$0xff]  ;;  %s184_s27 = scalar_lea.vmem %s1330_s3, %s843_s24 }
  0x11   : > { %913 = vmatprep.mubr.msk.f32.mxu0 %vm218_vm0, %v185_v1  ;;  %v188_v4 = vld [vmem:[%s1021_s20 + $0x18] sm:$0xff]  ;;  %v189_v5 = vld [vmem:[%s1021_s20 + $0x20] sm:$0xff]  ;;  %v202_v7 = vld [vmem:[%s1021_s20 + $0x88] sm:$0xff] }
  0x12   : > { %914 = vmatmul.mubr.msk.f32.vlgmr.msra.gmra.mrb[0].mxu0 %vm218_vm0, %v186_v2  ;;  %v201_v6 = vld [vmem:[%s1021_s20 + $0x80] sm:$0xff]  ;;  %v203_v8 = vld [vmem:[%s1021_s20 + $0x90] sm:$0xff]  ;;  %v190_v9 = vld [vmem:[%s1021_s20 + $0x28] sm:$0xff] }
  0x13   : > { %916 = vmatprep.mubr.msk.f32.mxu0 %vm218_vm0, %v187_v3  ;;  %937 = vmatprep.mubr.msk.f32.mxu1 %vm218_vm0, %v201_v6  ;;  %v191_v10 = vld [vmem:[%s1021_s20 + $0x30] sm:$0xff]  ;;  %v204_v11 = vld [vmem:[%s1021_s20 + $0x98] sm:$0xff]  ;;  %v205_v12 = vld [vmem:[%s1021_s20 + $0xa0] sm:$0xff] }
  0x14   : > { %938 = vmatmul.mubr.msk.f32.vlgmr.msra.gmra.mrb[0].mxu1 %vm218_vm0, %v202_v7  ;;  %v192_v13 = vld [vmem:[%s1021_s20 + $0x38] sm:$0xff]  ;;  %v193_v14 = vld [vmem:[%s1021_s20 + $0x40] sm:$0xff]  ;;  %v206_v15 = vld [vmem:[%s1021_s20 + $0xa8] sm:$0xff] }
  0x15   : > { %940 = vmatprep.mubr.msk.f32.mxu1 %vm218_vm0, %v203_v8  ;;  %v207_v16 = vld [vmem:[%s1021_s20 + $0xb0] sm:$0xff]  ;;  %v194_v17 = vld [vmem:[%s1021_s20 + $0x48] sm:$0xff]  ;;  %v208_v19 = vld [vmem:[%s1021_s20 + $0xb8] sm:$0xff] }
  0x16   : > { %917 = vmatmul.mubr.msk.f32.gmra.mrb[2].mxu0 %vm218_vm0, %v188_v4  ;;  %v195_v18 = vld [vmem:[%s1021_s20 + $0x50] sm:$0xff]  ;;  %v209_v20 = vld [vmem:[%s1021_s20 + $0xc0] sm:$0xff]  ;;  %v196_v21 = vld [vmem:[%s1021_s20 + $0x58] sm:$0xff] }
  0x17   : > { %919 = vmatprep.mubr.msk.f32.mxu0 %vm218_vm0, %v189_v5  ;;  %v197_v22 = vld [vmem:[%s1021_s20 + $0x60] sm:$0xff]  ;;  %v210_v23 = vld [vmem:[%s1021_s20 + $0xc8] sm:$0xff]  ;;  %v211_v24 = vld [vmem:[%s1021_s20 + $0xd0] sm:$0xff] }
  0x18   : > { %941 = vmatmul.mubr.msk.f32.gmra.mrb[2].mxu1 %vm218_vm0, %v204_v11  ;;  %v198_v25 = vld [vmem:[%s1021_s20 + $0x68] sm:$0xff]  ;;  %v199_v26 = vld [vmem:[%s1021_s20 + $0x70] sm:$0xff]  ;;  %v212_v27 = vld [vmem:[%s1021_s20 + $0xd8] sm:$0xff] }
  0x19   : > { %943 = vmatprep.mubr.msk.f32.mxu1 %vm218_vm0, %v205_v12  ;;  %v213_v28 = vld [vmem:[%s1021_s20 + $0xe0] sm:$0xff]  ;;  %v200_v29 = vld [vmem:[%s1021_s20 + $0x78] sm:$0xff]  ;;  %v214_v30 = vld [vmem:[%s1021_s20 + $0xe8] sm:$0xff] }
  0x1a   : > { %920 = vmatmul.mubr.msk.f32.gmra.mrb[4].mxu0 %vm218_vm0, %v190_v9  ;;  %v215_v31 = vld [vmem:[%s1021_s20 + $0xf0] sm:$0xff]  ;;  %v216_v32 = vld [vmem:[%s1021_s20 + $0xf8] sm:$0xff] }
  0x1b   : > { %922 = vmatprep.mubr.msk.f32.mxu0 %vm218_vm0, %v191_v10 }
  0x1c   : > { %944 = vmatmul.mubr.msk.f32.gmra.mrb[4].mxu1 %vm218_vm0, %v206_v15 }
  0x1d   : > { %946 = vmatprep.mubr.msk.f32.mxu1 %vm218_vm0, %v207_v16 }
  0x1e   : > { %923 = vmatmul.mubr.msk.f32.gmra.mrb[6].mxu0 %vm218_vm0, %v192_v13 }
  0x1f   : > { %925 = vmatprep.mubr.msk.f32.mxu0 %vm218_vm0, %v193_v14 }
  0x20   : > { %947 = vmatmul.mubr.msk.f32.gmra.mrb[6].mxu1 %vm218_vm0, %v208_v19 }
  0x21   : > { %949 = vmatprep.mubr.msk.f32.mxu1 %vm218_vm0, %v209_v20 }
  0x22   : > { %926 = vmatmul.mubr.msk.f32.gmra.mrb[8].mxu0 %vm218_vm0, %v194_v17 }
  0x23   : > { %928 = vmatprep.mubr.msk.f32.mxu0 %vm218_vm0, %v195_v18 }
  0x24   : > { %950 = vmatmul.mubr.msk.f32.gmra.mrb[8].mxu1 %vm218_vm0, %v210_v23 }
  0x25   : > { %952 = vmatprep.mubr.msk.f32.mxu1 %vm218_vm0, %v211_v24 }
  0x26   : > { %929 = vmatmul.mubr.msk.f32.gmra.mrb[10].mxu0 %vm218_vm0, %v196_v21 }
  0x27   : > { %931 = vmatprep.mubr.msk.f32.mxu0 %vm218_vm0, %v197_v22 }
  0x28   : > { %953 = vmatmul.mubr.msk.f32.gmra.mrb[10].mxu1 %vm218_vm0, %v212_v27 }
  0x29   : > { %955 = vmatprep.mubr.msk.f32.mxu1 %vm218_vm0, %v213_v28 }
  0x2a   : > { %932 = vmatmul.mubr.msk.f32.gmra.mrb[12].mxu0 %vm218_vm0, %v198_v25 }
  0x2b   : > { %934 = vmatprep.mubr.msk.f32.mxu0 %vm218_vm0, %v199_v26 }
  0x2c   : > { %956 = vmatmul.mubr.msk.f32.gmra.mrb[12].mxu1 %vm218_vm0, %v214_v30 }
  0x2d   : > { %958 = vmatprep.mubr.msk.f32.mxu1 %vm218_vm0, %v215_v31 }
  0x2e   : > { %935 = vmatmul.mubr.msk.f32.gmra.mrb[14].mxu0 %vm218_vm0, %v200_v29 }
  0x30   : > { %959 = vmatmul.mubr.msk.f32.gmra.mrb[14].mxu1 %vm218_vm0, %v216_v32 }
  0xe5   : > { %v915_v33 = vpop.f32.mrb[0].mxu0 }
  0xe6   : > { %541 = vst.msk [vmem:[%s1092_s23 + $0x8] sm:$0xff] %vm218_vm0, %v915_v33  ;;  %v573_v34 = vsel %vm218_vm0, %v915_v33, 0.0  ;;  %v642_v35 = vmul.f32 %v915_v33, %v915_v33  ;;  %v381_v36 = vpop.f32.mrb[1].mxu0 }
  0xe7   : > { %540 = vst.msk [vmem:[%s1092_s23] sm:$0xff] %vm218_vm0, %v381_v36  ;;  %v572_v37 = vsel %vm218_vm0, %v381_v36, 0.0  ;;  %v641_v38 = vmul.f32 %v381_v36, %v381_v36  ;;  %v1104_v45 = vpop.f32.mrb[0].mxu1 }
  0xe8   : > { %v674_v39 = vsel %vm218_vm0, %v642_v35, 0.0  ;;  %v574_v40 = vadd.f32 %v573_v34, %v572_v37  ;;  %557 = vst.msk [vmem:[%s1092_s23 + $0x88] sm:$0xff] %vm218_vm0, %v1104_v45  ;;  %v1112_v49 = vpop.f32.mrb[1].mxu1 }
  0xe9   : > { %v673_v41 = vsel %vm218_vm0, %v641_v38, 0.0  ;;  %v918_v42 = vpop.f32.mrb[2].mxu0  ;;  %556 = vst.msk [vmem:[%s1092_s23 + $0x80] sm:$0xff] %vm218_vm0, %v1112_v49 }
  0xea   : > { %v675_v43 = vadd.f32 %v674_v39, %v673_v41  ;;  %543 = vst.msk [vmem:[%s1092_s23 + $0x18] sm:$0xff] %vm218_vm0, %v918_v42  ;;  %v391_v44 = vpop.f32.mrb[3].mxu0  ;;  %v644_v46 = vmul.f32 %v918_v42, %v918_v42  ;;  %v577_v51 = vsel %vm218_vm0, %v918_v42, 0.0 }
  0xeb   : > { %542 = vst.msk [vmem:[%s1092_s23 + $0x10] sm:$0xff] %vm218_vm0, %v391_v44  ;;  %v575_v47 = vsel %vm218_vm0, %v391_v44, 0.0  ;;  %v643_v48 = vmul.f32 %v391_v44, %v391_v44  ;;  %v1121_v57 = vpop.f32.mrb[2].mxu1 }
  0xec   : > { %v576_v50 = vadd.f32 %v575_v47, %v574_v40  ;;  %v678_v58 = vsel %vm218_vm0, %v644_v46, 0.0  ;;  %559 = vst.msk [vmem:[%s1092_s23 + $0x98] sm:$0xff] %vm218_vm0, %v1121_v57  ;;  %v1130_v62 = vpop.f32.mrb[3].mxu1 }
  0xed   : > { %v676_v52 = vsel %vm218_vm0, %v643_v48, 0.0  ;;  %v921_v53 = vpop.f32.mrb[4].mxu0  ;;  %558 = vst.msk [vmem:[%s1092_s23 + $0x90] sm:$0xff] %vm218_vm0, %v1130_v62 }
  0xee   : > { %v677_v54 = vadd.f32 %v676_v52, %v675_v43  ;;  %545 = vst.msk [vmem:[%s1092_s23 + $0x28] sm:$0xff] %vm218_vm0, %v921_v53  ;;  %v401_v55 = vpop.f32.mrb[5].mxu0  ;;  %v578_v56 = vadd.f32 %v577_v51, %v576_v50  ;;  %v646_v59 = vmul.f32 %v921_v53, %v921_v53  ;;  %v581_v1 = vsel %vm218_vm0, %v921_v53, 0.0 }
  0xef   : > { %544 = vst.msk [vmem:[%s1092_s23 + $0x20] sm:$0xff] %vm218_vm0, %v401_v55  ;;  %v579_v60 = vsel %vm218_vm0, %v401_v55, 0.0  ;;  %v645_v61 = vmul.f32 %v401_v55, %v401_v55  ;;  %v1139_v7 = vpop.f32.mrb[4].mxu1 }
  0xf0   : > { %v580_v63 = vadd.f32 %v579_v60, %v578_v56  ;;  %v679_v0 = vadd.f32 %v678_v58, %v677_v54  ;;  %v682_v8 = vsel %vm218_vm0, %v646_v59, 0.0  ;;  %561 = vst.msk [vmem:[%s1092_s23 + $0xa8] sm:$0xff] %vm218_vm0, %v1139_v7  ;;  %v1148_v12 = vpop.f32.mrb[5].mxu1 }
  0xf1   : > { %v680_v2 = vsel %vm218_vm0, %v645_v61, 0.0  ;;  %v924_v3 = vpop.f32.mrb[6].mxu0  ;;  %560 = vst.msk [vmem:[%s1092_s23 + $0xa0] sm:$0xff] %vm218_vm0, %v1148_v12 }
  0xf2   : > { %v681_v4 = vadd.f32 %v680_v2, %v679_v0  ;;  %547 = vst.msk [vmem:[%s1092_s23 + $0x38] sm:$0xff] %vm218_vm0, %v924_v3  ;;  %v411_v5 = vpop.f32.mrb[7].mxu0  ;;  %v582_v6 = vadd.f32 %v581_v1, %v580_v63  ;;  %v648_v9 = vmul.f32 %v924_v3, %v924_v3  ;;  %v585_v15 = vsel %vm218_vm0, %v924_v3, 0.0 }
  0xf3   : > { %546 = vst.msk [vmem:[%s1092_s23 + $0x30] sm:$0xff] %vm218_vm0, %v411_v5  ;;  %v583_v10 = vsel %vm218_vm0, %v411_v5, 0.0  ;;  %v647_v11 = vmul.f32 %v411_v5, %v411_v5  ;;  %v1157_v21 = vpop.f32.mrb[6].mxu1  ;;  %v657_v3 = vmul.f32 %v1112_v49, %v1112_v49 }
  0xf4   : > { %v584_v13 = vadd.f32 %v583_v10, %v582_v6  ;;  %v683_v14 = vadd.f32 %v682_v8, %v681_v4  ;;  %v686_v22 = vsel %vm218_vm0, %v648_v9, 0.0  ;;  %563 = vst.msk [vmem:[%s1092_s23 + $0xb8] sm:$0xff] %vm218_vm0, %v1157_v21  ;;  %v1166_v26 = vpop.f32.mrb[7].mxu1 }
  0xf5   : > { %v684_v16 = vsel %vm218_vm0, %v647_v11, 0.0  ;;  %v927_v17 = vpop.f32.mrb[8].mxu0  ;;  %562 = vst.msk [vmem:[%s1092_s23 + $0xb0] sm:$0xff] %vm218_vm0, %v1166_v26 }
  0xf6   : > { %v685_v18 = vadd.f32 %v684_v16, %v683_v14  ;;  %549 = vst.msk [vmem:[%s1092_s23 + $0x48] sm:$0xff] %vm218_vm0, %v927_v17  ;;  %v421_v19 = vpop.f32.mrb[9].mxu0  ;;  %v586_v20 = vadd.f32 %v585_v15, %v584_v13  ;;  %v650_v23 = vmul.f32 %v927_v17, %v927_v17  ;;  %v589_v29 = vsel %vm218_vm0, %v927_v17, 0.0 }
  0xf7   : > { %548 = vst.msk [vmem:[%s1092_s23 + $0x40] sm:$0xff] %vm218_vm0, %v421_v19  ;;  %v587_v24 = vsel %vm218_vm0, %v421_v19, 0.0  ;;  %v649_v25 = vmul.f32 %v421_v19, %v421_v19  ;;  %v1175_v35 = vpop.f32.mrb[8].mxu1  ;;  %v603_v16 = vsel %vm218_vm0, %v1112_v49, 0.0 }
  0xf8   : > { %v588_v27 = vadd.f32 %v587_v24, %v586_v20  ;;  %v687_v28 = vadd.f32 %v686_v22, %v685_v18  ;;  %v690_v36 = vsel %vm218_vm0, %v650_v23, 0.0  ;;  %565 = vst.msk [vmem:[%s1092_s23 + $0xc8] sm:$0xff] %vm218_vm0, %v1175_v35  ;;  %v1184_v40 = vpop.f32.mrb[9].mxu1  ;;  %v658_v22 = vmul.f32 %v1104_v45, %v1104_v45 }
  0xf9   : > { %v688_v30 = vsel %vm218_vm0, %v649_v25, 0.0  ;;  %v930_v31 = vpop.f32.mrb[10].mxu0  ;;  %564 = vst.msk [vmem:[%s1092_s23 + $0xc0] sm:$0xff] %vm218_vm0, %v1184_v40  ;;  %v704_v23 = vsel %vm218_vm0, %v657_v3, 0.0  ;;  %v659_v24 = vmul.f32 %v1130_v62, %v1130_v62 }
  0xfa   : > { %v689_v32 = vadd.f32 %v688_v30, %v687_v28  ;;  %551 = vst.msk [vmem:[%s1092_s23 + $0x58] sm:$0xff] %vm218_vm0, %v930_v31  ;;  %v431_v33 = vpop.f32.mrb[11].mxu0  ;;  %v590_v34 = vadd.f32 %v589_v29, %v588_v27  ;;  %v652_v37 = vmul.f32 %v930_v31, %v930_v31  ;;  %v593_v43 = vsel %vm218_vm0, %v930_v31, 0.0 }
  0xfb   : > { %550 = vst.msk [vmem:[%s1092_s23 + $0x50] sm:$0xff] %vm218_vm0, %v431_v33  ;;  %v591_v38 = vsel %vm218_vm0, %v431_v33, 0.0  ;;  %v651_v39 = vmul.f32 %v431_v33, %v431_v33  ;;  %v1193_v51 = vpop.f32.mrb[10].mxu1  ;;  %v605_v28 = vsel %vm218_vm0, %v1104_v45, 0.0  ;;  %v607_v29 = vsel %vm218_vm0, %v1130_v62, 0.0 }
  0xfc   : > { %v592_v41 = vadd.f32 %v591_v38, %v590_v34  ;;  %v691_v42 = vadd.f32 %v690_v36, %v689_v32  ;;  %v694_v52 = vsel %vm218_vm0, %v652_v37, 0.0  ;;  %567 = vst.msk [vmem:[%s1092_s23 + $0xd8] sm:$0xff] %vm218_vm0, %v1193_v51  ;;  %v1202_v56 = vpop.f32.mrb[11].mxu1  ;;  %v706_v32 = vsel %vm218_vm0, %v658_v22, 0.0 }
  0xfd   : > { %v692_v44 = vsel %vm218_vm0, %v651_v39, 0.0  ;;  %v933_v46 = vpop.f32.mrb[12].mxu0  ;;  %566 = vst.msk [vmem:[%s1092_s23 + $0xd0] sm:$0xff] %vm218_vm0, %v1202_v56  ;;  %v660_v33 = vmul.f32 %v1121_v57, %v1121_v57  ;;  %v708_v34 = vsel %vm218_vm0, %v659_v24, 0.0  ;;  %v661_v36 = vmul.f32 %v1148_v12, %v1148_v12 }
  0xfe   : > { %v693_v47 = vadd.f32 %v692_v44, %v691_v42  ;;  %553 = vst.msk [vmem:[%s1092_s23 + $0x68] sm:$0xff] %vm218_vm0, %v933_v46  ;;  %v441_v48 = vpop.f32.mrb[13].mxu0  ;;  %v594_v50 = vadd.f32 %v593_v43, %v592_v41  ;;  %v654_v53 = vmul.f32 %v933_v46, %v933_v46  ;;  %v597_v60 = vsel %vm218_vm0, %v933_v46, 0.0 }
  0xff   : > { %552 = vst.msk [vmem:[%s1092_s23 + $0x60] sm:$0xff] %vm218_vm0, %v441_v48  ;;  %v595_v54 = vsel %vm218_vm0, %v441_v48, 0.0  ;;  %v653_v55 = vmul.f32 %v441_v48, %v441_v48  ;;  %v1213_v4 = vpop.f32.mrb[12].mxu1  ;;  %v609_v45 = vsel %vm218_vm0, %v1121_v57, 0.0  ;;  %v611_v62 = vsel %vm218_vm0, %v1148_v12, 0.0 }
 0x100   : > { %v596_v58 = vadd.f32 %v595_v54, %v594_v50  ;;  %v695_v59 = vadd.f32 %v694_v52, %v693_v47  ;;  %v698_v5 = vsel %vm218_vm0, %v654_v53, 0.0  ;;  %569 = vst.msk [vmem:[%s1092_s23 + $0xe8] sm:$0xff] %vm218_vm0, %v1213_v4  ;;  %v1222_v10 = vpop.f32.mrb[13].mxu1  ;;  %v710_v42 = vsel %vm218_vm0, %v660_v33, 0.0 }
 0x101   : > { %v696_v61 = vsel %vm218_vm0, %v653_v55, 0.0  ;;  %v936_v63 = vpop.f32.mrb[14].mxu0  ;;  %568 = vst.msk [vmem:[%s1092_s23 + $0xe0] sm:$0xff] %vm218_vm0, %v1222_v10  ;;  %v662_v43 = vmul.f32 %v1139_v7, %v1139_v7  ;;  %v712_v44 = vsel %vm218_vm0, %v661_v36, 0.0  ;;  %v663_v46 = vmul.f32 %v1166_v26, %v1166_v26 }
 0x102   : > { %v697_v0 = vadd.f32 %v696_v61, %v695_v59  ;;  %555 = vst.msk [vmem:[%s1092_s23 + $0x78] sm:$0xff] %vm218_vm0, %v936_v63  ;;  %v451_v1 = vpop.f32.mrb[15].mxu0  ;;  %v598_v2 = vadd.f32 %v597_v60, %v596_v58  ;;  %v656_v6 = vmul.f32 %v936_v63, %v936_v63  ;;  %v601_v14 = vsel %vm218_vm0, %v936_v63, 0.0 }
 0x103   : > { %554 = vst.msk [vmem:[%s1092_s23 + $0x70] sm:$0xff] %vm218_vm0, %v451_v1  ;;  %v599_v8 = vsel %vm218_vm0, %v451_v1, 0.0  ;;  %v655_v9 = vmul.f32 %v451_v1, %v451_v1  ;;  %v1231_v19 = vpop.f32.mrb[14].mxu1  ;;  %v613_v57 = vsel %vm218_vm0, %v1139_v7, 0.0  ;;  %v615_v12 = vsel %vm218_vm0, %v1166_v26, 0.0 }
 0x104   : > { %v600_v11 = vadd.f32 %v599_v8, %v598_v2  ;;  %v699_v13 = vadd.f32 %v698_v5, %v697_v0  ;;  %v702_v20 = vsel %vm218_vm0, %v656_v6, 0.0  ;;  %571 = vst.msk [vmem:[%s1092_s23 + $0xf8] sm:$0xff] %vm218_vm0, %v1231_v19  ;;  %v1242_v25 = vpop.f32.mrb[15].mxu1  ;;  %v714_v53 = vsel %vm218_vm0, %v662_v43, 0.0 }
 0x105   : > { %v700_v15 = vsel %vm218_vm0, %v655_v9, 0.0  ;;  %570 = vst.msk [vmem:[%s1092_s23 + $0xf0] sm:$0xff] %vm218_vm0, %v1242_v25  ;;  %v664_v54 = vmul.f32 %v1157_v21, %v1157_v21  ;;  %v716_v55 = vsel %vm218_vm0, %v663_v46, 0.0  ;;  %v665_v58 = vmul.f32 %v1184_v40, %v1184_v40 }
 0x106   : > { %v602_v17 = vadd.f32 %v601_v14, %v600_v11  ;;  %v701_v18 = vadd.f32 %v700_v15, %v699_v13  ;;  %v617_v7 = vsel %vm218_vm0, %v1157_v21, 0.0  ;;  %v619_v26 = vsel %vm218_vm0, %v1184_v40, 0.0 }
 0x107   : > { %v718_v0 = vsel %vm218_vm0, %v664_v54, 0.0  ;;  %v666_v1 = vmul.f32 %v1175_v35, %v1175_v35  ;;  %v720_v2 = vsel %vm218_vm0, %v665_v58, 0.0  ;;  %v667_v3 = vmul.f32 %v1202_v56, %v1202_v56 }
 0x108   : > { %v703_v49 = vadd.f32 %v702_v20, %v701_v18  ;;  %v604_v27 = vadd.f32 %v603_v16, %v602_v17  ;;  %v621_v21 = vsel %vm218_vm0, %v1175_v35, 0.0  ;;  %v623_v40 = vsel %vm218_vm0, %v1202_v56, 0.0 }
 0x109   : > { %v722_v11 = vsel %vm218_vm0, %v666_v1, 0.0  ;;  %v668_v13 = vmul.f32 %v1193_v51, %v1193_v51  ;;  %v724_v14 = vsel %vm218_vm0, %v667_v3, 0.0  ;;  %v669_v15 = vmul.f32 %v1222_v10, %v1222_v10 }
 0x10a   : > { %v705_v30 = vadd.f32 %v704_v23, %v703_v49  ;;  %v606_v31 = vadd.f32 %v605_v28, %v604_v27  ;;  %v625_v35 = vsel %vm218_vm0, %v1193_v51, 0.0  ;;  %v627_v56 = vsel %vm218_vm0, %v1222_v10, 0.0 }
 0x10b   : > { %v726_v22 = vsel %vm218_vm0, %v668_v13, 0.0  ;;  %v670_v23 = vmul.f32 %v1213_v4, %v1213_v4  ;;  %v728_v24 = vsel %vm218_vm0, %v669_v15, 0.0  ;;  %v671_v49 = vmul.f32 %v1242_v25, %v1242_v25 }
 0x10c   : > { %v608_v37 = vadd.f32 %v607_v29, %v606_v31  ;;  %v707_v38 = vadd.f32 %v706_v32, %v705_v30  ;;  %v629_v51 = vsel %vm218_vm0, %v1213_v4, 0.0  ;;  %v631_v10 = vsel %vm218_vm0, %v1242_v25, 0.0 }
 0x10d   : > { %v730_v31 = vsel %vm218_vm0, %v670_v23, 0.0  ;;  %v672_v32 = vmul.f32 %v1231_v19, %v1231_v19  ;;  %v732_v33 = vsel %vm218_vm0, %v671_v49, 0.0 }
 0x10e   : > { %v709_v39 = vadd.f32 %v708_v34, %v707_v38  ;;  %v610_v41 = vadd.f32 %v609_v45, %v608_v37  ;;  %v633_v37 = vsel %vm218_vm0, %v1231_v19, 0.0 }
 0x10f   : > { %v734_v45 = vsel %vm218_vm0, %v672_v32, 0.0 }
 0x110   : > { %v612_v47 = vadd.f32 %v611_v62, %v610_v41  ;;  %v711_v48 = vadd.f32 %v710_v42, %v709_v39  ;;  %v742_v42 = vlaneseq }
 0x112   : > { %v713_v50 = vadd.f32 %v712_v44, %v711_v48  ;;  %v614_v52 = vadd.f32 %v613_v57, %v612_v47  ;;  %v743_v48 = vshrl.u32 %v742_v42, 7 }
 0x114   : > { %v616_v59 = vadd.f32 %v615_v12, %v614_v52  ;;  %v715_v60 = vadd.f32 %v714_v53, %v713_v50  ;;  %vm744_vm1 = vcmp.eq.s32.totalorder %v743_v48, 0 }
 0x116   : > { %v717_v61 = vadd.f32 %v716_v55, %v715_v60  ;;  %v618_v63 = vadd.f32 %v617_v7, %v616_v59 }
 0x118   : > { %v620_v5 = vadd.f32 %v619_v26, %v618_v63  ;;  %v719_v6 = vadd.f32 %v718_v0, %v717_v61 }
 0x11a   : > { %v721_v8 = vadd.f32 %v720_v2, %v719_v6  ;;  %v622_v9 = vadd.f32 %v621_v21, %v620_v5 }
 0x11c   : > { %v624_v16 = vadd.f32 %v623_v40, %v622_v9  ;;  %v723_v17 = vadd.f32 %v722_v11, %v721_v8 }
 0x11e   : > { %v725_v18 = vadd.f32 %v724_v14, %v723_v17  ;;  %v626_v20 = vadd.f32 %v625_v35, %v624_v16 }
 0x120   : > { %v628_v27 = vadd.f32 %v627_v56, %v626_v20  ;;  %v727_v28 = vadd.f32 %v726_v22, %v725_v18 }
 0x122   : > { %v729_v29 = vadd.f32 %v728_v24, %v727_v28  ;;  %v630_v30 = vadd.f32 %v629_v51, %v628_v27 }
 0x124   : > { %v632_v34 = vadd.f32 %v631_v10, %v630_v30  ;;  %v731_v36 = vadd.f32 %v730_v31, %v729_v29 }
 0x126   : > { %v634_v38 = vadd.f32 %v633_v37, %v632_v34  ;;  %v733_v4 = vadd.f32 %v732_v33, %v731_v36 }
 0x128   : > { %v635_v25 = vrot.slane %v634_v38, 4  ;;  %v735_v62 = vadd.f32 %v734_v45, %v733_v4 }
 0x12a   : > { %v636_v39 = vadd.f32 %v635_v25, %v634_v38  ;;  %v736_v41 = vrot.slane %v735_v62, 4 }
 0x12c   : > { %v637_v43 = vrot.slane %v636_v39, 2  ;;  %v737_v44 = vadd.f32 %v736_v41, %v735_v62 }
 0x12e   : > { %v638_v46 = vadd.f32 %v637_v43, %v636_v39  ;;  %v738_v47 = vrot.slane %v737_v44, 2 }
 0x130   : > { %v639_v57 = vrot.slane %v638_v46, 1  ;;  %v739_v12 = vadd.f32 %v738_v47, %v737_v44 }
 0x132   : > { %v740_v19 = vrot.slane %v739_v12, 1  ;;  %v640_v50 = vadd.f32 %v639_v57, %v638_v46 }
 0x134   : > { %v741_v52 = vadd.f32 %v740_v19, %v739_v12 }
 0x136   : > { %v745_v53 = vsel %vm744_vm1, %v640_v50, %v741_v52 }
 0x137   : > { %746 = vst.msk [vmem:[%s184_s27] sm:$0xff] %vm218_vm0, %v745_v53 }
 0x138 PF: > { %s14_s12 = sadd.s32 1, %s977_s12  }
 0x139   : > { %p11_p5 = scmp.ge.s32.totalorder %s14_s12, 4  }
 0x13b   :  { %13 = sbr.rel (!%p11_p5) target bundleno = 1 (0x1), region = 70 }

// kernel: bottleneck_forward.6
= control target key start
LH: loop header
LB: loop body
LE: loop exit
PB: predicated region body
PF: predicated region fallthrough
CT: control target
= control target key end

     0   :  { %s1175_s18 = smov 0   ;;  %s1553_s0 = inlined_call_operand.vmem [shape: f32[512,8], index: 0, kind: input, shape index: {}]   ;;  %s1554_s1 = inlined_call_operand.vmem [shape: f32[1,8], index: 1, kind: input, shape index: {}]   ;;  %s1555_s2 = inlined_call_operand.vmem [shape: f32[1,8], index: 2, kind: input, shape index: {}]   ;;  %s1556_s3 = inlined_call_operand.vmem [shape: f32[8,8], index: 3, kind: input, shape index: {}]   ;;  %s1557_s4 = inlined_call_operand.vmem [shape: f32[512,8], index: 4, kind: output, shape index: {0}]   ;;  %s1558_s5 = inlined_call_operand.vmem [shape: f32[2,8,8], index: 5, kind: output, shape index: {1}]  }
   0x1 LB: > { %s1181_s19 = sadd.s32 4294967295, %s1143_s18   ;;  %p1002_p0 = scmp.ge.s32.totalorder %s1143_s18, 1  ;;  %s1143_s18 = sphi %s1175_s18, %s16_s18  }
   0x2   : > { %p191_p1 = scmp.lt.s32.totalorder %s1143_s18, 3 }
   0x4   : > { %p192_p2 = pnand %p1002_p0, %p191_p1 }
   0x5   : > { %v381_v0 = vld [vmem:[%s1556_s3] sm:$0xff] (!%p192_p2)  ;;  %s1003_s22 = sshll.u32 (!%p192_p2), %s1181_s19, 5  ;;  %vm382_vm0 = vcmask (!%p192_p2), 64512   ;;  %p235_p4 = scmp.lt.s32.totalorder (!%p192_p2), %s1181_s19, 1 }
   0x6   : > { %195 = sbr.rel (%p192_p2) target bundleno = 318 (0x13e), region = 36  ;;  %1077 = vmatprep.subr.mxu0 (!%p192_p2), %v381_v0  ;;  %p224_p3 = scmp.lt.s32.totalorder (!%p192_p2), %s1003_s22, 63  ;;  %1127 = vmatprep.subr.mxu1 (!%p192_p2), %v381_v0  ;;  %v1195_v1 = vld [vmem:[%s1554_s1] ss:$0 sm:$0xff] (!%p192_p2) }
   0x7   : > { %1078 = vmatpush3.msra.mxu0 (!%p192_p2), %v381_v0  ;;  %1128 = vmatpush3.msra.mxu1 (!%p192_p2), %v381_v0  ;;  %v1207_v2 = vld [vmem:[%s1555_s2] ss:$0 sm:$0xff] (!%p192_p2) }
   0xd   : > { %s1560_s22 = smov (!%p224_p3, %s1003_s22), 63  ;;  %s1562_s19 = smov (!%p235_p4, %s1181_s19), 1 }
   0xe   : > { %s1004_s23 = sshll.u32 %s1560_s22, 3  ;;  %s1007_s9 = sshll.u32 %s1562_s19, 3 }
   0xf   : > { %s1202_s28 = scalar_lea.vmem %s1553_s0, %s1004_s23  ;;  %s1342_s8 = scalar_lea.vmem %s1557_s4, %s1004_s23 }
  0x10   : > { %v239_v3 = vld [vmem:[%s1202_s28] sm:$0xff]  ;;  %v240_v4 = vld [vmem:[%s1202_s28 + $0x8] sm:$0xff]  ;;  %v241_v5 = vld [vmem:[%s1202_s28 + $0x10] sm:$0xff]  ;;  %s238_s12 = scalar_lea.vmem %s1558_s5, %s1007_s9 }
  0x11   : > { %v278_v6 = vmul.f32 %v1195_v1, %v239_v3  ;;  %v279_v7 = vmul.f32 %v1195_v1, %v240_v4  ;;  %v280_v8 = vmul.f32 %v1195_v1, %v241_v5  ;;  %v242_v9 = vld [vmem:[%s1202_s28 + $0x18] sm:$0xff]  ;;  %v243_v10 = vld [vmem:[%s1202_s28 + $0x20] sm:$0xff]  ;;  %v244_v11 = vld [vmem:[%s1202_s28 + $0x28] sm:$0xff] }
  0x12   : > { %v281_v12 = vmul.f32 %v1195_v1, %v242_v9  ;;  %v282_v13 = vmul.f32 %v1195_v1, %v243_v10  ;;  %v245_v14 = vld [vmem:[%s1202_s28 + $0x30] sm:$0xff]  ;;  %v246_v15 = vld [vmem:[%s1202_s28 + $0x38] sm:$0xff]  ;;  %v283_v19 = vmul.f32 %v1195_v1, %v244_v11  ;;  %v247_v27 = vld [vmem:[%s1202_s28 + $0x40] sm:$0xff] }
  0x13   : > { %v317_v16 = vadd.f32 %v1207_v2, %v278_v6  ;;  %v318_v17 = vadd.f32 %v1207_v2, %v279_v7  ;;  %v319_v18 = vadd.f32 %v1207_v2, %v280_v8  ;;  %v284_v21 = vmul.f32 %v1195_v1, %v245_v14  ;;  %v248_v29 = vld [vmem:[%s1202_s28 + $0x48] sm:$0xff]  ;;  %v249_v34 = vld [vmem:[%s1202_s28 + $0x50] sm:$0xff]  ;;  %v250_v36 = vld [vmem:[%s1202_s28 + $0x58] sm:$0xff] }
  0x14   : > { %v320_v20 = vadd.f32 %v1207_v2, %v281_v12  ;;  %v285_v22 = vmul.f32 %v1195_v1, %v246_v15  ;;  %v321_v26 = vadd.f32 %v1207_v2, %v282_v13  ;;  %v322_v28 = vadd.f32 %v1207_v2, %v283_v19  ;;  %v255_v38 = vld [vmem:[%s1202_s28 + $0x80] sm:$0xff]  ;;  %v256_v39 = vld [vmem:[%s1202_s28 + $0x88] sm:$0xff]  ;;  %v257_v40 = vld [vmem:[%s1202_s28 + $0x90] sm:$0xff] }
  0x15   : > { %v349_v23 = vmax.f32 %v317_v16, 0.0  ;;  %v350_v24 = vmax.f32 %v318_v17, 0.0  ;;  %v351_v25 = vmax.f32 %v319_v18, 0.0  ;;  %v323_v31 = vadd.f32 %v1207_v2, %v284_v21  ;;  %v251_v42 = vld [vmem:[%s1202_s28 + $0x60] sm:$0xff]  ;;  %v258_v43 = vld [vmem:[%s1202_s28 + $0x98] sm:$0xff]  ;;  %v260_v53 = vld [vmem:[%s1202_s28 + $0xa8] sm:$0xff] }
  0x16   : > { %v352_v30 = vmax.f32 %v320_v20, 0.0  ;;  %v324_v32 = vadd.f32 %v1207_v2, %v285_v22  ;;  %v286_v33 = vmul.f32 %v1195_v1, %v247_v27  ;;  %v353_v35 = vmax.f32 %v321_v26, 0.0  ;;  %v259_v44 = vld [vmem:[%s1202_s28 + $0xa0] sm:$0xff]  ;;  %v261_v54 = vld [vmem:[%s1202_s28 + $0xb0] sm:$0xff]  ;;  %v252_v0 = vld [vmem:[%s1202_s28 + $0x68] sm:$0xff] }
  0x17   : > { %1079 = vmatprep.mubr.msk.f32.mxu0 %vm382_vm0, %v349_v23  ;;  %v287_v37 = vmul.f32 %v1195_v1, %v248_v29  ;;  %v288_v41 = vmul.f32 %v1195_v1, %v249_v34  ;;  %v354_v45 = vmax.f32 %v322_v28, 0.0  ;;  %v355_v46 = vmax.f32 %v323_v31, 0.0  ;;  %v253_v3 = vld [vmem:[%s1202_s28 + $0x70] sm:$0xff]  ;;  %v262_v11 = vld [vmem:[%s1202_s28 + $0xb8] sm:$0xff]  ;;  %v263_v12 = vld [vmem:[%s1202_s28 + $0xc0] sm:$0xff] }
  0x18   : > { %1080 = vmatmul.mubr.msk.f32.vlgmr.msra.gmra.mrb[0].mxu0 %vm382_vm0, %v350_v24  ;;  %v356_v47 = vmax.f32 %v324_v32, 0.0  ;;  %v325_v48 = vadd.f32 %v1207_v2, %v286_v33  ;;  %v289_v49 = vmul.f32 %v1195_v1, %v250_v36  ;;  %v294_v50 = vmul.f32 %v1195_v1, %v255_v38  ;;  %v254_v18 = vld [vmem:[%s1202_s28 + $0x78] sm:$0xff]  ;;  %v264_v26 = vld [vmem:[%s1202_s28 + $0xc8] sm:$0xff]  ;;  %v265_v27 = vld [vmem:[%s1202_s28 + $0xd0] sm:$0xff] }
  0x19   : > { %1082 = vmatprep.mubr.msk.f32.mxu0 %vm382_vm0, %v351_v25  ;;  %v295_v51 = vmul.f32 %v1195_v1, %v256_v39  ;;  %v296_v52 = vmul.f32 %v1195_v1, %v257_v40  ;;  %v326_v55 = vadd.f32 %v1207_v2, %v287_v37  ;;  %v290_v56 = vmul.f32 %v1195_v1, %v251_v42  ;;  %v266_v39 = vld [vmem:[%s1202_s28 + $0xd8] sm:$0xff]  ;;  %v267_v40 = vld [vmem:[%s1202_s28 + $0xe0] sm:$0xff] }
  0x1a   : > { %v297_v57 = vmul.f32 %v1195_v1, %v258_v43  ;;  %v298_v58 = vmul.f32 %v1195_v1, %v259_v44  ;;  %v327_v59 = vadd.f32 %v1207_v2, %v288_v41  ;;  %v333_v60 = vadd.f32 %v1207_v2, %v294_v50  ;;  %v268_v50 = vld [vmem:[%s1202_s28 + $0xe8] sm:$0xff] }
  0x1b   : > { %v334_v61 = vadd.f32 %v1207_v2, %v295_v51  ;;  %v335_v62 = vadd.f32 %v1207_v2, %v296_v52  ;;  %v357_v63 = vmax.f32 %v325_v48, 0.0  ;;  %v299_v5 = vmul.f32 %v1195_v1, %v260_v53  ;;  %v269_v51 = vld [vmem:[%s1202_s28 + $0xf0] sm:$0xff] }
  0x1c   : > { %1083 = vmatmul.mubr.msk.f32.gmra.mrb[2].mxu0 %vm382_vm0, %v352_v30  ;;  %v336_v4 = vadd.f32 %v1207_v2, %v297_v57  ;;  %v300_v6 = vmul.f32 %v1195_v1, %v261_v54  ;;  %v365_v7 = vmax.f32 %v333_v60, 0.0  ;;  %v337_v10 = vadd.f32 %v1207_v2, %v298_v58 }
  0x1d   : > { %1085 = vmatprep.mubr.msk.f32.mxu0 %vm382_vm0, %v353_v35  ;;  %v366_v8 = vmax.f32 %v334_v61, 0.0  ;;  %v367_v9 = vmax.f32 %v335_v62, 0.0  ;;  %v328_v13 = vadd.f32 %v1207_v2, %v289_v49  ;;  %v329_v14 = vadd.f32 %v1207_v2, %v290_v56 }
  0x1e   : > { %v291_v15 = vmul.f32 %v1195_v1, %v252_v0  ;;  %v292_v16 = vmul.f32 %v1195_v1, %v253_v3  ;;  %1103 = vmatprep.mubr.msk.f32.mxu1 %vm382_vm0, %v365_v7  ;;  %v358_v17 = vmax.f32 %v326_v55, 0.0  ;;  %v368_v19 = vmax.f32 %v336_v4, 0.0 }
  0x1f   : > { %1104 = vmatmul.mubr.msk.f32.vlgmr.msra.gmra.mrb[0].mxu1 %vm382_vm0, %v366_v8  ;;  %v338_v20 = vadd.f32 %v1207_v2, %v299_v5  ;;  %v301_v21 = vmul.f32 %v1195_v1, %v262_v11  ;;  %v359_v22 = vmax.f32 %v327_v59, 0.0  ;;  %v369_v23 = vmax.f32 %v337_v10, 0.0  ;;  %v270_v59 = vld [vmem:[%s1202_s28 + $0xf8] sm:$0xff] }
  0x20   : > { %1086 = vmatmul.mubr.msk.f32.gmra.mrb[4].mxu0 %vm382_vm0, %v354_v45  ;;  %1106 = vmatprep.mubr.msk.f32.mxu1 %vm382_vm0, %v367_v9  ;;  %v339_v24 = vadd.f32 %v1207_v2, %v300_v6  ;;  %v302_v25 = vmul.f32 %v1195_v1, %v263_v12  ;;  %v330_v28 = vadd.f32 %v1207_v2, %v291_v15  ;;  %v360_v31 = vmax.f32 %v328_v13, 0.0 }
  0x21   : > { %1088 = vmatprep.mubr.msk.f32.mxu0 %vm382_vm0, %v355_v46  ;;  %v331_v29 = vadd.f32 %v1207_v2, %v292_v16  ;;  %v293_v30 = vmul.f32 %v1195_v1, %v254_v18  ;;  %v370_v32 = vmax.f32 %v338_v20, 0.0  ;;  %v340_v33 = vadd.f32 %v1207_v2, %v301_v21 }
  0x22   : > { %v303_v34 = vmul.f32 %v1195_v1, %v264_v26  ;;  %v361_v35 = vmax.f32 %v329_v14, 0.0  ;;  %v371_v36 = vmax.f32 %v339_v24, 0.0  ;;  %v341_v37 = vadd.f32 %v1207_v2, %v302_v25 }
  0x23   : > { %1107 = vmatmul.mubr.msk.f32.gmra.mrb[2].mxu1 %vm382_vm0, %v368_v19  ;;  %v304_v38 = vmul.f32 %v1195_v1, %v265_v27  ;;  %v362_v41 = vmax.f32 %v330_v28, 0.0  ;;  %v332_v42 = vadd.f32 %v1207_v2, %v293_v30  ;;  %v372_v43 = vmax.f32 %v340_v33, 0.0 }
  0x24   : > { %1089 = vmatmul.mubr.msk.f32.gmra.mrb[6].mxu0 %vm382_vm0, %v356_v47  ;;  %1109 = vmatprep.mubr.msk.f32.mxu1 %vm382_vm0, %v369_v23  ;;  %v342_v44 = vadd.f32 %v1207_v2, %v303_v34  ;;  %v305_v45 = vmul.f32 %v1195_v1, %v266_v39  ;;  %v363_v46 = vmax.f32 %v331_v29, 0.0  ;;  %v373_v47 = vmax.f32 %v341_v37, 0.0 }
  0x25   : > { %1091 = vmatprep.mubr.msk.f32.mxu0 %vm382_vm0, %v357_v63  ;;  %v343_v48 = vadd.f32 %v1207_v2, %v304_v38  ;;  %v306_v49 = vmul.f32 %v1195_v1, %v267_v40  ;;  %v364_v52 = vmax.f32 %v332_v42, 0.0  ;;  %v307_v55 = vmul.f32 %v1195_v1, %v268_v50 }
  0x26   : > { %v374_v53 = vmax.f32 %v342_v44, 0.0  ;;  %v344_v54 = vadd.f32 %v1207_v2, %v305_v45  ;;  %v308_v58 = vmul.f32 %v1195_v1, %v269_v51  ;;  %v309_v62 = vmul.f32 %v1195_v1, %v270_v59 }
  0x27   : > { %1110 = vmatmul.mubr.msk.f32.gmra.mrb[4].mxu1 %vm382_vm0, %v370_v32  ;;  %v375_v56 = vmax.f32 %v343_v48, 0.0  ;;  %v345_v57 = vadd.f32 %v1207_v2, %v306_v49  ;;  %v346_v61 = vadd.f32 %v1207_v2, %v307_v55 }
  0x28   : > { %1092 = vmatmul.mubr.msk.f32.gmra.mrb[8].mxu0 %vm382_vm0, %v358_v17  ;;  %1112 = vmatprep.mubr.msk.f32.mxu1 %vm382_vm0, %v371_v36  ;;  %v376_v60 = vmax.f32 %v344_v54, 0.0  ;;  %v347_v0 = vadd.f32 %v1207_v2, %v308_v58  ;;  %v348_v4 = vadd.f32 %v1207_v2, %v309_v62 }
  0x29   : > { %1094 = vmatprep.mubr.msk.f32.mxu0 %vm382_vm0, %v359_v22  ;;  %v377_v63 = vmax.f32 %v345_v57, 0.0  ;;  %v378_v3 = vmax.f32 %v346_v61, 0.0 }
  0x2a   : > { %v379_v5 = vmax.f32 %v347_v0, 0.0  ;;  %v380_v6 = vmax.f32 %v348_v4, 0.0 }
  0x2b   : > { %1113 = vmatmul.mubr.msk.f32.gmra.mrb[6].mxu1 %vm382_vm0, %v372_v43 }
  0x2c   : > { %1095 = vmatmul.mubr.msk.f32.gmra.mrb[10].mxu0 %vm382_vm0, %v360_v31  ;;  %1115 = vmatprep.mubr.msk.f32.mxu1 %vm382_vm0, %v373_v47 }
  0x2d   : > { %1097 = vmatprep.mubr.msk.f32.mxu0 %vm382_vm0, %v361_v35 }
  0x2f   : > { %1116 = vmatmul.mubr.msk.f32.gmra.mrb[8].mxu1 %vm382_vm0, %v374_v53 }
  0x30   : > { %1098 = vmatmul.mubr.msk.f32.gmra.mrb[12].mxu0 %vm382_vm0, %v362_v41  ;;  %1118 = vmatprep.mubr.msk.f32.mxu1 %vm382_vm0, %v375_v56 }
  0x31   : > { %1100 = vmatprep.mubr.msk.f32.mxu0 %vm382_vm0, %v363_v46 }
  0x33   : > { %1119 = vmatmul.mubr.msk.f32.gmra.mrb[10].mxu1 %vm382_vm0, %v376_v60 }
  0x34   : > { %1101 = vmatmul.mubr.msk.f32.gmra.mrb[14].mxu0 %vm382_vm0, %v364_v52  ;;  %1121 = vmatprep.mubr.msk.f32.mxu1 %vm382_vm0, %v377_v63 }
  0x37   : > { %1122 = vmatmul.mubr.msk.f32.gmra.mrb[12].mxu1 %vm382_vm0, %v378_v3 }
  0x38   : > { %1124 = vmatprep.mubr.msk.f32.mxu1 %vm382_vm0, %v379_v5 }
  0x3b   : > { %1125 = vmatmul.mubr.msk.f32.gmra.mrb[14].mxu1 %vm382_vm0, %v380_v6 }
  0xeb   : > { %v1081_v1 = vpop.f32.mrb[0].mxu0 }
  0xec   : > { %705 = vst.msk [vmem:[%s1342_s8 + $0x8] sm:$0xff] %vm382_vm0, %v1081_v1  ;;  %v737_v2 = vsel %vm382_vm0, %v1081_v1, 0.0  ;;  %v806_v7 = vmul.f32 %v1081_v1, %v1081_v1  ;;  %v545_v8 = vpop.f32.mrb[1].mxu0 }
  0xed   : > { %704 = vst.msk [vmem:[%s1342_s8] sm:$0xff] %vm382_vm0, %v545_v8  ;;  %v736_v9 = vsel %vm382_vm0, %v545_v8, 0.0  ;;  %v805_v10 = vmul.f32 %v545_v8, %v545_v8 }
  0xee   : > { %v838_v11 = vsel %vm382_vm0, %v806_v7, 0.0  ;;  %v738_v12 = vadd.f32 %v737_v2, %v736_v9 }
  0xef   : > { %v837_v13 = vsel %vm382_vm0, %v805_v10, 0.0  ;;  %v1084_v14 = vpop.f32.mrb[2].mxu0 }
  0xf0   : > { %v839_v15 = vadd.f32 %v838_v11, %v837_v13  ;;  %707 = vst.msk [vmem:[%s1342_s8 + $0x18] sm:$0xff] %vm382_vm0, %v1084_v14  ;;  %v555_v16 = vpop.f32.mrb[3].mxu0  ;;  %v808_v17 = vmul.f32 %v1084_v14, %v1084_v14  ;;  %v741_v21 = vsel %vm382_vm0, %v1084_v14, 0.0 }
  0xf1   : > { %706 = vst.msk [vmem:[%s1342_s8 + $0x10] sm:$0xff] %vm382_vm0, %v555_v16  ;;  %v739_v18 = vsel %vm382_vm0, %v555_v16, 0.0  ;;  %v807_v19 = vmul.f32 %v555_v16, %v555_v16 }
  0xf2   : > { %v740_v20 = vadd.f32 %v739_v18, %v738_v12  ;;  %v842_v27 = vsel %vm382_vm0, %v808_v17, 0.0  ;;  %v1367_v36 = vpop.f32.mrb[0].mxu1 }
  0xf3   : > { %v840_v22 = vsel %vm382_vm0, %v807_v19, 0.0  ;;  %v1087_v23 = vpop.f32.mrb[4].mxu0  ;;  %721 = vst.msk [vmem:[%s1342_s8 + $0x88] sm:$0xff] %vm382_vm0, %v1367_v36  ;;  %v1374_v40 = vpop.f32.mrb[1].mxu1 }
  0xf4   : > { %v841_v24 = vadd.f32 %v840_v22, %v839_v15  ;;  %709 = vst.msk [vmem:[%s1342_s8 + $0x28] sm:$0xff] %vm382_vm0, %v1087_v23  ;;  %v565_v25 = vpop.f32.mrb[5].mxu0  ;;  %v742_v26 = vadd.f32 %v741_v21, %v740_v20  ;;  %v810_v28 = vmul.f32 %v1087_v23, %v1087_v23  ;;  %v745_v33 = vsel %vm382_vm0, %v1087_v23, 0.0  ;;  %720 = vst.msk [vmem:[%s1342_s8 + $0x80] sm:$0xff] %vm382_vm0, %v1374_v40 }
  0xf5   : > { %708 = vst.msk [vmem:[%s1342_s8 + $0x20] sm:$0xff] %vm382_vm0, %v565_v25  ;;  %v743_v29 = vsel %vm382_vm0, %v565_v25, 0.0  ;;  %v809_v30 = vmul.f32 %v565_v25, %v565_v25 }
  0xf6   : > { %v744_v31 = vadd.f32 %v743_v29, %v742_v26  ;;  %v843_v32 = vadd.f32 %v842_v27, %v841_v24  ;;  %v846_v41 = vsel %vm382_vm0, %v810_v28, 0.0  ;;  %v1385_v50 = vpop.f32.mrb[2].mxu1 }
  0xf7   : > { %v844_v34 = vsel %vm382_vm0, %v809_v30, 0.0  ;;  %v1090_v35 = vpop.f32.mrb[6].mxu0  ;;  %723 = vst.msk [vmem:[%s1342_s8 + $0x98] sm:$0xff] %vm382_vm0, %v1385_v50  ;;  %v1392_v54 = vpop.f32.mrb[3].mxu1 }
  0xf8   : > { %v845_v37 = vadd.f32 %v844_v34, %v843_v32  ;;  %711 = vst.msk [vmem:[%s1342_s8 + $0x38] sm:$0xff] %vm382_vm0, %v1090_v35  ;;  %v575_v38 = vpop.f32.mrb[7].mxu0  ;;  %v746_v39 = vadd.f32 %v745_v33, %v744_v31  ;;  %v812_v42 = vmul.f32 %v1090_v35, %v1090_v35  ;;  %v749_v47 = vsel %vm382_vm0, %v1090_v35, 0.0  ;;  %722 = vst.msk [vmem:[%s1342_s8 + $0x90] sm:$0xff] %vm382_vm0, %v1392_v54 }
  0xf9   : > { %710 = vst.msk [vmem:[%s1342_s8 + $0x30] sm:$0xff] %vm382_vm0, %v575_v38  ;;  %v747_v43 = vsel %vm382_vm0, %v575_v38, 0.0  ;;  %v811_v44 = vmul.f32 %v575_v38, %v575_v38  ;;  %v821_v32 = vmul.f32 %v1374_v40, %v1374_v40 }
  0xfa   : > { %v748_v45 = vadd.f32 %v747_v43, %v746_v39  ;;  %v847_v46 = vadd.f32 %v846_v41, %v845_v37  ;;  %v850_v55 = vsel %vm382_vm0, %v812_v42, 0.0  ;;  %v1403_v0 = vpop.f32.mrb[4].mxu1 }
  0xfb   : > { %v848_v48 = vsel %vm382_vm0, %v811_v44, 0.0  ;;  %v1093_v49 = vpop.f32.mrb[8].mxu0  ;;  %725 = vst.msk [vmem:[%s1342_s8 + $0xa8] sm:$0xff] %vm382_vm0, %v1403_v0  ;;  %v1410_v6 = vpop.f32.mrb[5].mxu1  ;;  %v767_v44 = vsel %vm382_vm0, %v1374_v40, 0.0  ;;  %v823_v40 = vmul.f32 %v1392_v54, %v1392_v54 }
  0xfc   : > { %v849_v51 = vadd.f32 %v848_v48, %v847_v46  ;;  %713 = vst.msk [vmem:[%s1342_s8 + $0x48] sm:$0xff] %vm382_vm0, %v1093_v49  ;;  %v585_v52 = vpop.f32.mrb[9].mxu0  ;;  %v750_v53 = vadd.f32 %v749_v47, %v748_v45  ;;  %v814_v56 = vmul.f32 %v1093_v49, %v1093_v49  ;;  %v753_v61 = vsel %vm382_vm0, %v1093_v49, 0.0  ;;  %724 = vst.msk [vmem:[%s1342_s8 + $0xa0] sm:$0xff] %vm382_vm0, %v1410_v6 }
  0xfd   : > { %712 = vst.msk [vmem:[%s1342_s8 + $0x40] sm:$0xff] %vm382_vm0, %v585_v52  ;;  %v751_v57 = vsel %vm382_vm0, %v585_v52, 0.0  ;;  %v813_v58 = vmul.f32 %v585_v52, %v585_v52  ;;  %v868_v52 = vsel %vm382_vm0, %v821_v32, 0.0 }
  0xfe   : > { %v752_v59 = vadd.f32 %v751_v57, %v750_v53  ;;  %v851_v60 = vadd.f32 %v850_v55, %v849_v51  ;;  %v854_v1 = vsel %vm382_vm0, %v814_v56, 0.0  ;;  %v1421_v14 = vpop.f32.mrb[6].mxu1  ;;  %v822_v51 = vmul.f32 %v1367_v36, %v1367_v36 }
  0xff   : > { %v852_v62 = vsel %vm382_vm0, %v813_v58, 0.0  ;;  %v1096_v63 = vpop.f32.mrb[10].mxu0  ;;  %727 = vst.msk [vmem:[%s1342_s8 + $0xb8] sm:$0xff] %vm382_vm0, %v1421_v14  ;;  %v1428_v18 = vpop.f32.mrb[7].mxu1  ;;  %v769_v56 = vsel %vm382_vm0, %v1367_v36, 0.0  ;;  %v771_v57 = vsel %vm382_vm0, %v1392_v54, 0.0  ;;  %v825_v36 = vmul.f32 %v1410_v6, %v1410_v6 }
 0x100   : > { %v853_v3 = vadd.f32 %v852_v62, %v851_v60  ;;  %715 = vst.msk [vmem:[%s1342_s8 + $0x58] sm:$0xff] %vm382_vm0, %v1096_v63  ;;  %v595_v4 = vpop.f32.mrb[11].mxu0  ;;  %v754_v5 = vadd.f32 %v753_v61, %v752_v59  ;;  %v816_v2 = vmul.f32 %v1096_v63, %v1096_v63  ;;  %v757_v11 = vsel %vm382_vm0, %v1096_v63, 0.0  ;;  %726 = vst.msk [vmem:[%s1342_s8 + $0xb0] sm:$0xff] %vm382_vm0, %v1428_v18 }
 0x101   : > { %714 = vst.msk [vmem:[%s1342_s8 + $0x50] sm:$0xff] %vm382_vm0, %v595_v4  ;;  %v755_v7 = vsel %vm382_vm0, %v595_v4, 0.0  ;;  %v815_v8 = vmul.f32 %v595_v4, %v595_v4  ;;  %v870_v62 = vsel %vm382_vm0, %v822_v51, 0.0  ;;  %v824_v63 = vmul.f32 %v1385_v50, %v1385_v50 }
 0x102   : > { %v756_v9 = vadd.f32 %v755_v7, %v754_v5  ;;  %v855_v10 = vadd.f32 %v854_v1, %v853_v3  ;;  %v858_v19 = vsel %vm382_vm0, %v816_v2, 0.0  ;;  %v1439_v28 = vpop.f32.mrb[8].mxu1  ;;  %v872_v3 = vsel %vm382_vm0, %v823_v40, 0.0 }
 0x103   : > { %v856_v12 = vsel %vm382_vm0, %v815_v8, 0.0  ;;  %v1099_v13 = vpop.f32.mrb[12].mxu0  ;;  %729 = vst.msk [vmem:[%s1342_s8 + $0xc8] sm:$0xff] %vm382_vm0, %v1439_v28  ;;  %v1448_v33 = vpop.f32.mrb[9].mxu1  ;;  %v773_v5 = vsel %vm382_vm0, %v1385_v50, 0.0  ;;  %v775_v1 = vsel %vm382_vm0, %v1410_v6, 0.0 }
 0x104   : > { %v857_v15 = vadd.f32 %v856_v12, %v855_v10  ;;  %717 = vst.msk [vmem:[%s1342_s8 + $0x68] sm:$0xff] %vm382_vm0, %v1099_v13  ;;  %v605_v16 = vpop.f32.mrb[13].mxu0  ;;  %v758_v17 = vadd.f32 %v757_v11, %v756_v9  ;;  %v818_v20 = vmul.f32 %v1099_v13, %v1099_v13  ;;  %v761_v25 = vsel %vm382_vm0, %v1099_v13, 0.0  ;;  %728 = vst.msk [vmem:[%s1342_s8 + $0xc0] sm:$0xff] %vm382_vm0, %v1448_v33 }
 0x105   : > { %716 = vst.msk [vmem:[%s1342_s8 + $0x60] sm:$0xff] %vm382_vm0, %v605_v16  ;;  %v759_v21 = vsel %vm382_vm0, %v605_v16, 0.0  ;;  %v817_v22 = vmul.f32 %v605_v16, %v605_v16  ;;  %v874_v10 = vsel %vm382_vm0, %v824_v63, 0.0  ;;  %v826_v11 = vmul.f32 %v1403_v0, %v1403_v0 }
 0x106   : > { %v760_v23 = vadd.f32 %v759_v21, %v758_v17  ;;  %v859_v24 = vadd.f32 %v858_v19, %v857_v15  ;;  %v862_v34 = vsel %vm382_vm0, %v818_v20, 0.0  ;;  %v1461_v45 = vpop.f32.mrb[10].mxu1  ;;  %v876_v12 = vsel %vm382_vm0, %v825_v36, 0.0 }
 0x107   : > { %v860_v26 = vsel %vm382_vm0, %v817_v22, 0.0  ;;  %v1102_v27 = vpop.f32.mrb[14].mxu0  ;;  %731 = vst.msk [vmem:[%s1342_s8 + $0xd8] sm:$0xff] %vm382_vm0, %v1461_v45  ;;  %v675_v48 = vpop.f32.mrb[11].mxu1  ;;  %v827_v13 = vmul.f32 %v1428_v18, %v1428_v18  ;;  %v777_v15 = vsel %vm382_vm0, %v1403_v0, 0.0  ;;  %v779_v16 = vsel %vm382_vm0, %v1428_v18, 0.0 }
 0x108   : > { %v861_v29 = vadd.f32 %v860_v26, %v859_v24  ;;  %719 = vst.msk [vmem:[%s1342_s8 + $0x78] sm:$0xff] %vm382_vm0, %v1102_v27  ;;  %v615_v30 = vpop.f32.mrb[15].mxu0  ;;  %v762_v31 = vadd.f32 %v761_v25, %v760_v23  ;;  %v820_v35 = vmul.f32 %v1102_v27, %v1102_v27  ;;  %v765_v42 = vsel %vm382_vm0, %v1102_v27, 0.0  ;;  %730 = vst.msk [vmem:[%s1342_s8 + $0xd0] sm:$0xff] %vm382_vm0, %v675_v48 }
 0x109   : > { %718 = vst.msk [vmem:[%s1342_s8 + $0x70] sm:$0xff] %vm382_vm0, %v615_v30  ;;  %v763_v37 = vsel %vm382_vm0, %v615_v30, 0.0  ;;  %v819_v38 = vmul.f32 %v615_v30, %v615_v30  ;;  %v878_v20 = vsel %vm382_vm0, %v826_v11, 0.0  ;;  %v828_v21 = vmul.f32 %v1421_v14, %v1421_v14 }
 0x10a   : > { %v764_v39 = vadd.f32 %v763_v37, %v762_v31  ;;  %v863_v41 = vadd.f32 %v862_v34, %v861_v29  ;;  %v866_v49 = vsel %vm382_vm0, %v820_v35, 0.0  ;;  %v1478_v58 = vpop.f32.mrb[12].mxu1  ;;  %v880_v22 = vsel %vm382_vm0, %v827_v13, 0.0 }
 0x10b   : > { %v864_v43 = vsel %vm382_vm0, %v819_v38, 0.0  ;;  %733 = vst.msk [vmem:[%s1342_s8 + $0xe8] sm:$0xff] %vm382_vm0, %v1478_v58  ;;  %v685_v61 = vpop.f32.mrb[13].mxu1  ;;  %v829_v23 = vmul.f32 %v1448_v33, %v1448_v33  ;;  %v781_v0 = vsel %vm382_vm0, %v1421_v14, 0.0  ;;  %v783_v18 = vsel %vm382_vm0, %v1448_v33, 0.0 }
 0x10c   : > { %v766_v46 = vadd.f32 %v765_v42, %v764_v39  ;;  %v865_v47 = vadd.f32 %v864_v43, %v863_v41  ;;  %732 = vst.msk [vmem:[%s1342_s8 + $0xe0] sm:$0xff] %vm382_vm0, %v685_v61  ;;  %v882_v29 = vsel %vm382_vm0, %v828_v21, 0.0  ;;  %v830_v30 = vmul.f32 %v1439_v28, %v1439_v28 }
 0x10d   : > { %v884_v31 = vsel %vm382_vm0, %v829_v23, 0.0  ;;  %v831_v32 = vmul.f32 %v675_v48, %v675_v48  ;;  %v785_v37 = vsel %vm382_vm0, %v1439_v28, 0.0  ;;  %v787_v14 = vsel %vm382_vm0, %v675_v48, 0.0 }
 0x10e   : > { %v867_v53 = vadd.f32 %v866_v49, %v865_v47  ;;  %v768_v55 = vadd.f32 %v767_v44, %v766_v46  ;;  %v1126_v2 = vpop.f32.mrb[14].mxu1  ;;  %v886_v33 = vsel %vm382_vm0, %v830_v30, 0.0  ;;  %v832_v41 = vmul.f32 %v1461_v45, %v1461_v45 }
 0x10f   : > { %735 = vst.msk [vmem:[%s1342_s8 + $0xf8] sm:$0xff] %vm382_vm0, %v1126_v2  ;;  %v695_v9 = vpop.f32.mrb[15].mxu1  ;;  %v888_v42 = vsel %vm382_vm0, %v831_v32, 0.0  ;;  %v833_v43 = vmul.f32 %v685_v61, %v685_v61  ;;  %v789_v47 = vsel %vm382_vm0, %v1461_v45, 0.0  ;;  %v791_v49 = vsel %vm382_vm0, %v685_v61, 0.0 }
 0x110   : > { %v869_v59 = vadd.f32 %v868_v52, %v867_v53  ;;  %v770_v60 = vadd.f32 %v769_v56, %v768_v55  ;;  %734 = vst.msk [vmem:[%s1342_s8 + $0xf0] sm:$0xff] %vm382_vm0, %v695_v9  ;;  %v890_v48 = vsel %vm382_vm0, %v832_v41, 0.0  ;;  %v834_v52 = vmul.f32 %v1478_v58, %v1478_v58 }
 0x111   : > { %v892_v40 = vsel %vm382_vm0, %v833_v43, 0.0  ;;  %v835_v53 = vmul.f32 %v695_v9, %v695_v9  ;;  %v795_v45 = vsel %vm382_vm0, %v695_v9, 0.0 }
 0x112   : > { %v772_v54 = vadd.f32 %v771_v57, %v770_v60  ;;  %v871_v4 = vadd.f32 %v870_v62, %v869_v59  ;;  %v793_v57 = vsel %vm382_vm0, %v1478_v58, 0.0  ;;  %v894_v61 = vsel %vm382_vm0, %v834_v52, 0.0 }
 0x113   : > { %v836_v62 = vmul.f32 %v1126_v2, %v1126_v2  ;;  %v896_v63 = vsel %vm382_vm0, %v835_v53, 0.0 }
 0x114   : > { %v873_v7 = vadd.f32 %v872_v3, %v871_v4  ;;  %v774_v8 = vadd.f32 %v773_v5, %v772_v54  ;;  %v797_v54 = vsel %vm382_vm0, %v1126_v2, 0.0 }
 0x116   : > { %v776_v50 = vadd.f32 %v775_v1, %v774_v8  ;;  %v875_v6 = vadd.f32 %v874_v10, %v873_v7  ;;  %v898_v1 = vsel %vm382_vm0, %v836_v62, 0.0  ;;  %v906_v10 = vlaneseq }
 0x118   : > { %v877_v17 = vadd.f32 %v876_v12, %v875_v6  ;;  %v778_v19 = vadd.f32 %v777_v15, %v776_v50  ;;  %v907_v6 = vshrl.u32 %v906_v10, 7 }
 0x11a   : > { %v780_v24 = vadd.f32 %v779_v16, %v778_v19  ;;  %v879_v25 = vadd.f32 %v878_v20, %v877_v17  ;;  %vm908_vm1 = vcmp.eq.s32.totalorder %v907_v6, 0 }
 0x11c   : > { %v881_v26 = vadd.f32 %v880_v22, %v879_v25  ;;  %v782_v27 = vadd.f32 %v781_v0, %v780_v24 }
 0x11e   : > { %v784_v34 = vadd.f32 %v783_v18, %v782_v27  ;;  %v883_v35 = vadd.f32 %v882_v29, %v881_v26 }
 0x120   : > { %v885_v38 = vadd.f32 %v884_v31, %v883_v35  ;;  %v786_v39 = vadd.f32 %v785_v37, %v784_v34 }
 0x122   : > { %v788_v44 = vadd.f32 %v787_v14, %v786_v39  ;;  %v887_v46 = vadd.f32 %v886_v33, %v885_v38 }
 0x124   : > { %v889_v28 = vadd.f32 %v888_v42, %v887_v46  ;;  %v790_v51 = vadd.f32 %v789_v47, %v788_v44 }
 0x126   : > { %v792_v55 = vadd.f32 %v791_v49, %v790_v51  ;;  %v891_v56 = vadd.f32 %v890_v48, %v889_v28 }
 0x128   : > { %v893_v59 = vadd.f32 %v892_v40, %v891_v56  ;;  %v794_v60 = vadd.f32 %v793_v57, %v792_v55 }
 0x12a   : > { %v796_v3 = vadd.f32 %v795_v45, %v794_v60  ;;  %v895_v36 = vadd.f32 %v894_v61, %v893_v59 }
 0x12c   : > { %v798_v4 = vadd.f32 %v797_v54, %v796_v3  ;;  %v897_v5 = vadd.f32 %v896_v63, %v895_v36 }
 0x12e   : > { %v799_v7 = vrot.slane %v798_v4, 4  ;;  %v899_v58 = vadd.f32 %v898_v1, %v897_v5 }
 0x130   : > { %v800_v8 = vadd.f32 %v799_v7, %v798_v4  ;;  %v900_v9 = vrot.slane %v899_v58, 4 }
 0x132   : > { %v801_v11 = vrot.slane %v800_v8, 2  ;;  %v901_v12 = vadd.f32 %v900_v9, %v899_v58 }
 0x134   : > { %v802_v13 = vadd.f32 %v801_v11, %v800_v8  ;;  %v902_v50 = vrot.slane %v901_v12, 2 }
 0x136   : > { %v803_v15 = vrot.slane %v802_v13, 1  ;;  %v903_v16 = vadd.f32 %v902_v50, %v901_v12 }
 0x138   : > { %v904_v2 = vrot.slane %v903_v16, 1  ;;  %v804_v17 = vadd.f32 %v803_v15, %v802_v13 }
 0x13a   : > { %v905_v19 = vadd.f32 %v904_v2, %v903_v16 }
 0x13c   : > { %v909_v20 = vsel %vm908_vm1, %v804_v17, %v905_v19 }
 0x13d   : > { %910 = vst.msk [vmem:[%s238_s12] sm:$0xff] %vm382_vm0, %v909_v20 }
 0x13e PF: > { %s16_s18 = sadd.s32 1, %s1143_s18  }
 0x13f   : > { %p13_p5 = scmp.ge.s32.totalorder %s16_s18, 4  }
 0x141   :  { %15 = sbr.rel (!%p13_p5) target bundleno = 1 (0x1), region = 78 }

// kernel: bottleneck_forward.7
= control target key start
LH: loop header
LB: loop body
LE: loop exit
PB: predicated region body
PF: predicated region fallthrough
CT: control target
= control target key end

     0   :  { %s132_s0 = inlined_call_operand.vmem [shape: f32[32,128], index: 0, kind: input, shape index: {}]   ;;  %s133_s1 = inlined_call_operand.vmem [shape: f32[32,128], index: 1, kind: input, shape index: {}]   ;;  %s134_s2 = inlined_call_operand.vmem [shape: f32[1,128], index: 2, kind: input, shape index: {}]   ;;  %s135_s3 = inlined_call_operand.vmem [shape: f32[1,128], index: 3, kind: input, shape index: {}]   ;;  %s136_s4 = inlined_call_operand.vmem [shape: f32[32,128], index: 4, kind: output, shape index: {}]  }
   0x1   :  { %v17_v0 = vld [vmem:[%s132_s0] sm:$0xff]  ;;  %v18_v4 = vld [vmem:[%s132_s0 + $0x8] sm:$0xff]  ;;  %v19_v7 = vld [vmem:[%s132_s0 + $0x10] sm:$0xff] }
   0x2   :  { %v63_v1 = vld [vmem:[%s134_s2] ss:$0 sm:$0xff]  ;;  %v20_v8 = vld [vmem:[%s132_s0 + $0x18] sm:$0xff]  ;;  %v44_v10 = vld [vmem:[%s133_s1 + $0x8] sm:$0xff] }
   0x3   :  { %v64_v2 = vld [vmem:[%s135_s3] ss:$0 sm:$0xff]  ;;  %v28_v3 = vmul.f32 %v63_v1, %v17_v0  ;;  %v29_v6 = vmul.f32 %v63_v1, %v18_v4  ;;  %v30_v11 = vmul.f32 %v63_v1, %v19_v7  ;;  %v31_v12 = vmul.f32 %v63_v1, %v20_v8  ;;  %v45_v14 = vld [vmem:[%s133_s1 + $0x10] sm:$0xff]  ;;  %v46_v15 = vld [vmem:[%s133_s1 + $0x18] sm:$0xff] }
   0x4   :  { %v43_v5 = vld [vmem:[%s133_s1] sm:$0xff] }
   0x5   :  { %v39_v9 = vadd.f32 %v64_v2, %v28_v3  ;;  %v40_v13 = vadd.f32 %v64_v2, %v29_v6  ;;  %v41_v17 = vadd.f32 %v64_v2, %v30_v11  ;;  %v42_v18 = vadd.f32 %v64_v2, %v31_v12 }
   0x7   :  { %v47_v16 = vadd.f32 %v43_v5, %v39_v9  ;;  %v48_v19 = vadd.f32 %v44_v10, %v40_v13  ;;  %v49_v21 = vadd.f32 %v45_v14, %v41_v17  ;;  %v50_v22 = vadd.f32 %v46_v15, %v42_v18 }
   0x9   :  { %v51_v20 = vmax.f32 %v47_v16, 0.0  ;;  %v52_v23 = vmax.f32 %v48_v19, 0.0  ;;  %v53_v24 = vmax.f32 %v49_v21, 0.0  ;;  %v54_v25 = vmax.f32 %v50_v22, 0.0 }
   0xb   :  { %55 = vst [vmem:[%s136_s4] sm:$0xff] %v51_v20  ;;  %56 = vst [vmem:[%s136_s4 + $0x8] sm:$0xff] %v52_v23 }
   0xc   :  { %57 = vst [vmem:[%s136_s4 + $0x10] sm:$0xff] %v53_v24  ;;  %58 = vst [vmem:[%s136_s4 + $0x18] sm:$0xff] %v54_v25 }

// kernel: bottleneck_forward.5
= control target key start
LH: loop header
LB: loop body
LE: loop exit
PB: predicated region body
PF: predicated region fallthrough
CT: control target
= control target key end

     0   :  { %s5546_s18 = smov 0   ;;  %s6834_s0 = inlined_call_operand.vmem [shape: f32[2,16,16,8], index: 0, kind: input, shape index: {}]   ;;  %s6835_s1 = inlined_call_operand.vmem [shape: f32[1,8], index: 1, kind: input, shape index: {}]   ;;  %s6836_s2 = inlined_call_operand.vmem [shape: f32[1,8], index: 2, kind: input, shape index: {}]   ;;  %s6837_s3 = inlined_call_operand.vmem [shape: f32[72,8], index: 3, kind: input, shape index: {}]   ;;  %s6838_s4 = inlined_call_operand.vmem [shape: f32[2,16,16,8], index: 4, kind: output, shape index: {0}]   ;;  %s6839_s5 = inlined_call_operand.vmem [shape: f32[2,8,8], index: 5, kind: output, shape index: {1}]  }
   0x1 LB: > { %s4188_s19 = sadd.s32 4294967295, %s5513_s18   ;;  %p4192_p0 = scmp.ge.s32.totalorder %s5513_s18, 1  ;;  %s5513_s18 = sphi %s5546_s18, %s16_s18  }
   0x2   : > { %p190_p1 = scmp.lt.s32.totalorder %s5513_s18, 3 }
   0x4   : > { %p191_p2 = pnand %p4192_p0, %p190_p1 }
   0x6   : > { %194 = sbr.rel (%p191_p2) target bundleno = 579 (0x243), region = 36 }
   0xd   : > { %v5557_v0 = vld [vmem:[%s6837_s3 + $0x8] sm:$0xff]  ;;  %vm378_vm0 = vcmask 64512   ;;  %v5562_v1 = vld [vmem:[%s6837_s3 + $0x20] sm:$0xff]  ;;  %p5566_p3 = scmp.lt.s32.totalorder %s4188_s19, 1  ;;  %v5515_v3 = vmov 0.0   ;;  %v5776_v27 = vld [vmem:[%s6837_s3 + $0x10] sm:$0xff] }
   0xe   : > { %v5573_v2 = vld [vmem:[%s6837_s3] sm:$0xff]  ;;  %4789 = vmatprep.subr.mxu1 %v5557_v0  ;;  %380 = vst.msk [vmem:[#allocation2 + $0x8] sm:$0xff] %vm378_vm0, %v5515_v3  ;;  %379 = vst.msk [vmem:[#allocation2] sm:$0xff] %vm378_vm0, %v5515_v3  ;;  %4989 = vmatprep.subr.mxu0 %v5562_v1  ;;  %v5724_v4 = vld [vmem:[%s6837_s3 + $0x28] sm:$0xff] }
   0xf   : > { %381 = vst.msk [vmem:[#allocation2 + $0x10] sm:$0xff] %vm378_vm0, %v5515_v3  ;;  %382 = vst.msk [vmem:[#allocation2 + $0x18] sm:$0xff] %vm378_vm0, %v5515_v3  ;;  %4790 = vmatpush3.msra.mxu1 %v5557_v0  ;;  %4990 = vmatpush3.msra.mxu0 %v5562_v1  ;;  %s6946_s19 = smov (!%p5566_p3, %s4188_s19), 1  ;;  %v5740_v5 = vld [vmem:[%s6835_s1] ss:$0 sm:$0xff] }
  0x10   : > { %383 = vst.msk [vmem:[#allocation2 + $0x20] sm:$0xff] %vm378_vm0, %v5515_v3  ;;  %384 = vst.msk [vmem:[#allocation2 + $0x28] sm:$0xff] %vm378_vm0, %v5515_v3  ;;  %4839 = vmatprep.subr.mxu1 %v5573_v2  ;;  %5039 = vmatprep.subr.mxu0 %v5724_v4  ;;  %s4490_s29 = sshll.u32 %s6946_s19, 8  ;;  %v5752_v6 = vld [vmem:[%s6836_s2] ss:$0 sm:$0xff] }
  0x11   : > { %385 = vst.msk [vmem:[#allocation2 + $0x30] sm:$0xff] %vm378_vm0, %v5515_v3  ;;  %386 = vst.msk [vmem:[#allocation2 + $0x38] sm:$0xff] %vm378_vm0, %v5515_v3  ;;  %s5747_s9 = scalar_lea.vmem %s6834_s0, %s4490_s29  ;;  %s6688_s28 = scalar_lea.vmem %s6838_s4, %s4490_s29 }
  0x12   : > { %387 = vst.msk [vmem:[#allocation2 + $0x40] sm:$0xff] %vm378_vm0, %v5515_v3  ;;  %388 = vst.msk [vmem:[#allocation2 + $0x48] sm:$0xff] %vm378_vm0, %v5515_v3  ;;  %v236_v7 = vld [vmem:[%s5747_s9] sm:$0xff]  ;;  %v237_v8 = vld [vmem:[%s5747_s9 + $0x8] sm:$0xff]  ;;  %s4197_s29 = sshll.u32 %s6946_s19, 3 }
  0x13   : > { %389 = vst.msk [vmem:[#allocation2 + $0x50] sm:$0xff] %vm378_vm0, %v5515_v3  ;;  %390 = vst.msk [vmem:[#allocation2 + $0x58] sm:$0xff] %vm378_vm0, %v5515_v3  ;;  %v238_v9 = vld [vmem:[%s5747_s9 + $0x10] sm:$0xff]  ;;  %v275_v10 = vmul.f32 %v5740_v5, %v236_v7  ;;  %v276_v11 = vmul.f32 %v5740_v5, %v237_v8  ;;  %v239_v13 = vld [vmem:[%s5747_s9 + $0x18] sm:$0xff]  ;;  %s235_s7 = scalar_lea.vmem %s6839_s5, %s4197_s29 }
  0x14   : > { %391 = vst.msk [vmem:[#allocation2 + $0x60] sm:$0xff] %vm378_vm0, %v5515_v3  ;;  %392 = vst.msk [vmem:[#allocation2 + $0x68] sm:$0xff] %vm378_vm0, %v5515_v3  ;;  %v277_v12 = vmul.f32 %v5740_v5, %v238_v9  ;;  %v240_v14 = vld [vmem:[%s5747_s9 + $0x20] sm:$0xff]  ;;  %v241_v15 = vld [vmem:[%s5747_s9 + $0x28] sm:$0xff]  ;;  %v278_v18 = vmul.f32 %v5740_v5, %v239_v13 }
  0x15   : > { %393 = vst.msk [vmem:[#allocation2 + $0x70] sm:$0xff] %vm378_vm0, %v5515_v3  ;;  %394 = vst.msk [vmem:[#allocation2 + $0x78] sm:$0xff] %vm378_vm0, %v5515_v3  ;;  %v517_v16 = vld [vmem:[#allocation2 + $0x8] sm:$0xff]  ;;  %v279_v19 = vmul.f32 %v5740_v5, %v240_v14  ;;  %v280_v20 = vmul.f32 %v5740_v5, %v241_v15  ;;  %v242_v21 = vld [vmem:[%s5747_s9 + $0x30] sm:$0xff]  ;;  %v314_v22 = vadd.f32 %v5752_v6, %v275_v10 }
  0x16   : > { %395 = vst.msk [vmem:[#allocation2 + $0x80] sm:$0xff] %vm378_vm0, %v5515_v3  ;;  %396 = vst.msk [vmem:[#allocation2 + $0x88] sm:$0xff] %vm378_vm0, %v5515_v3  ;;  %v518_v17 = vld [vmem:[#allocation2 + $0x10] sm:$0xff]  ;;  %4791 = vmatprep.mubr.msk.f32.mxu1 %vm378_vm0, %v517_v16  ;;  %v315_v23 = vadd.f32 %v5752_v6, %v276_v11  ;;  %v316_v24 = vadd.f32 %v5752_v6, %v277_v12  ;;  %v281_v25 = vmul.f32 %v5740_v5, %v242_v21  ;;  %v243_v26 = vld [vmem:[%s5747_s9 + $0x38] sm:$0xff] }
  0x17   : > { %397 = vst.msk [vmem:[#allocation2 + $0x90] sm:$0xff] %vm378_vm0, %v5515_v3  ;;  %398 = vst.msk [vmem:[#allocation2 + $0x98] sm:$0xff] %vm378_vm0, %v5515_v3  ;;  %4792 = vmatmul.mubr.msk.f32.vlgmr.msra.gmra.mrb[0].mxu1 %vm378_vm0, %v518_v17  ;;  %v317_v28 = vadd.f32 %v5752_v6, %v278_v18  ;;  %v318_v29 = vadd.f32 %v5752_v6, %v279_v19  ;;  %v319_v30 = vadd.f32 %v5752_v6, %v280_v20  ;;  %v244_v32 = vld [vmem:[%s5747_s9 + $0x40] sm:$0xff]  ;;  %v245_v33 = vld [vmem:[%s5747_s9 + $0x48] sm:$0xff] }
  0x18   : > { %399 = vst.msk [vmem:[#allocation2 + $0xa0] sm:$0xff] %vm378_vm0, %v5515_v3  ;;  %400 = vst.msk [vmem:[#allocation2 + $0xa8] sm:$0xff] %vm378_vm0, %v5515_v3  ;;  %v282_v31 = vmul.f32 %v5740_v5, %v243_v26  ;;  %v246_v34 = vld [vmem:[%s5747_s9 + $0x50] sm:$0xff]  ;;  %v346_v35 = vmax.f32 %v314_v22, 0.0  ;;  %v347_v36 = vmax.f32 %v315_v23, 0.0  ;;  %4840 = vmatpush3.msra.mxu1 %v5573_v2  ;;  %v348_v37 = vmax.f32 %v316_v24, 0.0 }
  0x19   : > { %401 = vst.msk [vmem:[#allocation2 + $0xb0] sm:$0xff] %vm378_vm0, %v5515_v3  ;;  %402 = vst.msk [vmem:[#allocation2 + $0xb8] sm:$0xff] %vm378_vm0, %v5515_v3  ;;  %v320_v38 = vadd.f32 %v5752_v6, %v281_v25  ;;  %v247_v39 = vld [vmem:[%s5747_s9 + $0x58] sm:$0xff]  ;;  %v248_v40 = vld [vmem:[%s5747_s9 + $0x60] sm:$0xff]  ;;  %v349_v42 = vmax.f32 %v317_v28, 0.0  ;;  %v350_v43 = vmax.f32 %v318_v29, 0.0  ;;  %4889 = vmatprep.subr.mxu1 %v5776_v27  ;;  %v283_v48 = vmul.f32 %v5740_v5, %v244_v32 }
  0x1a   : > { %403 = vst.msk [vmem:[#allocation2 + $0xc0] sm:$0xff] %vm378_vm0, %v5515_v3  ;;  %404 = vst.msk [vmem:[#allocation2 + $0xc8] sm:$0xff] %vm378_vm0, %v5515_v3  ;;  %v249_v41 = vld [vmem:[%s5747_s9 + $0x68] sm:$0xff]  ;;  %v351_v44 = vmax.f32 %v319_v30, 0.0  ;;  %v321_v45 = vadd.f32 %v5752_v6, %v282_v31  ;;  %v250_v46 = vld [vmem:[%s5747_s9 + $0x70] sm:$0xff]  ;;  %v284_v49 = vmul.f32 %v5740_v5, %v245_v33  ;;  %v285_v50 = vmul.f32 %v5740_v5, %v246_v34 }
  0x1b   : > { %405 = vst.msk [vmem:[#allocation2 + $0xd0] sm:$0xff] %vm378_vm0, %v5515_v3  ;;  %406 = vst.msk [vmem:[#allocation2 + $0xd8] sm:$0xff] %vm378_vm0, %v5515_v3  ;;  %v352_v47 = vmax.f32 %v320_v38, 0.0  ;;  %v251_v51 = vld [vmem:[%s5747_s9 + $0x78] sm:$0xff]  ;;  %v286_v53 = vmul.f32 %v5740_v5, %v247_v39  ;;  %v287_v54 = vmul.f32 %v5740_v5, %v248_v40  ;;  %v288_v55 = vmul.f32 %v5740_v5, %v249_v41  ;;  %v252_v0 = vld [vmem:[%s5747_s9 + $0x80] sm:$0xff] }
  0x1c   : > { %407 = vst.msk [vmem:[#allocation2 + $0xe0] sm:$0xff] %vm378_vm0, %v5515_v3  ;;  %408 = vst.msk [vmem:[#allocation2 + $0xe8] sm:$0xff] %vm378_vm0, %v5515_v3  ;;  %v353_v52 = vmax.f32 %v321_v45, 0.0  ;;  %v322_v56 = vadd.f32 %v5752_v6, %v283_v48  ;;  %v323_v57 = vadd.f32 %v5752_v6, %v284_v49  ;;  %v324_v58 = vadd.f32 %v5752_v6, %v285_v50  ;;  %v253_v2 = vld [vmem:[%s5747_s9 + $0x88] sm:$0xff]  ;;  %v255_v11 = vld [vmem:[%s5747_s9 + $0x98] sm:$0xff] }
  0x1d   : > { %409 = vst.msk [vmem:[#allocation2 + $0xf0] sm:$0xff] %vm378_vm0, %v5515_v3  ;;  %410 = vst.msk [vmem:[#allocation2 + $0xf8] sm:$0xff] %vm378_vm0, %v5515_v3  ;;  %v289_v59 = vmul.f32 %v5740_v5, %v250_v46  ;;  %v325_v60 = vadd.f32 %v5752_v6, %v286_v53  ;;  %v326_v61 = vadd.f32 %v5752_v6, %v287_v54  ;;  %v256_v12 = vld [vmem:[%s5747_s9 + $0xa0] sm:$0xff]  ;;  %v257_v13 = vld [vmem:[%s5747_s9 + $0xa8] sm:$0xff] }
  0x1e   : > { %411 = vst.msk [vmem:[#allocation2 + $0x100] sm:$0xff] %vm378_vm0, %v5515_v3  ;;  %412 = vst.msk [vmem:[#allocation2 + $0x108] sm:$0xff] %vm378_vm0, %v5515_v3  ;;  %v327_v62 = vadd.f32 %v5752_v6, %v288_v55  ;;  %v290_v63 = vmul.f32 %v5740_v5, %v251_v51  ;;  %v354_v7 = vmax.f32 %v322_v56, 0.0  ;;  %v355_v8 = vmax.f32 %v323_v57, 0.0  ;;  %v258_v22 = vld [vmem:[%s5747_s9 + $0xb0] sm:$0xff]  ;;  %v260_v39 = vld [vmem:[%s5747_s9 + $0xc0] sm:$0xff] }
  0x1f   : > { %413 = vst.msk [vmem:[#allocation2 + $0x110] sm:$0xff] %vm378_vm0, %v5515_v3  ;;  %414 = vst.msk [vmem:[#allocation2 + $0x118] sm:$0xff] %vm378_vm0, %v5515_v3  ;;  %v356_v9 = vmax.f32 %v324_v58, 0.0  ;;  %v328_v10 = vadd.f32 %v5752_v6, %v289_v59  ;;  %v357_v14 = vmax.f32 %v325_v60, 0.0  ;;  %v358_v15 = vmax.f32 %v326_v61, 0.0  ;;  %v5847_v32 = vld [vmem:[%s6837_s3 + $0x30] sm:$0xff] }
  0x20   : > { %415 = vst.msk [vmem:[#allocation2 + $0x120] sm:$0xff] %vm378_vm0, %v5515_v3  ;;  %416 = vst.msk [vmem:[#allocation2 + $0x128] sm:$0xff] %vm378_vm0, %v5515_v3  ;;  %v359_v16 = vmax.f32 %v327_v62, 0.0  ;;  %v329_v17 = vadd.f32 %v5752_v6, %v290_v63  ;;  %v291_v19 = vmul.f32 %v5740_v5, %v252_v0  ;;  %v292_v20 = vmul.f32 %v5740_v5, %v253_v2  ;;  %v261_v40 = vld [vmem:[%s5747_s9 + $0xc8] sm:$0xff]  ;;  %v262_v41 = vld [vmem:[%s5747_s9 + $0xd0] sm:$0xff] }
  0x21   : > { %417 = vst.msk [vmem:[#allocation2 + $0x130] sm:$0xff] %vm378_vm0, %v5515_v3  ;;  %418 = vst.msk [vmem:[#allocation2 + $0x138] sm:$0xff] %vm378_vm0, %v5515_v3  ;;  %v360_v18 = vmax.f32 %v328_v10, 0.0  ;;  %v294_v28 = vmul.f32 %v5740_v5, %v255_v11  ;;  %v295_v29 = vmul.f32 %v5740_v5, %v256_v12  ;;  %v296_v30 = vmul.f32 %v5740_v5, %v257_v13  ;;  %v264_v48 = vld [vmem:[%s5747_s9 + $0xe0] sm:$0xff]  ;;  %v265_v57 = vld [vmem:[%s5747_s9 + $0xe8] sm:$0xff] }
  0x22   : > { %419 = vst.msk [vmem:[#allocation2 + $0x140] sm:$0xff] %vm378_vm0, %v5515_v3  ;;  %420 = vst.msk [vmem:[#allocation2 + $0x148] sm:$0xff] %vm378_vm0, %v5515_v3  ;;  %v361_v26 = vmax.f32 %v329_v17, 0.0  ;;  %v330_v31 = vadd.f32 %v5752_v6, %v291_v19  ;;  %v331_v33 = vadd.f32 %v5752_v6, %v292_v20  ;;  %v297_v46 = vmul.f32 %v5740_v5, %v258_v22  ;;  %v266_v61 = vld [vmem:[%s5747_s9 + $0xf0] sm:$0xff] }
  0x23   : > { %421 = vst.msk [vmem:[#allocation2 + $0x150] sm:$0xff] %vm378_vm0, %v5515_v3  ;;  %422 = vst.msk [vmem:[#allocation2 + $0x158] sm:$0xff] %vm378_vm0, %v5515_v3  ;;  %v335_v38 = vadd.f32 %v5752_v6, %v296_v30  ;;  %v299_v54 = vmul.f32 %v5740_v5, %v260_v39  ;;  %v300_v55 = vmul.f32 %v5740_v5, %v261_v40 }
  0x24   : > { %423 = vst.msk [vmem:[#allocation2 + $0x160] sm:$0xff] %vm378_vm0, %v5515_v3  ;;  %424 = vst.msk [vmem:[#allocation2 + $0x168] sm:$0xff] %vm378_vm0, %v5515_v3  ;;  %v336_v53 = vadd.f32 %v5752_v6, %v297_v46  ;;  %v301_v56 = vmul.f32 %v5740_v5, %v262_v41  ;;  %v303_v60 = vmul.f32 %v5740_v5, %v264_v48 }
  0x25   : > { %425 = vst.msk [vmem:[#allocation2 + $0x170] sm:$0xff] %vm378_vm0, %v5515_v3  ;;  %426 = vst.msk [vmem:[#allocation2 + $0x178] sm:$0xff] %vm378_vm0, %v5515_v3  ;;  %v367_v51 = vmax.f32 %v335_v38, 0.0  ;;  %v338_v0 = vadd.f32 %v5752_v6, %v299_v54  ;;  %v339_v2 = vadd.f32 %v5752_v6, %v300_v55  ;;  %v304_v12 = vmul.f32 %v5740_v5, %v265_v57 }
  0x26   : > { %427 = vst.msk [vmem:[#allocation2 + $0x180] sm:$0xff] %vm378_vm0, %v5515_v3  ;;  %428 = vst.msk [vmem:[#allocation2 + $0x188] sm:$0xff] %vm378_vm0, %v5515_v3  ;;  %v368_v63 = vmax.f32 %v336_v53, 0.0  ;;  %v342_v11 = vadd.f32 %v5752_v6, %v303_v60 }
  0x27   : > { %429 = vst.msk [vmem:[#allocation2 + $0x190] sm:$0xff] %vm378_vm0, %v5515_v3  ;;  %430 = vst.msk [vmem:[#allocation2 + $0x198] sm:$0xff] %vm378_vm0, %v5515_v3  ;;  %v370_v13 = vmax.f32 %v338_v0, 0.0  ;;  %v343_v19 = vadd.f32 %v5752_v6, %v304_v12 }
  0x28   : > { %431 = vst.msk [vmem:[#allocation2 + $0x1a0] sm:$0xff] %vm378_vm0, %v5515_v3  ;;  %432 = vst.msk [vmem:[#allocation2 + $0x1a8] sm:$0xff] %vm378_vm0, %v5515_v3 }
  0x29   : > { %433 = vst.msk [vmem:[#allocation2 + $0x1b0] sm:$0xff] %vm378_vm0, %v5515_v3  ;;  %434 = vst.msk [vmem:[#allocation2 + $0x1b8] sm:$0xff] %vm378_vm0, %v5515_v3 }
  0x2a   : > { %435 = vst.msk [vmem:[#allocation2 + $0x1c0] sm:$0xff] %vm378_vm0, %v5515_v3  ;;  %436 = vst.msk [vmem:[#allocation2 + $0x1c8] sm:$0xff] %vm378_vm0, %v5515_v3 }
  0x2b   : > { %437 = vst.msk [vmem:[#allocation2 + $0x1d0] sm:$0xff] %vm378_vm0, %v5515_v3  ;;  %438 = vst.msk [vmem:[#allocation2 + $0x1d8] sm:$0xff] %vm378_vm0, %v5515_v3 }
  0x2c   : > { %439 = vst.msk [vmem:[#allocation2 + $0x1e0] sm:$0xff] %vm378_vm0, %v5515_v3  ;;  %440 = vst.msk [vmem:[#allocation2 + $0x1e8] sm:$0xff] %vm378_vm0, %v5515_v3 }
  0x2d   : > { %441 = vst.msk [vmem:[#allocation2 + $0x1f0] sm:$0xff] %vm378_vm0, %v5515_v3  ;;  %442 = vst.msk [vmem:[#allocation2 + $0x1f8] sm:$0xff] %vm378_vm0, %v5515_v3 }
  0x2e   : > { %443 = vst.msk [vmem:[#allocation2 + $0x200] sm:$0xff] %vm378_vm0, %v5515_v3  ;;  %444 = vst.msk [vmem:[#allocation2 + $0x208] sm:$0xff] %vm378_vm0, %v5515_v3 }
  0x2f   : > { %445 = vst.msk [vmem:[#allocation2 + $0x210] sm:$0xff] %vm378_vm0, %v5515_v3  ;;  %446 = vst.msk [vmem:[#allocation2 + $0x218] sm:$0xff] %vm378_vm0, %v5515_v3 }
  0x30   : > { %447 = vst.msk [vmem:[#allocation2 + $0x220] sm:$0xff] %vm378_vm0, %v5515_v3  ;;  %448 = vst.msk [vmem:[#allocation2 + $0x228] sm:$0xff] %vm378_vm0, %v5515_v3 }
  0x31   : > { %449 = vst.msk [vmem:[#allocation2 + $0x230] sm:$0xff] %vm378_vm0, %v5515_v3  ;;  %450 = vst.msk [vmem:[#allocation2 + $0x238] sm:$0xff] %vm378_vm0, %v5515_v3  ;;  %v254_v3 = vld [vmem:[%s5747_s9 + $0x90] sm:$0xff] }
  0x32   : > { %452 = vst.msk [vmem:[#allocation2 + $0x28] sm:$0xff] %vm378_vm0, %v346_v35  ;;  %453 = vst.msk [vmem:[#allocation2 + $0x30] sm:$0xff] %vm378_vm0, %v347_v36  ;;  %v293_v21 = vmul.f32 %v5740_v5, %v254_v3  ;;  %v259_v35 = vld [vmem:[%s5747_s9 + $0xb8] sm:$0xff]  ;;  %v333_v36 = vadd.f32 %v5752_v6, %v294_v28  ;;  %v340_v3 = vadd.f32 %v5752_v6, %v301_v56 }
  0x33   : > { %454 = vst.msk [vmem:[#allocation2 + $0x48] sm:$0xff] %vm378_vm0, %v348_v37  ;;  %455 = vst.msk [vmem:[#allocation2 + $0x50] sm:$0xff] %vm378_vm0, %v349_v42  ;;  %v334_v37 = vadd.f32 %v5752_v6, %v295_v29 }
  0x34   : > { %456 = vst.msk [vmem:[#allocation2 + $0x68] sm:$0xff] %vm378_vm0, %v350_v43  ;;  %457 = vst.msk [vmem:[#allocation2 + $0x70] sm:$0xff] %vm378_vm0, %v351_v44  ;;  %v332_v34 = vadd.f32 %v5752_v6, %v293_v21  ;;  %v362_v43 = vmax.f32 %v330_v31, 0.0  ;;  %v363_v44 = vmax.f32 %v331_v33, 0.0 }
  0x35   : > { %458 = vst.msk [vmem:[#allocation2 + $0x88] sm:$0xff] %vm378_vm0, %v352_v47  ;;  %459 = vst.msk [vmem:[#allocation2 + $0x90] sm:$0xff] %vm378_vm0, %v353_v52  ;;  %v263_v47 = vld [vmem:[%s5747_s9 + $0xd8] sm:$0xff]  ;;  %v366_v50 = vmax.f32 %v334_v37, 0.0  ;;  %v298_v52 = vmul.f32 %v5740_v5, %v259_v35 }
  0x36   : > { %460 = vst.msk [vmem:[#allocation2 + $0xa8] sm:$0xff] %vm378_vm0, %v354_v7  ;;  %461 = vst.msk [vmem:[#allocation2 + $0xb0] sm:$0xff] %vm378_vm0, %v355_v8  ;;  %v364_v45 = vmax.f32 %v332_v34, 0.0  ;;  %v302_v59 = vmul.f32 %v5740_v5, %v263_v47  ;;  %v267_v7 = vld [vmem:[%s5747_s9 + $0xf8] sm:$0xff] }
  0x37   : > { %462 = vst.msk [vmem:[#allocation2 + $0xc8] sm:$0xff] %vm378_vm0, %v356_v9  ;;  %463 = vst.msk [vmem:[#allocation2 + $0xd0] sm:$0xff] %vm378_vm0, %v357_v14  ;;  %v337_v58 = vadd.f32 %v5752_v6, %v298_v52  ;;  %v371_v14 = vmax.f32 %v339_v2, 0.0  ;;  %v306_v20 = vmul.f32 %v5740_v5, %v267_v7 }
  0x38   : > { %464 = vst.msk [vmem:[#allocation2 + $0xe8] sm:$0xff] %vm378_vm0, %v358_v15  ;;  %465 = vst.msk [vmem:[#allocation2 + $0xf0] sm:$0xff] %vm378_vm0, %v359_v16  ;;  %v341_v10 = vadd.f32 %v5752_v6, %v302_v59  ;;  %v372_v15 = vmax.f32 %v340_v3, 0.0  ;;  %v305_v16 = vmul.f32 %v5740_v5, %v266_v61  ;;  %v375_v5 = vmax.f32 %v343_v19, 0.0  ;;  %v484_v3 = vld [vmem:[#allocation2 + $0x7] sm:$0xff] }
  0x39   : > { %v519_v23 = vld [vmem:[#allocation2 + $0x28] sm:$0xff]  ;;  %v520_v24 = vld [vmem:[#allocation2 + $0x30] sm:$0xff]  ;;  %466 = vst.msk [vmem:[#allocation2 + $0x108] sm:$0xff] %vm378_vm0, %v360_v18  ;;  %467 = vst.msk [vmem:[#allocation2 + $0x110] sm:$0xff] %vm378_vm0, %v361_v26  ;;  %v369_v9 = vmax.f32 %v337_v58, 0.0  ;;  %v374_v18 = vmax.f32 %v342_v11, 0.0 }
  0x3a   : > { %v5832_v25 = vld [vmem:[#allocation2 + $0x48] sm:$0xff]  ;;  %4794 = vmatprep.mubr.msk.f32.mxu1 %vm378_vm0, %v519_v23  ;;  %4991 = vmatprep.mubr.msk.f32.mxu0 %vm378_vm0, %v519_v23  ;;  %v5864_v42 = vld [vmem:[#allocation2 + $0x50] sm:$0xff]  ;;  %468 = vst.msk [vmem:[#allocation2 + $0x128] sm:$0xff] %vm378_vm0, %v362_v43  ;;  %469 = vst.msk [vmem:[#allocation2 + $0x130] sm:$0xff] %vm378_vm0, %v363_v44  ;;  %v373_v17 = vmax.f32 %v341_v10, 0.0  ;;  %v344_v22 = vadd.f32 %v5752_v6, %v305_v16 }
  0x3b   : > { %4795 = vmatmul.mubr.msk.f32.gmra.mrb[2].mxu1 %vm378_vm0, %v520_v24  ;;  %4992 = vmatmul.mubr.msk.f32.vlgmr.msra.gmra.mrb[0].mxu0 %vm378_vm0, %v520_v24  ;;  %v5871_v49 = vld [vmem:[#allocation2 + $0x68] sm:$0xff]  ;;  %470 = vst.msk [vmem:[#allocation2 + $0x148] sm:$0xff] %vm378_vm0, %v364_v45  ;;  %472 = vst.msk [vmem:[#allocation2 + $0x168] sm:$0xff] %vm378_vm0, %v366_v50  ;;  %v5898_v62 = vld [vmem:[#allocation2 + $0x70] sm:$0xff]  ;;  %v345_v24 = vadd.f32 %v5752_v6, %v306_v20 }
  0x3c   : > { %5040 = vmatpush3.msra.mxu0 %v5724_v4  ;;  %4797 = vmatprep.mubr.msk.f32.mxu1 %vm378_vm0, %v5832_v25  ;;  %v365_v4 = vmax.f32 %v333_v36, 0.0  ;;  %473 = vst.msk [vmem:[#allocation2 + $0x170] sm:$0xff] %vm378_vm0, %v367_v51  ;;  %v5904_v8 = vld [vmem:[#allocation2 + $0x88] sm:$0xff]  ;;  %474 = vst.msk [vmem:[#allocation2 + $0x188] sm:$0xff] %vm378_vm0, %v368_v63  ;;  %v5922_v21 = vld [vmem:[#allocation2 + $0x90] sm:$0xff]  ;;  %v376_v26 = vmax.f32 %v344_v22, 0.0 }
  0x3d   : > { %4994 = vmatprep.mubr.msk.f32.mxu0 %vm378_vm0, %v5832_v25  ;;  %5089 = vmatprep.subr.mxu0 %v5847_v32  ;;  %475 = vst.msk [vmem:[#allocation2 + $0x190] sm:$0xff] %vm378_vm0, %v369_v9  ;;  %476 = vst.msk [vmem:[#allocation2 + $0x1a8] sm:$0xff] %vm378_vm0, %v370_v13  ;;  %v5928_v23 = vld [vmem:[#allocation2 + $0xa8] sm:$0xff]  ;;  %v377_v28 = vmax.f32 %v345_v24, 0.0  ;;  %v5942_v29 = vld [vmem:[#allocation2 + $0xb0] sm:$0xff] }
  0x3e   : > { %471 = vst.msk [vmem:[#allocation2 + $0x150] sm:$0xff] %vm378_vm0, %v365_v4  ;;  %477 = vst.msk [vmem:[#allocation2 + $0x1b0] sm:$0xff] %vm378_vm0, %v371_v14  ;;  %v5945_v6 = vld [vmem:[#allocation2 + $0xc8] sm:$0xff]  ;;  %v5956_v30 = vld [vmem:[#allocation2 + $0xd0] sm:$0xff] }
  0x3f   : > { %4798 = vmatmul.mubr.msk.f32.gmra.mrb[4].mxu1 %vm378_vm0, %v5864_v42  ;;  %4995 = vmatmul.mubr.msk.f32.gmra.mrb[2].mxu0 %vm378_vm0, %v5864_v42  ;;  %478 = vst.msk [vmem:[#allocation2 + $0x1c8] sm:$0xff] %vm378_vm0, %v372_v15  ;;  %479 = vst.msk [vmem:[#allocation2 + $0x1d0] sm:$0xff] %vm378_vm0, %v373_v17  ;;  %v5958_v31 = vld [vmem:[#allocation2 + $0xe8] sm:$0xff]  ;;  %v5968_v33 = vld [vmem:[#allocation2 + $0xf0] sm:$0xff] }
  0x40   : > { %4800 = vmatprep.mubr.msk.f32.mxu1 %vm378_vm0, %v5871_v49  ;;  %4997 = vmatprep.mubr.msk.f32.mxu0 %vm378_vm0, %v5871_v49  ;;  %480 = vst.msk [vmem:[#allocation2 + $0x1e8] sm:$0xff] %vm378_vm0, %v374_v18  ;;  %481 = vst.msk [vmem:[#allocation2 + $0x1f0] sm:$0xff] %vm378_vm0, %v375_v5  ;;  %v5970_v34 = vld [vmem:[#allocation2 + $0x108] sm:$0xff]  ;;  %v5980_v35 = vld [vmem:[#allocation2 + $0x110] sm:$0xff] }
  0x41   : > { %482 = vst.msk [vmem:[#allocation2 + $0x208] sm:$0xff] %vm378_vm0, %v376_v26  ;;  %483 = vst.msk [vmem:[#allocation2 + $0x210] sm:$0xff] %vm378_vm0, %v377_v28  ;;  %v5982_v36 = vld [vmem:[#allocation2 + $0x128] sm:$0xff]  ;;  %v5994_v38 = vld [vmem:[#allocation2 + $0x130] sm:$0xff] }
  0x42   : > { %6883 = vst [vmem:[#allocation3_spill] sm:$0xff] %v5980_v35  ;;  %6884 = vst [vmem:[#allocation4_spill] sm:$0xff] %v5982_v36  ;;  %v5984_v37 = vld [vmem:[#allocation2 + $0x29] sm:$0xff]  ;;  %v5996_v39 = vld [vmem:[#allocation2 + $0x31] sm:$0xff] }
  0x43   : > { %4801 = vmatmul.mubr.msk.f32.gmra.mrb[6].mxu1 %vm378_vm0, %v5898_v62  ;;  %4998 = vmatmul.mubr.msk.f32.gmra.mrb[4].mxu0 %vm378_vm0, %v5898_v62  ;;  %6885 = vst [vmem:[#allocation5_spill] sm:$0xff] %v5994_v38  ;;  %v5998_v40 = vld [vmem:[#allocation2 + $0x148] sm:$0xff]  ;;  %v6005_v43 = vld [vmem:[%s6837_s3 + $0x38] sm:$0xff] }
  0x44   : > { %4803 = vmatprep.mubr.msk.f32.mxu1 %vm378_vm0, %v5904_v8  ;;  %5000 = vmatprep.mubr.msk.f32.mxu0 %vm378_vm0, %v5904_v8  ;;  %6886 = vst [vmem:[#allocation6_spill] sm:$0xff] %v5998_v40  ;;  %v6000_v41 = vld [vmem:[#allocation2 + $0x49] sm:$0xff]  ;;  %v6016_v45 = vld [vmem:[#allocation2 + $0x51] sm:$0xff] }
  0x45   : > { %v6014_v44 = vld [vmem:[#allocation2 + $0x150] sm:$0xff]  ;;  %v6020_v46 = vld [vmem:[#allocation2 + $0x168] sm:$0xff]  ;;  %v6122_v13 = vld [vmem:[%s6837_s3 + $0x18] sm:$0xff] }
  0x46   : > { %6887 = vst [vmem:[#allocation7_spill] sm:$0xff] %v6014_v44  ;;  %6888 = vst [vmem:[#allocation8_spill] sm:$0xff] %v6020_v46  ;;  %v6022_v47 = vld [vmem:[#allocation2 + $0x69] sm:$0xff]  ;;  %v6035_v48 = vld [vmem:[#allocation2 + $0x71] sm:$0xff] }
  0x47   : > { %4804 = vmatmul.mubr.msk.f32.gmra.mrb[8].mxu1 %vm378_vm0, %v5922_v21  ;;  %5001 = vmatmul.mubr.msk.f32.gmra.mrb[6].mxu0 %vm378_vm0, %v5922_v21  ;;  %v6037_v4 = vld [vmem:[#allocation2 + $0x188] sm:$0xff]  ;;  %v6049_v51 = vld [vmem:[#allocation2 + $0x190] sm:$0xff] }
  0x48   : > { %4806 = vmatprep.mubr.msk.f32.mxu1 %vm378_vm0, %v5928_v23  ;;  %5003 = vmatprep.mubr.msk.f32.mxu0 %vm378_vm0, %v5928_v23  ;;  %6890 = vst [vmem:[#allocation10_spill] sm:$0xff] %v6037_v4  ;;  %v6039_v50 = vld [vmem:[#allocation2 + $0x89] sm:$0xff]  ;;  %6891 = vst [vmem:[#allocation11_spill] sm:$0xff] %v6049_v51  ;;  %v6051_v52 = vld [vmem:[#allocation2 + $0x91] sm:$0xff] }
  0x49   : > { %v6053_v53 = vld [vmem:[#allocation2 + $0x1a8] sm:$0xff]  ;;  %v6065_v55 = vld [vmem:[#allocation2 + $0x1b0] sm:$0xff] }
  0x4a   : > { %6892 = vst [vmem:[#allocation12_spill] sm:$0xff] %v6053_v53  ;;  %v6055_v54 = vld [vmem:[#allocation2 + $0xa9] sm:$0xff]  ;;  %6893 = vst [vmem:[#allocation13_spill] sm:$0xff] %v6065_v55  ;;  %v6067_v56 = vld [vmem:[#allocation2 + $0xb1] sm:$0xff] }
  0x4b   : > { %4807 = vmatmul.mubr.msk.f32.gmra.mrb[10].mxu1 %vm378_vm0, %v5942_v29  ;;  %5004 = vmatmul.mubr.msk.f32.gmra.mrb[8].mxu0 %vm378_vm0, %v5942_v29  ;;  %v6069_v57 = vld [vmem:[#allocation2 + $0x1c8] sm:$0xff]  ;;  %v6081_v59 = vld [vmem:[#allocation2 + $0x1d0] sm:$0xff] }
  0x4c   : > { %4809 = vmatprep.mubr.msk.f32.mxu1 %vm378_vm0, %v5945_v6  ;;  %5006 = vmatprep.mubr.msk.f32.mxu0 %vm378_vm0, %v5945_v6  ;;  %6894 = vst [vmem:[#allocation14_spill] sm:$0xff] %v6069_v57  ;;  %v6071_v58 = vld [vmem:[#allocation2 + $0xc9] sm:$0xff]  ;;  %6895 = vst [vmem:[#allocation15_spill] sm:$0xff] %v6081_v59  ;;  %v6083_v60 = vld [vmem:[#allocation2 + $0xd1] sm:$0xff] }
  0x4d   : > { %v6085_v61 = vld [vmem:[#allocation2 + $0x1e8] sm:$0xff]  ;;  %v6097_v0 = vld [vmem:[#allocation2 + $0x1f0] sm:$0xff] }
  0x4e   : > { %6896 = vst [vmem:[#allocation16_spill] sm:$0xff] %v6085_v61  ;;  %v6087_v63 = vld [vmem:[#allocation2 + $0xe9] sm:$0xff]  ;;  %6897 = vst [vmem:[#allocation17_spill] sm:$0xff] %v6097_v0  ;;  %v6099_v2 = vld [vmem:[#allocation2 + $0xf1] sm:$0xff] }
  0x4f   : > { %4810 = vmatmul.mubr.msk.f32.gmra.mrb[12].mxu1 %vm378_vm0, %v5956_v30  ;;  %5007 = vmatmul.mubr.msk.f32.gmra.mrb[10].mxu0 %vm378_vm0, %v5956_v30  ;;  %v6101_v7 = vld [vmem:[#allocation2 + $0x109] sm:$0xff]  ;;  %v6110_v10 = vld [vmem:[#allocation2 + $0x111] sm:$0xff] }
  0x50   : > { %4812 = vmatprep.mubr.msk.f32.mxu1 %vm378_vm0, %v5958_v31  ;;  %5009 = vmatprep.mubr.msk.f32.mxu0 %vm378_vm0, %v5958_v31  ;;  %v485_v9 = vld [vmem:[#allocation2 + $0xf] sm:$0xff]  ;;  %v6112_v11 = vld [vmem:[#allocation2 + $0x27] sm:$0xff] }
  0x51   : > { %6898 = vst [vmem:[#allocation18_spill] sm:$0xff] %v6112_v11  ;;  %v6114_v12 = vld [vmem:[#allocation2 + $0x129] sm:$0xff]  ;;  %v6130_v15 = vld [vmem:[#allocation2 + $0x131] sm:$0xff] }
  0x52   : > { %v6128_v14 = vld [vmem:[#allocation2 + $0x2f] sm:$0xff]  ;;  %v6133_v16 = vld [vmem:[#allocation2 + $0x47] sm:$0xff] }
  0x53   : > { %4813 = vmatmul.mubr.msk.f32.gmra.mrb[14].mxu1 %vm378_vm0, %v5968_v33  ;;  %5010 = vmatmul.mubr.msk.f32.gmra.mrb[12].mxu0 %vm378_vm0, %v5968_v33  ;;  %6899 = vst [vmem:[#allocation19_spill] sm:$0xff] %v6128_v14  ;;  %6900 = vst [vmem:[#allocation20_spill] sm:$0xff] %v6133_v16  ;;  %v6135_v17 = vld [vmem:[#allocation2 + $0x149] sm:$0xff]  ;;  %v6164_v5 = vld [vmem:[#allocation2 + $0x171] sm:$0xff] }
  0x54   : > { %4815 = vmatprep.mubr.msk.f32.mxu1 %vm378_vm0, %v5970_v34  ;;  %5012 = vmatprep.mubr.msk.f32.mxu0 %vm378_vm0, %v5970_v34  ;;  %v6146_v18 = vld [vmem:[#allocation2 + $0x4f] sm:$0xff]  ;;  %v6150_v19 = vld [vmem:[#allocation2 + $0x67] sm:$0xff] }
  0x55   : > { %6901 = vst [vmem:[#allocation21_spill] sm:$0xff] %v6146_v18  ;;  %6902 = vst [vmem:[#allocation22_spill] sm:$0xff] %v6150_v19  ;;  %v6152_v20 = vld [vmem:[#allocation2 + $0x169] sm:$0xff] }
  0x56   : > { %v6162_v22 = vld [vmem:[#allocation2 + $0x6f] sm:$0xff]  ;;  %v6166_v24 = vld [vmem:[#allocation2 + $0x87] sm:$0xff] }
  0x57   : > { %4816 = vmatmul.mubr.msk.f32.gmra.mrb[16].mxu1 %vm378_vm0, %v5980_v35  ;;  %5013 = vmatmul.mubr.msk.f32.gmra.mrb[14].mxu0 %vm378_vm0, %v5980_v35  ;;  %6903 = vst [vmem:[#allocation23_spill] sm:$0xff] %v6162_v22  ;;  %6904 = vst [vmem:[#allocation24_spill] sm:$0xff] %v6166_v24  ;;  %v6168_v26 = vld [vmem:[#allocation2 + $0x189] sm:$0xff] }
  0x58   : > { %4818 = vmatprep.mubr.msk.f32.mxu1 %vm378_vm0, %v5982_v36  ;;  %5041 = vmatprep.mubr.msk.f32.mxu0 %vm378_vm0, %v5984_v37  ;;  %v6178_v28 = vld [vmem:[#allocation2 + $0x8f] sm:$0xff] }
  0x59   : > { %6905 = vst [vmem:[#allocation25_spill] sm:$0xff] %v6178_v28  ;;  %v6244_v36 = vld [vmem:[#allocation2 + $0x211] sm:$0xff] }
  0x5a   : > { %6913 = vst [vmem:[#allocation33_spill] sm:$0xff] %v6244_v36  ;;  %v6256_v35 = vld [vmem:[#allocation2 + $0x12f] sm:$0xff] }
  0x5b   : > { %4819 = vmatmul.mubr.msk.f32.gmra.mrb[18].mxu1 %vm378_vm0, %v5994_v38  ;;  %5042 = vmatmul.mubr.msk.f32.vlgmr.msra.gmra.mrb[0].mxu0 %vm378_vm0, %v5996_v39  ;;  %v6232_v38 = vld [vmem:[#allocation2 + $0x209] sm:$0xff] }
  0x5c   : > { %5090 = vmatpush3.msra.mxu0 %v5847_v32  ;;  %4821 = vmatprep.mubr.msk.f32.mxu1 %vm378_vm0, %v5998_v40  ;;  %v6033_v32 = vld [vmem:[#allocation2 + $0x170] sm:$0xff]  ;;  %v6230_v40 = vld [vmem:[#allocation2 + $0x107] sm:$0xff]  ;;  %6912 = vst [vmem:[#allocation32_spill] sm:$0xff] %v6232_v38 }
  0x5d   : > { %5044 = vmatprep.mubr.msk.f32.mxu0 %vm378_vm0, %v6000_v41  ;;  %5139 = vmatprep.subr.mxu0 %v6005_v43  ;;  %6889 = vst [vmem:[#allocation9_spill] sm:$0xff] %v6033_v32 }
  0x5f   : > { %4822 = vmatmul.mubr.msk.f32.gmra.mrb[20].mxu1 %vm378_vm0, %v6014_v44  ;;  %5045 = vmatmul.mubr.msk.f32.gmra.mrb[2].mxu0 %vm378_vm0, %v6016_v45  ;;  %v6228_v44 = vld [vmem:[#allocation2 + $0x1f1] sm:$0xff] }
  0x60   : > { %4824 = vmatprep.mubr.msk.f32.mxu1 %vm378_vm0, %v6020_v46  ;;  %5047 = vmatprep.mubr.msk.f32.mxu0 %vm378_vm0, %v6022_v47  ;;  %v6226_v46 = vld [vmem:[#allocation2 + $0xef] sm:$0xff]  ;;  %6911 = vst [vmem:[#allocation31_spill] sm:$0xff] %v6228_v44 }
  0x61   : > { %6910 = vst [vmem:[#allocation30_spill] sm:$0xff] %v6226_v46 }
  0x63   : > { %4825 = vmatmul.mubr.msk.f32.gmra.mrb[22].mxu1 %vm378_vm0, %v6033_v32  ;;  %5048 = vmatmul.mubr.msk.f32.gmra.mrb[4].mxu0 %vm378_vm0, %v6035_v48  ;;  %v6216_v32 = vld [vmem:[#allocation2 + $0x1e9] sm:$0xff] }
  0x64   : > { %4827 = vmatprep.mubr.msk.f32.mxu1 %vm378_vm0, %v6037_v4  ;;  %5050 = vmatprep.mubr.msk.f32.mxu0 %vm378_vm0, %v6039_v50  ;;  %v6214_v4 = vld [vmem:[#allocation2 + $0xe7] sm:$0xff] }
  0x67   : > { %4828 = vmatmul.mubr.msk.f32.gmra.mrb[24].mxu1 %vm378_vm0, %v6049_v51  ;;  %5051 = vmatmul.mubr.msk.f32.gmra.mrb[6].mxu0 %vm378_vm0, %v6051_v52  ;;  %v6212_v51 = vld [vmem:[#allocation2 + $0x1d1] sm:$0xff] }
  0x68   : > { %4830 = vmatprep.mubr.msk.f32.mxu1 %vm378_vm0, %v6053_v53  ;;  %5053 = vmatprep.mubr.msk.f32.mxu0 %vm378_vm0, %v6055_v54  ;;  %v6210_v53 = vld [vmem:[#allocation2 + $0xcf] sm:$0xff] }
  0x69   : > { %6909 = vst [vmem:[#allocation29_spill] sm:$0xff] %v6210_v53 }
  0x6b   : > { %4831 = vmatmul.mubr.msk.f32.gmra.mrb[26].mxu1 %vm378_vm0, %v6065_v55  ;;  %5054 = vmatmul.mubr.msk.f32.gmra.mrb[8].mxu0 %vm378_vm0, %v6067_v56  ;;  %v6200_v55 = vld [vmem:[#allocation2 + $0x1c9] sm:$0xff] }
  0x6c   : > { %4833 = vmatprep.mubr.msk.f32.mxu1 %vm378_vm0, %v6069_v57  ;;  %5056 = vmatprep.mubr.msk.f32.mxu0 %vm378_vm0, %v6071_v58  ;;  %v6198_v57 = vld [vmem:[#allocation2 + $0xc7] sm:$0xff] }
  0x6d   : > { %6908 = vst [vmem:[#allocation28_spill] sm:$0xff] %v6198_v57 }
  0x6f   : > { %4834 = vmatmul.mubr.msk.f32.gmra.mrb[28].mxu1 %vm378_vm0, %v6081_v59  ;;  %5057 = vmatmul.mubr.msk.f32.gmra.mrb[10].mxu0 %vm378_vm0, %v6083_v60  ;;  %v6196_v59 = vld [vmem:[#allocation2 + $0x1b1] sm:$0xff] }
  0x70   : > { %4836 = vmatprep.mubr.msk.f32.mxu1 %vm378_vm0, %v6085_v61  ;;  %5059 = vmatprep.mubr.msk.f32.mxu0 %vm378_vm0, %v6087_v63  ;;  %v6194_v61 = vld [vmem:[#allocation2 + $0xaf] sm:$0xff] }
  0x71   : > { %6907 = vst [vmem:[#allocation27_spill] sm:$0xff] %v6194_v61 }
  0x73   : > { %4837 = vmatmul.mubr.msk.f32.gmra.mrb[30].mxu1 %vm378_vm0, %v6097_v0  ;;  %5060 = vmatmul.mubr.msk.f32.gmra.mrb[12].mxu0 %vm378_vm0, %v6099_v2  ;;  %v6184_v0 = vld [vmem:[#allocation2 + $0x1a9] sm:$0xff] }
  0x74   : > { %4841 = vmatprep.mubr.msk.f32.mxu1 %vm378_vm0, %v484_v3  ;;  %5062 = vmatprep.mubr.msk.f32.mxu0 %vm378_vm0, %v6101_v7  ;;  %v6180_v3 = vld [vmem:[#allocation2 + $0x191] sm:$0xff] }
  0x77   : > { %4842 = vmatmul.mubr.msk.f32.vlgmr.msra.gmra.mrb[0].mxu1 %vm378_vm0, %v485_v9  ;;  %5063 = vmatmul.mubr.msk.f32.gmra.mrb[14].mxu0 %vm378_vm0, %v6110_v10  ;;  %v6182_v9 = vld [vmem:[#allocation2 + $0xa7] sm:$0xff] }
  0x78   : > { %4844 = vmatprep.mubr.msk.f32.mxu1 %vm378_vm0, %v6112_v11  ;;  %5065 = vmatprep.mubr.msk.f32.mxu0 %vm378_vm0, %v6114_v12  ;;  %6906 = vst [vmem:[#allocation26_spill] sm:$0xff] %v6182_v9  ;;  %v6246_v11 = vld [vmem:[#allocation2 + $0x127] sm:$0xff] }
  0x79   : > { %4890 = vmatpush3.msra.mxu1 %v5776_v27  ;;  %v6148_v27 = vld [vmem:[#allocation2 + $0x151] sm:$0xff] }
  0x7a   : > { %4939 = vmatprep.subr.mxu1 %v6122_v13 }
  0x7b   : > { %4845 = vmatmul.mubr.msk.f32.gmra.mrb[2].mxu1 %vm378_vm0, %v6128_v14  ;;  %5066 = vmatmul.mubr.msk.f32.gmra.mrb[16].mxu0 %vm378_vm0, %v6130_v15  ;;  %v6242_v14 = vld [vmem:[#allocation2 + $0x10f] sm:$0xff] }
  0x7c   : > { %4847 = vmatprep.mubr.msk.f32.mxu1 %vm378_vm0, %v6133_v16  ;;  %5068 = vmatprep.mubr.msk.f32.mxu0 %vm378_vm0, %v6135_v17 }
  0x7f   : > { %4848 = vmatmul.mubr.msk.f32.gmra.mrb[4].mxu1 %vm378_vm0, %v6146_v18  ;;  %5069 = vmatmul.mubr.msk.f32.gmra.mrb[18].mxu0 %vm378_vm0, %v6148_v27 }
  0x80   : > { %4850 = vmatprep.mubr.msk.f32.mxu1 %vm378_vm0, %v6150_v19  ;;  %5071 = vmatprep.mubr.msk.f32.mxu0 %vm378_vm0, %v6152_v20 }
  0x83   : > { %4851 = vmatmul.mubr.msk.f32.gmra.mrb[6].mxu1 %vm378_vm0, %v6162_v22  ;;  %5072 = vmatmul.mubr.msk.f32.gmra.mrb[20].mxu0 %vm378_vm0, %v6164_v5 }
  0x84   : > { %4853 = vmatprep.mubr.msk.f32.mxu1 %vm378_vm0, %v6166_v24  ;;  %5074 = vmatprep.mubr.msk.f32.mxu0 %vm378_vm0, %v6168_v26 }
  0x87   : > { %4854 = vmatmul.mubr.msk.f32.gmra.mrb[8].mxu1 %vm378_vm0, %v6178_v28  ;;  %5075 = vmatmul.mubr.msk.f32.gmra.mrb[22].mxu0 %vm378_vm0, %v6180_v3 }
  0x88   : > { %4856 = vmatprep.mubr.msk.f32.mxu1 %vm378_vm0, %v6182_v9  ;;  %5077 = vmatprep.mubr.msk.f32.mxu0 %vm378_vm0, %v6184_v0 }
  0x8b   : > { %4857 = vmatmul.mubr.msk.f32.gmra.mrb[10].mxu1 %vm378_vm0, %v6194_v61  ;;  %5078 = vmatmul.mubr.msk.f32.gmra.mrb[24].mxu0 %vm378_vm0, %v6196_v59 }
  0x8c   : > { %4859 = vmatprep.mubr.msk.f32.mxu1 %vm378_vm0, %v6198_v57  ;;  %5080 = vmatprep.mubr.msk.f32.mxu0 %vm378_vm0, %v6200_v55 }
  0x8f   : > { %4860 = vmatmul.mubr.msk.f32.gmra.mrb[12].mxu1 %vm378_vm0, %v6210_v53  ;;  %5081 = vmatmul.mubr.msk.f32.gmra.mrb[26].mxu0 %vm378_vm0, %v6212_v51 }
  0x90   : > { %4862 = vmatprep.mubr.msk.f32.mxu1 %vm378_vm0, %v6214_v4  ;;  %5083 = vmatprep.mubr.msk.f32.mxu0 %vm378_vm0, %v6216_v32 }
  0x93   : > { %4863 = vmatmul.mubr.msk.f32.gmra.mrb[14].mxu1 %vm378_vm0, %v6226_v46  ;;  %5084 = vmatmul.mubr.msk.f32.gmra.mrb[28].mxu0 %vm378_vm0, %v6228_v44  ;;  %v6263_v44 = vld [vmem:[%s6837_s3 + $0x40] sm:$0xff] }
  0x94   : > { %4865 = vmatprep.mubr.msk.f32.mxu1 %vm378_vm0, %v6230_v40  ;;  %5086 = vmatprep.mubr.msk.f32.mxu0 %vm378_vm0, %v6232_v38  ;;  %v6258_v38 = vld [vmem:[#allocation2 + $0x147] sm:$0xff] }
  0x97   : > { %4866 = vmatmul.mubr.msk.f32.gmra.mrb[16].mxu1 %vm378_vm0, %v6242_v14  ;;  %5087 = vmatmul.mubr.msk.f32.gmra.mrb[30].mxu0 %vm378_vm0, %v6244_v36  ;;  %v6272_v36 = vld [vmem:[#allocation2 + $0x14f] sm:$0xff] }
  0x98   : > { %4868 = vmatprep.mubr.msk.f32.mxu1 %vm378_vm0, %v6246_v11  ;;  %5091 = vmatprep.mubr.msk.f32.mxu0 %vm378_vm0, %v6133_v16  ;;  %v6276_v16 = vld [vmem:[#allocation2 + $0x167] sm:$0xff] }
  0x9b   : > { %4869 = vmatmul.mubr.msk.f32.gmra.mrb[18].mxu1 %vm378_vm0, %v6256_v35  ;;  %5092 = vmatmul.mubr.msk.f32.vlgmr.msra.gmra.mrb[0].mxu0 %vm378_vm0, %v6146_v18  ;;  %v6289_v18 = vld [vmem:[#allocation2 + $0x187] sm:$0xff] }
  0x9c   : > { %5140 = vmatpush3.msra.mxu0 %v6005_v43  ;;  %4871 = vmatprep.mubr.msk.f32.mxu1 %vm378_vm0, %v6258_v38  ;;  %v6287_v43 = vld [vmem:[#allocation2 + $0x16f] sm:$0xff] }
  0x9d   : > { %5094 = vmatprep.mubr.msk.f32.mxu0 %vm378_vm0, %v6150_v19  ;;  %5189 = vmatprep.subr.mxu0 %v6263_v44  ;;  %v6301_v19 = vld [vmem:[#allocation2 + $0x1a7] sm:$0xff] }
  0x9f   : > { %4872 = vmatmul.mubr.msk.f32.gmra.mrb[20].mxu1 %vm378_vm0, %v6272_v36  ;;  %5095 = vmatmul.mubr.msk.f32.gmra.mrb[2].mxu0 %vm378_vm0, %v6162_v22  ;;  %v6299_v22 = vld [vmem:[#allocation2 + $0x18f] sm:$0xff] }
  0xa0   : > { %4874 = vmatprep.mubr.msk.f32.mxu1 %vm378_vm0, %v6276_v16  ;;  %5097 = vmatprep.mubr.msk.f32.mxu0 %vm378_vm0, %v6166_v24  ;;  %v6313_v24 = vld [vmem:[#allocation2 + $0x1c7] sm:$0xff] }
  0xa3   : > { %4875 = vmatmul.mubr.msk.f32.gmra.mrb[22].mxu1 %vm378_vm0, %v6287_v43  ;;  %5098 = vmatmul.mubr.msk.f32.gmra.mrb[4].mxu0 %vm378_vm0, %v6178_v28  ;;  %v6311_v28 = vld [vmem:[#allocation2 + $0x1af] sm:$0xff] }
  0xa4   : > { %4877 = vmatprep.mubr.msk.f32.mxu1 %vm378_vm0, %v6289_v18  ;;  %5100 = vmatprep.mubr.msk.f32.mxu0 %vm378_vm0, %v6182_v9  ;;  %v6325_v9 = vld [vmem:[#allocation2 + $0x1e7] sm:$0xff] }
  0xa7   : > { %4878 = vmatmul.mubr.msk.f32.gmra.mrb[24].mxu1 %vm378_vm0, %v6299_v22  ;;  %5101 = vmatmul.mubr.msk.f32.gmra.mrb[6].mxu0 %vm378_vm0, %v6194_v61  ;;  %v6323_v61 = vld [vmem:[#allocation2 + $0x1cf] sm:$0xff] }
  0xa8   : > { %4880 = vmatprep.mubr.msk.f32.mxu1 %vm378_vm0, %v6301_v19  ;;  %5103 = vmatprep.mubr.msk.f32.mxu0 %vm378_vm0, %v6198_v57  ;;  %v1192_v57 = vld [vmem:[#allocation2 + $0x9] sm:$0xff] }
  0xab   : > { %4881 = vmatmul.mubr.msk.f32.gmra.mrb[26].mxu1 %vm378_vm0, %v6311_v28  ;;  %5104 = vmatmul.mubr.msk.f32.gmra.mrb[8].mxu0 %vm378_vm0, %v6210_v53  ;;  %v6335_v53 = vld [vmem:[#allocation2 + $0x1ef] sm:$0xff] }
  0xac   : > { %4883 = vmatprep.mubr.msk.f32.mxu1 %vm378_vm0, %v6313_v24  ;;  %5106 = vmatprep.mubr.msk.f32.mxu0 %vm378_vm0, %v6214_v4 }
  0xaf   : > { %4884 = vmatmul.mubr.msk.f32.gmra.mrb[28].mxu1 %vm378_vm0, %v6323_v61  ;;  %5107 = vmatmul.mubr.msk.f32.gmra.mrb[10].mxu0 %vm378_vm0, %v6226_v46  ;;  %v1193_v46 = vld [vmem:[#allocation2 + $0x11] sm:$0xff] }
  0xb0   : > { %4886 = vmatprep.mubr.msk.f32.mxu1 %vm378_vm0, %v6325_v9  ;;  %5109 = vmatprep.mubr.msk.f32.mxu0 %vm378_vm0, %v6230_v40 }
  0xb3   : > { %4887 = vmatmul.mubr.msk.f32.gmra.mrb[30].mxu1 %vm378_vm0, %v6335_v53  ;;  %5110 = vmatmul.mubr.msk.f32.gmra.mrb[12].mxu0 %vm378_vm0, %v6242_v14 }
  0xb4   : > { %4891 = vmatprep.mubr.msk.f32.mxu1 %vm378_vm0, %v1192_v57  ;;  %5112 = vmatprep.mubr.msk.f32.mxu0 %vm378_vm0, %v6246_v11  ;;  %v6927_v57 = vld [vmem:[#allocation9_spill] sm:$0xff] }
  0xb7   : > { %4892 = vmatmul.mubr.msk.f32.vlgmr.msra.gmra.mrb[0].mxu1 %vm378_vm0, %v1193_v46  ;;  %5113 = vmatmul.mubr.msk.f32.gmra.mrb[14].mxu0 %vm378_vm0, %v6256_v35  ;;  %v2768_v46 = vld [vmem:[#allocation2 + $0x22f] sm:$0xff] }
  0xb8   : > { %4894 = vmatprep.mubr.msk.f32.mxu1 %vm378_vm0, %v5984_v37  ;;  %5115 = vmatprep.mubr.msk.f32.mxu0 %vm378_vm0, %v6258_v38  ;;  %v6403_v37 = vld [vmem:[#allocation2 + $0x20f] sm:$0xff] }
  0xb9   : > { %4940 = vmatpush3.msra.mxu1 %v6122_v13  ;;  %v6928_v13 = vld [vmem:[#allocation24_spill] sm:$0xff] }
  0xba   : > { %5239 = vmatprep.subr.mxu1 %v5562_v1  ;;  %v6393_v1 = vld [vmem:[#allocation2 + $0x207] sm:$0xff] }
  0xbb   : > { %4895 = vmatmul.mubr.msk.f32.gmra.mrb[2].mxu1 %vm378_vm0, %v5996_v39  ;;  %5116 = vmatmul.mubr.msk.f32.gmra.mrb[16].mxu0 %vm378_vm0, %v6272_v36  ;;  %v2767_v39 = vld [vmem:[#allocation2 + $0x227] sm:$0xff] }
  0xbc   : > { %4897 = vmatprep.mubr.msk.f32.mxu1 %vm378_vm0, %v6000_v41  ;;  %5118 = vmatprep.mubr.msk.f32.mxu0 %vm378_vm0, %v6276_v16 }
  0xbf   : > { %4898 = vmatmul.mubr.msk.f32.gmra.mrb[4].mxu1 %vm378_vm0, %v6016_v45  ;;  %5119 = vmatmul.mubr.msk.f32.gmra.mrb[18].mxu0 %vm378_vm0, %v6287_v43 }
  0xc0   : > { %4900 = vmatprep.mubr.msk.f32.mxu1 %vm378_vm0, %v6022_v47  ;;  %5121 = vmatprep.mubr.msk.f32.mxu0 %vm378_vm0, %v6289_v18 }
  0xc3   : > { %4901 = vmatmul.mubr.msk.f32.gmra.mrb[6].mxu1 %vm378_vm0, %v6035_v48  ;;  %5122 = vmatmul.mubr.msk.f32.gmra.mrb[20].mxu0 %vm378_vm0, %v6299_v22 }
  0xc4   : > { %4903 = vmatprep.mubr.msk.f32.mxu1 %vm378_vm0, %v6039_v50  ;;  %5124 = vmatprep.mubr.msk.f32.mxu0 %vm378_vm0, %v6301_v19 }
  0xc7   : > { %4904 = vmatmul.mubr.msk.f32.gmra.mrb[8].mxu1 %vm378_vm0, %v6051_v52  ;;  %5125 = vmatmul.mubr.msk.f32.gmra.mrb[22].mxu0 %vm378_vm0, %v6311_v28 }
  0xc8   : > { %4906 = vmatprep.mubr.msk.f32.mxu1 %vm378_vm0, %v6055_v54  ;;  %5127 = vmatprep.mubr.msk.f32.mxu0 %vm378_vm0, %v6313_v24 }
  0xcb   : > { %4907 = vmatmul.mubr.msk.f32.gmra.mrb[10].mxu1 %vm378_vm0, %v6067_v56  ;;  %5128 = vmatmul.mubr.msk.f32.gmra.mrb[24].mxu0 %vm378_vm0, %v6323_v61 }
  0xcc   : > { %4909 = vmatprep.mubr.msk.f32.mxu1 %vm378_vm0, %v6071_v58  ;;  %5130 = vmatprep.mubr.msk.f32.mxu0 %vm378_vm0, %v6325_v9 }
  0xcf   : > { %4910 = vmatmul.mubr.msk.f32.gmra.mrb[12].mxu1 %vm378_vm0, %v6083_v60  ;;  %5131 = vmatmul.mubr.msk.f32.gmra.mrb[26].mxu0 %vm378_vm0, %v6335_v53 }
  0xd0   : > { %4912 = vmatprep.mubr.msk.f32.mxu1 %vm378_vm0, %v6087_v63  ;;  %5133 = vmatprep.mubr.msk.f32.mxu0 %vm378_vm0, %v6393_v1 }
  0xd3   : > { %4913 = vmatmul.mubr.msk.f32.gmra.mrb[14].mxu1 %vm378_vm0, %v6099_v2  ;;  %5134 = vmatmul.mubr.msk.f32.gmra.mrb[28].mxu0 %vm378_vm0, %v6403_v37 }
  0xd4   : > { %4915 = vmatprep.mubr.msk.f32.mxu1 %vm378_vm0, %v6101_v7  ;;  %5136 = vmatprep.mubr.msk.f32.mxu0 %vm378_vm0, %v2767_v39  ;;  %v6929_v39 = vld [vmem:[#allocation10_spill] sm:$0xff] }
  0xd7   : > { %4916 = vmatmul.mubr.msk.f32.gmra.mrb[16].mxu1 %vm378_vm0, %v6110_v10  ;;  %5137 = vmatmul.mubr.msk.f32.gmra.mrb[30].mxu0 %vm378_vm0, %v2768_v46  ;;  %v6930_v46 = vld [vmem:[#allocation25_spill] sm:$0xff] }
  0xd8   : > { %4918 = vmatprep.mubr.msk.f32.mxu1 %vm378_vm0, %v6114_v12  ;;  %5141 = vmatprep.mubr.msk.f32.mxu0 %vm378_vm0, %v5832_v25  ;;  %v6914_v25 = vld [vmem:[#allocation31_spill] sm:$0xff] }
  0xdb   : > { %4919 = vmatmul.mubr.msk.f32.gmra.mrb[18].mxu1 %vm378_vm0, %v6130_v15  ;;  %5142 = vmatmul.mubr.msk.f32.vlgmr.msra.gmra.mrb[0].mxu0 %vm378_vm0, %v5864_v42  ;;  %v6915_v42 = vld [vmem:[#allocation3_spill] sm:$0xff] }
  0xdc   : > { %5190 = vmatpush3.msra.mxu0 %v6263_v44  ;;  %4921 = vmatprep.mubr.msk.f32.mxu1 %vm378_vm0, %v6135_v17  ;;  %v6926_v44 = vld [vmem:[#allocation23_spill] sm:$0xff] }
  0xdd   : > { %5144 = vmatprep.mubr.msk.f32.mxu0 %vm378_vm0, %v5871_v49  ;;  %v6916_v49 = vld [vmem:[#allocation18_spill] sm:$0xff] }
  0xdf   : > { %4922 = vmatmul.mubr.msk.f32.gmra.mrb[20].mxu1 %vm378_vm0, %v6148_v27  ;;  %5145 = vmatmul.mubr.msk.f32.gmra.mrb[2].mxu0 %vm378_vm0, %v5898_v62  ;;  %v6917_v62 = vld [vmem:[#allocation4_spill] sm:$0xff] }
  0xe0   : > { %4924 = vmatprep.mubr.msk.f32.mxu1 %vm378_vm0, %v6152_v20  ;;  %5147 = vmatprep.mubr.msk.f32.mxu0 %vm378_vm0, %v5904_v8  ;;  %v6918_v8 = vld [vmem:[#allocation19_spill] sm:$0xff] }
  0xe3   : > { %4925 = vmatmul.mubr.msk.f32.gmra.mrb[22].mxu1 %vm378_vm0, %v6164_v5  ;;  %5148 = vmatmul.mubr.msk.f32.gmra.mrb[4].mxu0 %vm378_vm0, %v5922_v21  ;;  %v6919_v21 = vld [vmem:[#allocation5_spill] sm:$0xff] }
  0xe4   : > { %4927 = vmatprep.mubr.msk.f32.mxu1 %vm378_vm0, %v6168_v26  ;;  %5150 = vmatprep.mubr.msk.f32.mxu0 %vm378_vm0, %v5928_v23  ;;  %v6920_v23 = vld [vmem:[#allocation20_spill] sm:$0xff] }
  0xe7   : > { %4928 = vmatmul.mubr.msk.f32.gmra.mrb[24].mxu1 %vm378_vm0, %v6180_v3  ;;  %5151 = vmatmul.mubr.msk.f32.gmra.mrb[6].mxu0 %vm378_vm0, %v5942_v29  ;;  %v6921_v29 = vld [vmem:[#allocation6_spill] sm:$0xff] }
  0xe8   : > { %4930 = vmatprep.mubr.msk.f32.mxu1 %vm378_vm0, %v6184_v0  ;;  %5153 = vmatprep.mubr.msk.f32.mxu0 %vm378_vm0, %v5945_v6  ;;  %v5506_v6 = vld [vmem:[%s6837_s3 + $0x20] sm:$0xff] }
  0xeb   : > { %4931 = vmatmul.mubr.msk.f32.gmra.mrb[26].mxu1 %vm378_vm0, %v6196_v59  ;;  %5154 = vmatmul.mubr.msk.f32.gmra.mrb[8].mxu0 %vm378_vm0, %v5956_v30  ;;  %v6922_v30 = vld [vmem:[#allocation21_spill] sm:$0xff] }
  0xec   : > { %4933 = vmatprep.mubr.msk.f32.mxu1 %vm378_vm0, %v6200_v55  ;;  %5156 = vmatprep.mubr.msk.f32.mxu0 %vm378_vm0, %v5958_v31  ;;  %v6923_v31 = vld [vmem:[#allocation7_spill] sm:$0xff] }
  0xef   : > { %4934 = vmatmul.mubr.msk.f32.gmra.mrb[28].mxu1 %vm378_vm0, %v6212_v51  ;;  %5157 = vmatmul.mubr.msk.f32.gmra.mrb[10].mxu0 %vm378_vm0, %v5968_v33  ;;  %v6924_v33 = vld [vmem:[#allocation22_spill] sm:$0xff] }
  0xf0   : > { %4936 = vmatprep.mubr.msk.f32.mxu1 %vm378_vm0, %v6216_v32  ;;  %5159 = vmatprep.mubr.msk.f32.mxu0 %vm378_vm0, %v5970_v34  ;;  %v6925_v34 = vld [vmem:[#allocation8_spill] sm:$0xff] }
  0xf3   : > { %4937 = vmatmul.mubr.msk.f32.gmra.mrb[30].mxu1 %vm378_vm0, %v6914_v25  ;;  %5160 = vmatmul.mubr.msk.f32.gmra.mrb[12].mxu0 %vm378_vm0, %v6915_v42  ;;  %v6931_v42 = vld [vmem:[#allocation11_spill] sm:$0xff] }
  0xf4   : > { %4941 = vmatprep.mubr.msk.f32.mxu1 %vm378_vm0, %v6916_v49  ;;  %5162 = vmatprep.mubr.msk.f32.mxu0 %vm378_vm0, %v6917_v62  ;;  %v6932_v49 = vld [vmem:[#allocation26_spill] sm:$0xff]  ;;  %v6933_v62 = vld [vmem:[#allocation12_spill] sm:$0xff] }
  0xf7   : > { %4942 = vmatmul.mubr.msk.f32.vlgmr.msra.gmra.mrb[0].mxu1 %vm378_vm0, %v6918_v8  ;;  %5163 = vmatmul.mubr.msk.f32.gmra.mrb[14].mxu0 %vm378_vm0, %v6919_v21  ;;  %v6934_v8 = vld [vmem:[#allocation27_spill] sm:$0xff]  ;;  %v6935_v21 = vld [vmem:[#allocation13_spill] sm:$0xff] }
  0xf8   : > { %4944 = vmatprep.mubr.msk.f32.mxu1 %vm378_vm0, %v6920_v23  ;;  %5165 = vmatprep.mubr.msk.f32.mxu0 %vm378_vm0, %v6921_v29  ;;  %v6936_v23 = vld [vmem:[#allocation28_spill] sm:$0xff]  ;;  %v6937_v29 = vld [vmem:[#allocation14_spill] sm:$0xff] }
  0xf9   : > { %5240 = vmatpush3.msra.mxu1 %v5506_v6  ;;  %v6938_v6 = vld [vmem:[#allocation29_spill] sm:$0xff] }
  0xfb   : > { %4945 = vmatmul.mubr.msk.f32.gmra.mrb[2].mxu1 %vm378_vm0, %v6922_v30  ;;  %5166 = vmatmul.mubr.msk.f32.gmra.mrb[16].mxu0 %vm378_vm0, %v6923_v31  ;;  %v6939_v30 = vld [vmem:[#allocation15_spill] sm:$0xff]  ;;  %v6940_v31 = vld [vmem:[#allocation16_spill] sm:$0xff] }
  0xfc   : > { %4947 = vmatprep.mubr.msk.f32.mxu1 %vm378_vm0, %v6924_v33  ;;  %5168 = vmatprep.mubr.msk.f32.mxu0 %vm378_vm0, %v6925_v34  ;;  %v6527_v33 = vld [vmem:[#allocation2 + $0x208] sm:$0xff] }
  0xff   : > { %4948 = vmatmul.mubr.msk.f32.gmra.mrb[4].mxu1 %vm378_vm0, %v6926_v44  ;;  %5169 = vmatmul.mubr.msk.f32.gmra.mrb[18].mxu0 %vm378_vm0, %v6927_v57  ;;  %v6941_v44 = vld [vmem:[#allocation30_spill] sm:$0xff] }
 0x100   : > { %4950 = vmatprep.mubr.msk.f32.mxu1 %vm378_vm0, %v6928_v13  ;;  %5171 = vmatprep.mubr.msk.f32.mxu0 %vm378_vm0, %v6929_v39  ;;  %v6942_v13 = vld [vmem:[#allocation17_spill] sm:$0xff] }
 0x103   : > { %4951 = vmatmul.mubr.msk.f32.gmra.mrb[6].mxu1 %vm378_vm0, %v6930_v46  ;;  %5172 = vmatmul.mubr.msk.f32.gmra.mrb[20].mxu0 %vm378_vm0, %v6931_v42  ;;  %v6537_v46 = vld [vmem:[#allocation2 + $0x210] sm:$0xff] }
 0x104   : > { %4953 = vmatprep.mubr.msk.f32.mxu1 %vm378_vm0, %v6932_v49  ;;  %5174 = vmatprep.mubr.msk.f32.mxu0 %vm378_vm0, %v6933_v62  ;;  %v3154_v49 = vld [vmem:[#allocation2 + $0x230] sm:$0xff] }
 0x107   : > { %4954 = vmatmul.mubr.msk.f32.gmra.mrb[8].mxu1 %vm378_vm0, %v6934_v8  ;;  %5175 = vmatmul.mubr.msk.f32.gmra.mrb[22].mxu0 %vm378_vm0, %v6935_v21 }
 0x108   : > { %4956 = vmatprep.mubr.msk.f32.mxu1 %vm378_vm0, %v6936_v23  ;;  %5177 = vmatprep.mubr.msk.f32.mxu0 %vm378_vm0, %v6937_v29 }
 0x10b   : > { %4957 = vmatmul.mubr.msk.f32.gmra.mrb[10].mxu1 %vm378_vm0, %v6938_v6  ;;  %5178 = vmatmul.mubr.msk.f32.gmra.mrb[24].mxu0 %vm378_vm0, %v6939_v30 }
 0x10c   : > { %4959 = vmatprep.mubr.msk.f32.mxu1 %vm378_vm0, %v6214_v4  ;;  %5180 = vmatprep.mubr.msk.f32.mxu0 %vm378_vm0, %v6940_v31  ;;  %v3153_v4 = vld [vmem:[#allocation2 + $0x228] sm:$0xff] }
 0x10f   : > { %4960 = vmatmul.mubr.msk.f32.gmra.mrb[12].mxu1 %vm378_vm0, %v6941_v44  ;;  %5181 = vmatmul.mubr.msk.f32.gmra.mrb[26].mxu0 %vm378_vm0, %v6942_v13 }
 0x110   : > { %4962 = vmatprep.mubr.msk.f32.mxu1 %vm378_vm0, %v6230_v40  ;;  %5183 = vmatprep.mubr.msk.f32.mxu0 %vm378_vm0, %v6527_v33  ;;  %v1983_v40 = vld [vmem:[#allocation2 + $0x150] sm:$0xff] }
 0x113   : > { %4963 = vmatmul.mubr.msk.f32.gmra.mrb[14].mxu1 %vm378_vm0, %v6242_v14  ;;  %5184 = vmatmul.mubr.msk.f32.gmra.mrb[28].mxu0 %vm378_vm0, %v6537_v46 }
 0x114   : > { %4965 = vmatprep.mubr.msk.f32.mxu1 %vm378_vm0, %v6246_v11  ;;  %5186 = vmatprep.mubr.msk.f32.mxu0 %vm378_vm0, %v3153_v4 }
 0x117   : > { %4966 = vmatmul.mubr.msk.f32.gmra.mrb[16].mxu1 %vm378_vm0, %v6256_v35  ;;  %5187 = vmatmul.mubr.msk.f32.gmra.mrb[30].mxu0 %vm378_vm0, %v3154_v49  ;;  %v1980_v35 = vld [vmem:[#allocation2 + $0x128] sm:$0xff] }
 0x118   : > { %4968 = vmatprep.mubr.msk.f32.mxu1 %vm378_vm0, %v6258_v38  ;;  %5191 = vmatprep.mubr.msk.f32.mxu0 %vm378_vm0, %v6000_v41  ;;  %v1982_v38 = vld [vmem:[#allocation2 + $0x148] sm:$0xff] }
 0x119   : > { %v6943_v41 = vld [vmem:[#allocation32_spill] sm:$0xff] }
 0x11b   : > { %4969 = vmatmul.mubr.msk.f32.gmra.mrb[18].mxu1 %vm378_vm0, %v6272_v36  ;;  %5192 = vmatmul.mubr.msk.f32.vlgmr.msra.gmra.mrb[0].mxu0 %vm378_vm0, %v6016_v45  ;;  %v1981_v36 = vld [vmem:[#allocation2 + $0x130] sm:$0xff] }
 0x11c   : > { %4971 = vmatprep.mubr.msk.f32.mxu1 %vm378_vm0, %v6276_v16  ;;  %5194 = vmatprep.mubr.msk.f32.mxu0 %vm378_vm0, %v6022_v47  ;;  %v3539_v45 = vld [vmem:[#allocation2 + $0x229] sm:$0xff] }
 0x11d   : > { %v6944_v47 = vld [vmem:[#allocation33_spill] sm:$0xff] }
 0x11f   : > { %4972 = vmatmul.mubr.msk.f32.gmra.mrb[20].mxu1 %vm378_vm0, %v6287_v43  ;;  %5195 = vmatmul.mubr.msk.f32.gmra.mrb[2].mxu0 %vm378_vm0, %v6035_v48 }
 0x120   : > { %4974 = vmatprep.mubr.msk.f32.mxu1 %vm378_vm0, %v6289_v18  ;;  %5197 = vmatprep.mubr.msk.f32.mxu0 %vm378_vm0, %v6039_v50 }
 0x123   : > { %4975 = vmatmul.mubr.msk.f32.gmra.mrb[22].mxu1 %vm378_vm0, %v6299_v22  ;;  %5198 = vmatmul.mubr.msk.f32.gmra.mrb[4].mxu0 %vm378_vm0, %v6051_v52 }
 0x124   : > { %4977 = vmatprep.mubr.msk.f32.mxu1 %vm378_vm0, %v6301_v19  ;;  %5200 = vmatprep.mubr.msk.f32.mxu0 %vm378_vm0, %v6055_v54 }
 0x127   : > { %4978 = vmatmul.mubr.msk.f32.gmra.mrb[24].mxu1 %vm378_vm0, %v6311_v28  ;;  %5201 = vmatmul.mubr.msk.f32.gmra.mrb[6].mxu0 %vm378_vm0, %v6067_v56 }
 0x128   : > { %4980 = vmatprep.mubr.msk.f32.mxu1 %vm378_vm0, %v6313_v24  ;;  %5203 = vmatprep.mubr.msk.f32.mxu0 %vm378_vm0, %v6071_v58 }
 0x12b   : > { %4981 = vmatmul.mubr.msk.f32.gmra.mrb[26].mxu1 %vm378_vm0, %v6323_v61  ;;  %5204 = vmatmul.mubr.msk.f32.gmra.mrb[8].mxu0 %vm378_vm0, %v6083_v60 }
 0x12c   : > { %4983 = vmatprep.mubr.msk.f32.mxu1 %vm378_vm0, %v6325_v9  ;;  %5206 = vmatprep.mubr.msk.f32.mxu0 %vm378_vm0, %v6087_v63 }
 0x12f   : > { %4984 = vmatmul.mubr.msk.f32.gmra.mrb[28].mxu1 %vm378_vm0, %v6335_v53  ;;  %5207 = vmatmul.mubr.msk.f32.gmra.mrb[10].mxu0 %vm378_vm0, %v6099_v2 }
 0x130   : > { %4986 = vmatprep.mubr.msk.f32.mxu1 %vm378_vm0, %v6393_v1  ;;  %5209 = vmatprep.mubr.msk.f32.mxu0 %vm378_vm0, %v6101_v7 }
 0x133   : > { %4987 = vmatmul.mubr.msk.f32.gmra.mrb[30].mxu1 %vm378_vm0, %v6403_v37  ;;  %5210 = vmatmul.mubr.msk.f32.gmra.mrb[12].mxu0 %vm378_vm0, %v6110_v10 }
 0x134   : > { %5015 = vmatprep.mubr.msk.f32.mxu1 %vm378_vm0, %v1980_v35  ;;  %5212 = vmatprep.mubr.msk.f32.mxu0 %vm378_vm0, %v6114_v12 }
 0x137   : > { %5016 = vmatmul.mubr.msk.f32.vlgmr.msra.gmra.mrb[16].mxu1 %vm378_vm0, %v1981_v36  ;;  %5213 = vmatmul.mubr.msk.f32.gmra.mrb[14].mxu0 %vm378_vm0, %v6130_v15 }
 0x138   : > { %5018 = vmatprep.mubr.msk.f32.mxu1 %vm378_vm0, %v1982_v38  ;;  %5215 = vmatprep.mubr.msk.f32.mxu0 %vm378_vm0, %v6135_v17 }
 0x13b   : > { %5019 = vmatmul.mubr.msk.f32.gmra.mrb[18].mxu1 %vm378_vm0, %v1983_v40  ;;  %5216 = vmatmul.mubr.msk.f32.gmra.mrb[16].mxu0 %vm378_vm0, %v6148_v27 }
 0x13c   : > { %5021 = vmatprep.mubr.msk.f32.mxu1 %vm378_vm0, %v6925_v34  ;;  %5218 = vmatprep.mubr.msk.f32.mxu0 %vm378_vm0, %v6152_v20 }
 0x13f   : > { %5022 = vmatmul.mubr.msk.f32.gmra.mrb[20].mxu1 %vm378_vm0, %v6927_v57  ;;  %5219 = vmatmul.mubr.msk.f32.gmra.mrb[18].mxu0 %vm378_vm0, %v6164_v5 }
 0x140   : > { %5024 = vmatprep.mubr.msk.f32.mxu1 %vm378_vm0, %v6929_v39  ;;  %5221 = vmatprep.mubr.msk.f32.mxu0 %vm378_vm0, %v6168_v26 }
 0x143   : > { %5025 = vmatmul.mubr.msk.f32.gmra.mrb[22].mxu1 %vm378_vm0, %v6931_v42  ;;  %5222 = vmatmul.mubr.msk.f32.gmra.mrb[20].mxu0 %vm378_vm0, %v6180_v3 }
 0x144   : > { %5027 = vmatprep.mubr.msk.f32.mxu1 %vm378_vm0, %v6933_v62  ;;  %5224 = vmatprep.mubr.msk.f32.mxu0 %vm378_vm0, %v6184_v0 }
 0x147   : > { %5028 = vmatmul.mubr.msk.f32.gmra.mrb[24].mxu1 %vm378_vm0, %v6935_v21  ;;  %5225 = vmatmul.mubr.msk.f32.gmra.mrb[22].mxu0 %vm378_vm0, %v6196_v59 }
 0x148   : > { %5030 = vmatprep.mubr.msk.f32.mxu1 %vm378_vm0, %v6937_v29  ;;  %5227 = vmatprep.mubr.msk.f32.mxu0 %vm378_vm0, %v6200_v55 }
 0x14b   : > { %5031 = vmatmul.mubr.msk.f32.gmra.mrb[26].mxu1 %vm378_vm0, %v6939_v30  ;;  %5228 = vmatmul.mubr.msk.f32.gmra.mrb[24].mxu0 %vm378_vm0, %v6212_v51 }
 0x14c   : > { %5033 = vmatprep.mubr.msk.f32.mxu1 %vm378_vm0, %v6940_v31  ;;  %5230 = vmatprep.mubr.msk.f32.mxu0 %vm378_vm0, %v6216_v32  ;;  %v3540_v32 = vld [vmem:[#allocation2 + $0x231] sm:$0xff] }
 0x14f   : > { %5034 = vmatmul.mubr.msk.f32.gmra.mrb[28].mxu1 %vm378_vm0, %v6942_v13  ;;  %5231 = vmatmul.mubr.msk.f32.gmra.mrb[26].mxu0 %vm378_vm0, %v6914_v25 }
 0x150   : > { %5036 = vmatprep.mubr.msk.f32.mxu1 %vm378_vm0, %v6527_v33  ;;  %5233 = vmatprep.mubr.msk.f32.mxu0 %vm378_vm0, %v6943_v41 }
 0x153   : > { %5037 = vmatmul.mubr.msk.f32.gmra.mrb[30].mxu1 %vm378_vm0, %v6537_v46  ;;  %5234 = vmatmul.mubr.msk.f32.gmra.mrb[28].mxu0 %vm378_vm0, %v6944_v47 }
 0x154   : > { %5236 = vmatprep.mubr.msk.f32.mxu0 %vm378_vm0, %v3539_v45 }
 0x157   : > { %5237 = vmatmul.mubr.msk.f32.gmra.mrb[30].mxu0 %vm378_vm0, %v3540_v32 }
 0x1ca   : > { %v4943_v48 = vpop.f32.mrb[0].mxu1 }
 0x1cb   : > { %v1773_v50 = vpop.f32.mrb[1].mxu1 }
 0x1ce   : > { %v4946_v51 = vpop.f32.mrb[2].mxu1 }
 0x1cf   : > { %v1783_v52 = vpop.f32.mrb[3].mxu1 }
 0x1d2   : > { %v4949_v53 = vpop.f32.mrb[4].mxu1 }
 0x1d3   : > { %v1793_v54 = vpop.f32.mrb[5].mxu1 }
 0x1d6   : > { %v4952_v55 = vpop.f32.mrb[6].mxu1 }
 0x1d7   : > { %v1803_v56 = vpop.f32.mrb[7].mxu1 }
 0x1da   : > { %v6667_v58 = vpop.f32.mrb[8].mxu1 }
 0x1db   : > { %v6669_v59 = vpop.f32.mrb[9].mxu1 }
 0x1de   : > { %v6671_v60 = vpop.f32.mrb[10].mxu1 }
 0x1df   : > { %v6673_v61 = vpop.f32.mrb[11].mxu1 }
 0x1e2   : > { %v6675_v63 = vpop.f32.mrb[12].mxu1 }
 0x1e3   : > { %v6677_v0 = vpop.f32.mrb[13].mxu1 }
 0x1e6   : > { %v6679_v2 = vpop.f32.mrb[14].mxu1 }
 0x1e7   : > { %v6681_v7 = vpop.f32.mrb[15].mxu1 }
 0x1ee   : > { %v5193_v10 = vpop.f32.mrb[0].mxu0 }
 0x1ef   : > { %v5241_v11 = vadd.f32 %v5193_v10, %v4943_v48  ;;  %v3704_v12 = vpop.f32.mrb[1].mxu0 }
 0x1f0   : > { %v5242_v14 = vadd.f32 %v3704_v12, %v1773_v50 }
 0x1f1   : > { %3896 = vst.msk [vmem:[%s6688_s28 + $0x8] sm:$0xff] %vm378_vm0, %v5241_v11  ;;  %v3928_v15 = vsel %vm378_vm0, %v5241_v11, 0.0  ;;  %v3997_v16 = vmul.f32 %v5241_v11, %v5241_v11 }
 0x1f2   : > { %3895 = vst.msk [vmem:[%s6688_s28] sm:$0xff] %vm378_vm0, %v5242_v14  ;;  %v3927_v17 = vsel %vm378_vm0, %v5242_v14, 0.0  ;;  %v3996_v18 = vmul.f32 %v5242_v14, %v5242_v14  ;;  %v5196_v27 = vpop.f32.mrb[2].mxu0 }
 0x1f3   : > { %v4029_v19 = vsel %vm378_vm0, %v3997_v16, 0.0  ;;  %v3929_v20 = vadd.f32 %v3928_v15, %v3927_v17  ;;  %v5243_v22 = vadd.f32 %v5196_v27, %v4946_v51  ;;  %v3714_v5 = vpop.f32.mrb[3].mxu0 }
 0x1f4   : > { %v4028_v24 = vsel %vm378_vm0, %v3996_v18, 0.0  ;;  %v5244_v26 = vadd.f32 %v3714_v5, %v1783_v52 }
 0x1f5   : > { %v4030_v28 = vadd.f32 %v4029_v19, %v4028_v24  ;;  %3898 = vst.msk [vmem:[%s6688_s28 + $0x18] sm:$0xff] %vm378_vm0, %v5243_v22  ;;  %v3999_v3 = vmul.f32 %v5243_v22, %v5243_v22  ;;  %v3932_v57 = vsel %vm378_vm0, %v5243_v22, 0.0 }
 0x1f6   : > { %3897 = vst.msk [vmem:[%s6688_s28 + $0x10] sm:$0xff] %vm378_vm0, %v5244_v26  ;;  %v3930_v9 = vsel %vm378_vm0, %v5244_v26, 0.0  ;;  %v3998_v43 = vmul.f32 %v5244_v26, %v5244_v26  ;;  %v5199_v1 = vpop.f32.mrb[4].mxu0 }
 0x1f7   : > { %v3931_v37 = vadd.f32 %v3930_v9, %v3929_v20  ;;  %v5245_v25 = vadd.f32 %v5199_v1, %v4949_v53  ;;  %v3724_v34 = vpop.f32.mrb[5].mxu0  ;;  %v4033_v21 = vsel %vm378_vm0, %v3999_v3, 0.0 }
 0x1f8   : > { %v4031_v39 = vsel %vm378_vm0, %v3998_v43, 0.0  ;;  %v5246_v42 = vadd.f32 %v3724_v34, %v1793_v54 }
 0x1f9   : > { %v4032_v62 = vadd.f32 %v4031_v39, %v4030_v28  ;;  %3900 = vst.msk [vmem:[%s6688_s28 + $0x28] sm:$0xff] %vm378_vm0, %v5245_v25  ;;  %v3933_v8 = vadd.f32 %v3932_v57, %v3931_v37  ;;  %v4001_v23 = vmul.f32 %v5245_v25, %v5245_v25  ;;  %v3936_v46 = vsel %vm378_vm0, %v5245_v25, 0.0 }
 0x1fa   : > { %3899 = vst.msk [vmem:[%s6688_s28 + $0x20] sm:$0xff] %vm378_vm0, %v5246_v42  ;;  %v3934_v29 = vsel %vm378_vm0, %v5246_v42, 0.0  ;;  %v4000_v6 = vmul.f32 %v5246_v42, %v5246_v42  ;;  %v5202_v30 = vpop.f32.mrb[6].mxu0 }
 0x1fb   : > { %v3935_v31 = vadd.f32 %v3934_v29, %v3933_v8  ;;  %v4034_v33 = vadd.f32 %v4033_v21, %v4032_v62  ;;  %v5247_v44 = vadd.f32 %v5202_v30, %v4952_v55  ;;  %v3734_v13 = vpop.f32.mrb[7].mxu0  ;;  %v4037_v38 = vsel %vm378_vm0, %v4001_v23, 0.0 }
 0x1fc   : > { %v4035_v4 = vsel %vm378_vm0, %v4000_v6, 0.0  ;;  %v5248_v49 = vadd.f32 %v3734_v13, %v1803_v56 }
 0x1fd   : > { %v4036_v35 = vadd.f32 %v4035_v4, %v4034_v33  ;;  %3902 = vst.msk [vmem:[%s6688_s28 + $0x38] sm:$0xff] %vm378_vm0, %v5247_v44  ;;  %v3937_v36 = vadd.f32 %v3936_v46, %v3935_v31  ;;  %v4003_v40 = vmul.f32 %v5247_v44, %v5247_v44  ;;  %v3940_v52 = vsel %vm378_vm0, %v5247_v44, 0.0 }
 0x1fe   : > { %3901 = vst.msk [vmem:[%s6688_s28 + $0x30] sm:$0xff] %vm378_vm0, %v5248_v49  ;;  %v3938_v41 = vsel %vm378_vm0, %v5248_v49, 0.0  ;;  %v4002_v45 = vmul.f32 %v5248_v49, %v5248_v49  ;;  %v5205_v47 = vpop.f32.mrb[8].mxu0 }
 0x1ff   : > { %v3939_v32 = vadd.f32 %v3938_v41, %v3937_v36  ;;  %v4038_v48 = vadd.f32 %v4037_v38, %v4036_v35  ;;  %v5249_v50 = vadd.f32 %v5205_v47, %v6667_v58  ;;  %v3744_v51 = vpop.f32.mrb[9].mxu0  ;;  %v4041_v10 = vsel %vm378_vm0, %v4003_v40, 0.0 }
 0x200   : > { %v4039_v53 = vsel %vm378_vm0, %v4002_v45, 0.0  ;;  %v5250_v54 = vadd.f32 %v3744_v51, %v6669_v59 }
 0x201   : > { %v4040_v55 = vadd.f32 %v4039_v53, %v4038_v48  ;;  %3904 = vst.msk [vmem:[%s6688_s28 + $0x48] sm:$0xff] %vm378_vm0, %v5249_v50  ;;  %v3941_v56 = vadd.f32 %v3940_v52, %v3939_v32  ;;  %v4005_v11 = vmul.f32 %v5249_v50, %v5249_v50  ;;  %v3944_v18 = vsel %vm378_vm0, %v5249_v50, 0.0 }
 0x202   : > { %3903 = vst.msk [vmem:[%s6688_s28 + $0x40] sm:$0xff] %vm378_vm0, %v5250_v54  ;;  %v3942_v58 = vsel %vm378_vm0, %v5250_v54, 0.0  ;;  %v4004_v12 = vmul.f32 %v5250_v54, %v5250_v54  ;;  %v5208_v14 = vpop.f32.mrb[10].mxu0 }
 0x203   : > { %v3943_v15 = vadd.f32 %v3942_v58, %v3941_v56  ;;  %v4042_v16 = vadd.f32 %v4041_v10, %v4040_v55  ;;  %v5251_v17 = vadd.f32 %v5208_v14, %v6671_v60  ;;  %v3754_v59 = vpop.f32.mrb[11].mxu0  ;;  %v4045_v5 = vsel %vm378_vm0, %v4005_v11, 0.0 }
 0x204   : > { %v4043_v27 = vsel %vm378_vm0, %v4004_v12, 0.0  ;;  %v5252_v19 = vadd.f32 %v3754_v59, %v6673_v61 }
 0x205   : > { %v4044_v20 = vadd.f32 %v4043_v27, %v4042_v16  ;;  %3906 = vst.msk [vmem:[%s6688_s28 + $0x58] sm:$0xff] %vm378_vm0, %v5251_v17  ;;  %v3945_v22 = vadd.f32 %v3944_v18, %v3943_v15  ;;  %v4007_v24 = vmul.f32 %v5251_v17, %v5251_v17  ;;  %v3948_v1 = vsel %vm378_vm0, %v5251_v17, 0.0 }
 0x206   : > { %3905 = vst.msk [vmem:[%s6688_s28 + $0x50] sm:$0xff] %vm378_vm0, %v5252_v19  ;;  %v3946_v60 = vsel %vm378_vm0, %v5252_v19, 0.0  ;;  %v4006_v26 = vmul.f32 %v5252_v19, %v5252_v19  ;;  %v5211_v28 = vpop.f32.mrb[12].mxu0 }
 0x207   : > { %v3947_v3 = vadd.f32 %v3946_v60, %v3945_v22  ;;  %v4046_v9 = vadd.f32 %v4045_v5, %v4044_v20  ;;  %v5253_v43 = vadd.f32 %v5211_v28, %v6675_v63  ;;  %v3764_v61 = vpop.f32.mrb[13].mxu0  ;;  %v4049_v39 = vsel %vm378_vm0, %v4007_v24, 0.0 }
 0x208   : > { %v4047_v37 = vsel %vm378_vm0, %v4006_v26, 0.0  ;;  %v5254_v25 = vadd.f32 %v3764_v61, %v6677_v0 }
 0x209   : > { %v4048_v34 = vadd.f32 %v4047_v37, %v4046_v9  ;;  %3908 = vst.msk [vmem:[%s6688_s28 + $0x68] sm:$0xff] %vm378_vm0, %v5253_v43  ;;  %v3949_v57 = vadd.f32 %v3948_v1, %v3947_v3  ;;  %v4009_v42 = vmul.f32 %v5253_v43, %v5253_v43  ;;  %v3952_v31 = vsel %vm378_vm0, %v5253_v43, 0.0 }
 0x20a   : > { %3907 = vst.msk [vmem:[%s6688_s28 + $0x60] sm:$0xff] %vm378_vm0, %v5254_v25  ;;  %v3950_v62 = vsel %vm378_vm0, %v5254_v25, 0.0  ;;  %v4008_v63 = vmul.f32 %v5254_v25, %v5254_v25  ;;  %v5017_v8 = vpop.f32.mrb[16].mxu1  ;;  %v5214_v21 = vpop.f32.mrb[14].mxu0 }
 0x20b   : > { %v3951_v23 = vadd.f32 %v3950_v62, %v3949_v57  ;;  %v4050_v29 = vadd.f32 %v4049_v39, %v4048_v34  ;;  %v5255_v0 = vadd.f32 %v5214_v21, %v6679_v2  ;;  %v2239_v6 = vpop.f32.mrb[17].mxu1  ;;  %v3774_v30 = vpop.f32.mrb[15].mxu0  ;;  %v4053_v4 = vsel %vm378_vm0, %v4009_v42, 0.0 }
 0x20c   : > { %v4051_v33 = vsel %vm378_vm0, %v4008_v63, 0.0  ;;  %v5256_v44 = vadd.f32 %v3774_v30, %v6681_v7 }
 0x20d   : > { %v4052_v13 = vadd.f32 %v4051_v33, %v4050_v29  ;;  %3910 = vst.msk [vmem:[%s6688_s28 + $0x78] sm:$0xff] %vm378_vm0, %v5255_v0  ;;  %v3953_v46 = vadd.f32 %v3952_v31, %v3951_v23  ;;  %v4011_v49 = vmul.f32 %v5255_v0, %v5255_v0  ;;  %v3956_v32 = vsel %vm378_vm0, %v5255_v0, 0.0 }
 0x20e   : > { %3909 = vst.msk [vmem:[%s6688_s28 + $0x70] sm:$0xff] %vm378_vm0, %v5256_v44  ;;  %v3954_v2 = vsel %vm378_vm0, %v5256_v44, 0.0  ;;  %v4010_v35 = vmul.f32 %v5256_v44, %v5256_v44  ;;  %v5020_v36 = vpop.f32.mrb[18].mxu1  ;;  %v5217_v38 = vpop.f32.mrb[16].mxu0 }
 0x20f   : > { %v3955_v40 = vadd.f32 %v3954_v2, %v3953_v46  ;;  %v4054_v41 = vadd.f32 %v4053_v4, %v4052_v13  ;;  %v5257_v45 = vadd.f32 %v5217_v38, %v5017_v8  ;;  %v2249_v7 = vpop.f32.mrb[19].mxu1  ;;  %v3784_v47 = vpop.f32.mrb[17].mxu0  ;;  %v4057_v53 = vsel %vm378_vm0, %v4011_v49, 0.0 }
 0x210   : > { %v4055_v48 = vsel %vm378_vm0, %v4010_v35, 0.0  ;;  %v5258_v50 = vadd.f32 %v3784_v47, %v2239_v6 }
 0x211   : > { %v4056_v51 = vadd.f32 %v4055_v48, %v4054_v41  ;;  %3912 = vst.msk [vmem:[%s6688_s28 + $0x88] sm:$0xff] %vm378_vm0, %v5257_v45  ;;  %v3957_v52 = vadd.f32 %v3956_v32, %v3955_v40  ;;  %v4013_v54 = vmul.f32 %v5257_v45, %v5257_v45  ;;  %v3960_v17 = vsel %vm378_vm0, %v5257_v45, 0.0 }
 0x212   : > { %3911 = vst.msk [vmem:[%s6688_s28 + $0x80] sm:$0xff] %vm378_vm0, %v5258_v50  ;;  %v3958_v55 = vsel %vm378_vm0, %v5258_v50, 0.0  ;;  %v4012_v56 = vmul.f32 %v5258_v50, %v5258_v50  ;;  %v5023_v10 = vpop.f32.mrb[20].mxu1  ;;  %v5220_v11 = vpop.f32.mrb[18].mxu0 }
 0x213   : > { %v3959_v58 = vadd.f32 %v3958_v55, %v3957_v52  ;;  %v4058_v12 = vadd.f32 %v4057_v53, %v4056_v51  ;;  %v5259_v14 = vadd.f32 %v5220_v11, %v5020_v36  ;;  %v2259_v15 = vpop.f32.mrb[21].mxu1  ;;  %v3794_v16 = vpop.f32.mrb[19].mxu0  ;;  %v4061_v20 = vsel %vm378_vm0, %v4013_v54, 0.0 }
 0x214   : > { %v4059_v59 = vsel %vm378_vm0, %v4012_v56, 0.0  ;;  %v5260_v18 = vadd.f32 %v3794_v16, %v2249_v7 }
 0x215   : > { %v4060_v27 = vadd.f32 %v4059_v59, %v4058_v12  ;;  %3914 = vst.msk [vmem:[%s6688_s28 + $0x98] sm:$0xff] %vm378_vm0, %v5259_v14  ;;  %v3961_v19 = vadd.f32 %v3960_v17, %v3959_v58  ;;  %v4015_v22 = vmul.f32 %v5259_v14, %v5259_v14  ;;  %v3964_v1 = vsel %vm378_vm0, %v5259_v14, 0.0 }
 0x216   : > { %3913 = vst.msk [vmem:[%s6688_s28 + $0x90] sm:$0xff] %vm378_vm0, %v5260_v18  ;;  %v3962_v5 = vsel %vm378_vm0, %v5260_v18, 0.0  ;;  %v4014_v24 = vmul.f32 %v5260_v18, %v5260_v18  ;;  %v5026_v60 = vpop.f32.mrb[22].mxu1  ;;  %v5223_v26 = vpop.f32.mrb[20].mxu0 }
 0x217   : > { %v3963_v28 = vadd.f32 %v3962_v5, %v3961_v19  ;;  %v4062_v3 = vadd.f32 %v4061_v20, %v4060_v27  ;;  %v5261_v9 = vadd.f32 %v5223_v26, %v5023_v10  ;;  %v2269_v43 = vpop.f32.mrb[23].mxu1  ;;  %v3804_v61 = vpop.f32.mrb[21].mxu0  ;;  %v4065_v39 = vsel %vm378_vm0, %v4015_v22, 0.0 }
 0x218   : > { %v4063_v37 = vsel %vm378_vm0, %v4014_v24, 0.0  ;;  %v5262_v25 = vadd.f32 %v3804_v61, %v2259_v15 }
 0x219   : > { %v4064_v34 = vadd.f32 %v4063_v37, %v4062_v3  ;;  %3916 = vst.msk [vmem:[%s6688_s28 + $0xa8] sm:$0xff] %vm378_vm0, %v5261_v9  ;;  %v3965_v57 = vadd.f32 %v3964_v1, %v3963_v28  ;;  %v4017_v42 = vmul.f32 %v5261_v9, %v5261_v9  ;;  %v3968_v31 = vsel %vm378_vm0, %v5261_v9, 0.0 }
 0x21a   : > { %3915 = vst.msk [vmem:[%s6688_s28 + $0xa0] sm:$0xff] %vm378_vm0, %v5262_v25  ;;  %v3966_v62 = vsel %vm378_vm0, %v5262_v25, 0.0  ;;  %v4016_v63 = vmul.f32 %v5262_v25, %v5262_v25  ;;  %v5029_v8 = vpop.f32.mrb[24].mxu1  ;;  %v5226_v21 = vpop.f32.mrb[22].mxu0 }
 0x21b   : > { %v3967_v23 = vadd.f32 %v3966_v62, %v3965_v57  ;;  %v4066_v29 = vadd.f32 %v4065_v39, %v4064_v34  ;;  %v5263_v0 = vadd.f32 %v5226_v21, %v5026_v60  ;;  %v2279_v6 = vpop.f32.mrb[25].mxu1  ;;  %v3814_v30 = vpop.f32.mrb[23].mxu0  ;;  %v4069_v4 = vsel %vm378_vm0, %v4017_v42, 0.0 }
 0x21c   : > { %v4067_v33 = vsel %vm378_vm0, %v4016_v63, 0.0  ;;  %v5264_v44 = vadd.f32 %v3814_v30, %v2269_v43 }
 0x21d   : > { %v4068_v13 = vadd.f32 %v4067_v33, %v4066_v29  ;;  %3918 = vst.msk [vmem:[%s6688_s28 + $0xb8] sm:$0xff] %vm378_vm0, %v5263_v0  ;;  %v3969_v46 = vadd.f32 %v3968_v31, %v3967_v23  ;;  %v4019_v49 = vmul.f32 %v5263_v0, %v5263_v0  ;;  %v3972_v32 = vsel %vm378_vm0, %v5263_v0, 0.0 }
 0x21e   : > { %3917 = vst.msk [vmem:[%s6688_s28 + $0xb0] sm:$0xff] %vm378_vm0, %v5264_v44  ;;  %v3970_v2 = vsel %vm378_vm0, %v5264_v44, 0.0  ;;  %v4018_v35 = vmul.f32 %v5264_v44, %v5264_v44  ;;  %v5032_v36 = vpop.f32.mrb[26].mxu1  ;;  %v5229_v38 = vpop.f32.mrb[24].mxu0 }
 0x21f   : > { %v3971_v40 = vadd.f32 %v3970_v2, %v3969_v46  ;;  %v4070_v41 = vadd.f32 %v4069_v4, %v4068_v13  ;;  %v5265_v45 = vadd.f32 %v5229_v38, %v5029_v8  ;;  %v2289_v7 = vpop.f32.mrb[27].mxu1  ;;  %v3824_v47 = vpop.f32.mrb[25].mxu0  ;;  %v4073_v53 = vsel %vm378_vm0, %v4019_v49, 0.0 }
 0x220   : > { %v4071_v48 = vsel %vm378_vm0, %v4018_v35, 0.0  ;;  %v5266_v50 = vadd.f32 %v3824_v47, %v2279_v6 }
 0x221   : > { %v4072_v51 = vadd.f32 %v4071_v48, %v4070_v41  ;;  %3920 = vst.msk [vmem:[%s6688_s28 + $0xc8] sm:$0xff] %vm378_vm0, %v5265_v45  ;;  %v3973_v52 = vadd.f32 %v3972_v32, %v3971_v40  ;;  %v4021_v54 = vmul.f32 %v5265_v45, %v5265_v45  ;;  %v3976_v17 = vsel %vm378_vm0, %v5265_v45, 0.0 }
 0x222   : > { %3919 = vst.msk [vmem:[%s6688_s28 + $0xc0] sm:$0xff] %vm378_vm0, %v5266_v50  ;;  %v3974_v55 = vsel %vm378_vm0, %v5266_v50, 0.0  ;;  %v4020_v56 = vmul.f32 %v5266_v50, %v5266_v50  ;;  %v5035_v10 = vpop.f32.mrb[28].mxu1  ;;  %v5232_v11 = vpop.f32.mrb[26].mxu0  ;;  %v4097_v50 = vlaneseq }
 0x223   : > { %v3975_v58 = vadd.f32 %v3974_v55, %v3973_v52  ;;  %v4074_v12 = vadd.f32 %v4073_v53, %v4072_v51  ;;  %v5267_v14 = vadd.f32 %v5232_v11, %v5032_v36  ;;  %v2299_v15 = vpop.f32.mrb[29].mxu1  ;;  %v3834_v16 = vpop.f32.mrb[27].mxu0  ;;  %v4077_v20 = vsel %vm378_vm0, %v4021_v54, 0.0 }
 0x224   : > { %v4075_v59 = vsel %vm378_vm0, %v4020_v56, 0.0  ;;  %v5268_v18 = vadd.f32 %v3834_v16, %v2289_v7  ;;  %v4098_v55 = vshrl.u32 %v4097_v50, 7 }
 0x225   : > { %v4076_v27 = vadd.f32 %v4075_v59, %v4074_v12  ;;  %3922 = vst.msk [vmem:[%s6688_s28 + $0xd8] sm:$0xff] %vm378_vm0, %v5267_v14  ;;  %v3977_v19 = vadd.f32 %v3976_v17, %v3975_v58  ;;  %v4023_v22 = vmul.f32 %v5267_v14, %v5267_v14  ;;  %v3980_v1 = vsel %vm378_vm0, %v5267_v14, 0.0 }
 0x226   : > { %3921 = vst.msk [vmem:[%s6688_s28 + $0xd0] sm:$0xff] %vm378_vm0, %v5268_v18  ;;  %v3978_v5 = vsel %vm378_vm0, %v5268_v18, 0.0  ;;  %v4022_v24 = vmul.f32 %v5268_v18, %v5268_v18  ;;  %v5038_v60 = vpop.f32.mrb[30].mxu1  ;;  %v5235_v26 = vpop.f32.mrb[28].mxu0  ;;  %vm4099_vm1 = vcmp.eq.s32.totalorder %v4098_v55, 0 }
 0x227   : > { %v3979_v28 = vadd.f32 %v3978_v5, %v3977_v19  ;;  %v4078_v3 = vadd.f32 %v4077_v20, %v4076_v27  ;;  %v5269_v9 = vadd.f32 %v5235_v26, %v5035_v10  ;;  %v2309_v43 = vpop.f32.mrb[31].mxu1  ;;  %v3844_v61 = vpop.f32.mrb[29].mxu0  ;;  %v4081_v39 = vsel %vm378_vm0, %v4023_v22, 0.0 }
 0x228   : > { %v4079_v37 = vsel %vm378_vm0, %v4022_v24, 0.0  ;;  %v5270_v25 = vadd.f32 %v3844_v61, %v2299_v15 }
 0x229   : > { %v4080_v34 = vadd.f32 %v4079_v37, %v4078_v3  ;;  %3924 = vst.msk [vmem:[%s6688_s28 + $0xe8] sm:$0xff] %vm378_vm0, %v5269_v9  ;;  %v3981_v57 = vadd.f32 %v3980_v1, %v3979_v28  ;;  %v4025_v42 = vmul.f32 %v5269_v9, %v5269_v9  ;;  %v3984_v6 = vsel %vm378_vm0, %v5269_v9, 0.0 }
 0x22a   : > { %3923 = vst.msk [vmem:[%s6688_s28 + $0xe0] sm:$0xff] %vm378_vm0, %v5270_v25  ;;  %v3982_v62 = vsel %vm378_vm0, %v5270_v25, 0.0  ;;  %v4024_v63 = vmul.f32 %v5270_v25, %v5270_v25  ;;  %v5238_v8 = vpop.f32.mrb[30].mxu0 }
 0x22b   : > { %v3983_v21 = vadd.f32 %v3982_v62, %v3981_v57  ;;  %v4082_v23 = vadd.f32 %v4081_v39, %v4080_v34  ;;  %v5271_v29 = vadd.f32 %v5238_v8, %v5038_v60  ;;  %v3854_v0 = vpop.f32.mrb[31].mxu0  ;;  %v4085_v13 = vsel %vm378_vm0, %v4025_v42, 0.0 }
 0x22c   : > { %v4083_v30 = vsel %vm378_vm0, %v4024_v63, 0.0  ;;  %v5272_v31 = vadd.f32 %v3854_v0, %v2309_v43 }
 0x22d   : > { %v4084_v33 = vadd.f32 %v4083_v30, %v4082_v23  ;;  %3926 = vst.msk [vmem:[%s6688_s28 + $0xf8] sm:$0xff] %vm378_vm0, %v5271_v29  ;;  %v3985_v44 = vadd.f32 %v3984_v6, %v3983_v21  ;;  %v4027_v46 = vmul.f32 %v5271_v29, %v5271_v29  ;;  %v3988_v36 = vsel %vm378_vm0, %v5271_v29, 0.0 }
 0x22e   : > { %3925 = vst.msk [vmem:[%s6688_s28 + $0xf0] sm:$0xff] %vm378_vm0, %v5272_v31  ;;  %v3986_v4 = vsel %vm378_vm0, %v5272_v31, 0.0  ;;  %v4026_v49 = vmul.f32 %v5272_v31, %v5272_v31 }
 0x22f   : > { %v3987_v2 = vadd.f32 %v3986_v4, %v3985_v44  ;;  %v4086_v35 = vadd.f32 %v4085_v13, %v4084_v33  ;;  %v4089_v45 = vsel %vm378_vm0, %v4027_v46, 0.0 }
 0x230   : > { %v4087_v38 = vsel %vm378_vm0, %v4026_v49, 0.0 }
 0x231   : > { %v3989_v40 = vadd.f32 %v3988_v36, %v3987_v2  ;;  %v4088_v41 = vadd.f32 %v4087_v38, %v4086_v35 }
 0x233   : > { %v3990_v7 = vrot.slane %v3989_v40, 4  ;;  %v4090_v47 = vadd.f32 %v4089_v45, %v4088_v41 }
 0x235   : > { %v3991_v32 = vadd.f32 %v3990_v7, %v3989_v40  ;;  %v4091_v48 = vrot.slane %v4090_v47, 4 }
 0x237   : > { %v3992_v51 = vrot.slane %v3991_v32, 2  ;;  %v4092_v52 = vadd.f32 %v4091_v48, %v4090_v47 }
 0x239   : > { %v3993_v53 = vadd.f32 %v3992_v51, %v3991_v32  ;;  %v4093_v54 = vrot.slane %v4092_v52, 2 }
 0x23b   : > { %v3994_v56 = vrot.slane %v3993_v53, 1  ;;  %v4094_v10 = vadd.f32 %v4093_v54, %v4092_v52 }
 0x23d   : > { %v4095_v11 = vrot.slane %v4094_v10, 1  ;;  %v3995_v58 = vadd.f32 %v3994_v56, %v3993_v53 }
 0x23f   : > { %v4096_v12 = vadd.f32 %v4095_v11, %v4094_v10 }
 0x241   : > { %v4100_v14 = vsel %vm4099_vm1, %v3995_v58, %v4096_v12 }
 0x242   : > { %4101 = vst.msk [vmem:[%s235_s7] sm:$0xff] %vm378_vm0, %v4100_v14 }
 0x243 PF: > { %s16_s18 = sadd.s32 1, %s5513_s18  }
 0x244   : > { %p13_p4 = scmp.ge.s32.totalorder %s16_s18, 4  }
 0x246   :  { %15 = sbr.rel (!%p13_p4) target bundleno = 1 (0x1), region = 80 }

</bundles_post_ra>
